<compile_context>
chip_gen: v7x
topology: tpu7x:2x2x1
jax: 0.10.0
libtpu: 0.0.40
codegen_flags: <defaults>
</compile_context>

<pallas_src>
import functools

import jax
import jax.numpy as jnp
from jax.experimental import pallas as pl
from jax.experimental.pallas import tpu as pltpu


# ----------------------------------------------------------------------------
# Config (small but consistent with the module's shapes)
# ----------------------------------------------------------------------------
class Conf:
    d_model = 32
    ffn_dim = 64
    n_shared = 2
    n_experts = 4
    top_k = 2


_SQRT1_2 = 0.7071067811865476


def _gelu_exact(x):
    # PyTorch F.gelu default ("none") is the exact erf-based GELU.
    return 0.5 * x * (1.0 + jax.lax.erf(x * _SQRT1_2))


# ----------------------------------------------------------------------------
# Pallas kernel: gate + top-k + fused (shared+routed) expert MLPs + combine
# ----------------------------------------------------------------------------
def moe_kernel(x_ref, gw_ref, gb_ref, w1_ref, b1_ref, w2_ref,
               sb2_ref, rb2_ref, smask_ref, exp_ref, o_ref,
               *, n_experts, top_k):
    x = x_ref[...]                                     # (TT, D) f32
    tt = x.shape[0]

    # ---- gate: logits -> softmax -> top-k combine weights (all f32) ---------
    logits = jnp.dot(x, gw_ref[...],
                     preferred_element_type=jnp.float32) + gb_ref[...]
    mmax = jnp.max(logits, axis=-1, keepdims=True)
    ex = jnp.exp(logits - mmax)
    denom = jnp.sum(ex, axis=-1, keepdims=True)
    probs = ex * pl.reciprocal(denom, approx=True)     # EUP divide (free slot)

    col = jax.lax.broadcasted_iota(jnp.int32, (tt, n_experts), 1)
    weights = jnp.zeros((tt, n_experts), jnp.float32)  # routed combine weights
    remaining = probs
    for _ in range(top_k):                             # static, small top_k
        cur_max = jnp.max(remaining, axis=-1, keepdims=True)
        is_max = remaining == cur_max
        # first index attaining the max (matches torch.topk tie order)
        first_idx = jnp.min(jnp.where(is_max, col, n_experts),
                            axis=-1, keepdims=True)
        sel = col == first_idx
        weights = weights + jnp.where(sel, probs, 0.0)
        remaining = jnp.where(sel, -jnp.inf, remaining)

    # ---- fused expert layer 1: one wide bf16 MXU pass over ALL experts ------
    xb = x.astype(jnp.bfloat16)
    h = jnp.dot(xb, w1_ref[...],
                preferred_element_type=jnp.float32) + b1_ref[...]
    h = _gelu_exact(h)                                 # (TT, E_tot*F) f32

    # Per-hidden-column combine weights: 1.0 on shared-expert columns,
    # routed top-k prob on routed columns (exact: 0/1 expansion matmul).
    cexp = smask_ref[...] + jnp.dot(weights, exp_ref[...],
                                    preferred_element_type=jnp.float32)
    hs = (h * cexp).astype(jnp.bfloat16)

    # ---- fused expert layer 2 + weighted second biases -----------------------
    out = jnp.dot(hs, w2_ref[...], preferred_element_type=jnp.float32)
    out = out + sb2_ref[...] + jnp.dot(weights, rb2_ref[...],
                                       preferred_element_type=jnp.float32)

    o_ref[...] = out.astype(o_ref.dtype)


def _full_spec(arr):
    nd = arr.ndim
    return pl.BlockSpec(arr.shape, lambda i, _nd=nd: (0,) * _nd)


def deepseek_moe_forward(x_tokens, params, *, top_k, token_tile=128):
    """x_tokens: (N, D) float32; params: dict from pack_params()."""
    N, D = x_tokens.shape
    n_experts = params["gw"].shape[1]

    n_pad = int(pl.cdiv(N, token_tile)) * token_tile
    if n_pad != N:
        x_in = jnp.zeros((n_pad, D), x_tokens.dtype).at[:N].set(x_tokens)
    else:
        x_in = x_tokens

    # bf16 at the pallas_call boundary for the big expert matmuls (halves DMA
    # bytes, hits MXU bf16 peak); gate weights / biases / masks stay f32.
    weight_args = (
        params["gw"], params["gb"],
        params["w1_all"].astype(jnp.bfloat16), params["b1_all"],
        params["w2_all"].astype(jnp.bfloat16),
        params["shared_b2"], params["rb2"],
        params["shared_mask"], params["expand_r"],
    )

    kernel = functools.partial(moe_kernel, n_experts=n_experts, top_k=top_k)
    in_specs = [pl.BlockSpec((token_tile, D), lambda i: (i, 0))]
    in_specs += [_full_spec(a) for a in weight_args]

    out = pl.pallas_call(
        kernel,
        out_shape=jax.ShapeDtypeStruct((n_pad, D), x_tokens.dtype),
        grid=(n_pad // token_tile,),
        in_specs=in_specs,
        out_specs=pl.BlockSpec((token_tile, D), lambda i: (i, 0)),
        compiler_params=pltpu.CompilerParams(
            dimension_semantics=("parallel",)),
    )(x_in, *weight_args)
    return out[:N]


# ----------------------------------------------------------------------------
# Parameter init (nn.Linear-style, pre-transposed) and fused packing
# ----------------------------------------------------------------------------
def init_params(key, conf):
    D, F = conf.d_model, conf.ffn_dim

    def linear(key, fan_in, fan_out):
        kw, kb = jax.random.split(key)
        bound = 1.0 / (fan_in ** 0.5)
        w = jax.random.uniform(kw, (fan_in, fan_out), jnp.float32, -bound, bound)
        b = jax.random.uniform(kb, (fan_out,), jnp.float32, -bound, bound)
        return w, b

    n_lin = 1 + 2 * conf.n_shared + 2 * conf.n_experts
    keys = iter(jax.random.split(key, n_lin))

    gw, gb = linear(next(keys), D, conf.n_experts)

    def expert_stack(n):
        w1s, b1s, w2s, b2s = [], [], [], []
        for _ in range(n):
            w1, b1 = linear(next(keys), D, F)
            w2, b2 = linear(next(keys), F, D)
            w1s.append(w1); b1s.append(b1); w2s.append(w2); b2s.append(b2)
        return (jnp.stack(w1s), jnp.stack(b1s), jnp.stack(w2s), jnp.stack(b2s))

    sw1, sb1, sw2, sb2 = expert_stack(conf.n_shared)
    rw1, rb1, rw2, rb2 = expert_stack(conf.n_experts)
    return {"gw": gw, "gb": gb.reshape(1, conf.n_experts),
            "sw1": sw1, "sb1": sb1, "sw2": sw2, "sb2": sb2,
            "rw1": rw1, "rb1": rb1, "rw2": rw2, "rb2": rb2}


def pack_params(raw):
    """Stack shared+routed expert weights for the fused two-matmul kernel."""
    sw1, sb1, sw2, sb2 = raw["sw1"], raw["sb1"], raw["sw2"], raw["sb2"]
    rw1, rb1, rw2, rb2 = raw["rw1"], raw["rb1"], raw["rw2"], raw["rb2"]
    n_shared, D, F = sw1.shape
    n_experts = rw1.shape[0]
    e_tot = n_shared + n_experts
    H = e_tot * F

    w1_cat = jnp.concatenate([sw1, rw1], axis=0)                 # (E_tot, D, F)
    w1_all = jnp.transpose(w1_cat, (1, 0, 2)).reshape(D, H)      # (D, E_tot*F)
    b1_all = jnp.concatenate([sb1, rb1], axis=0).reshape(1, H)
    w2_all = jnp.concatenate([sw2, rw2], axis=0).reshape(H, D)   # (E_tot*F, D)

    shared_b2 = jnp.sum(sb2, axis=0, keepdims=True)              # (1, D)
    rb2_stack = rb2                                              # (E, D)

    col = jnp.arange(H)
    shared_mask = (col < n_shared * F).astype(jnp.float32).reshape(1, H)
    owner = col // F - n_shared                                  # routed owner per column
    expand_r = (owner[None, :] == jnp.arange(n_experts)[:, None]).astype(jnp.float32)

    return {"gw": raw["gw"], "gb": raw["gb"],
            "w1_all": w1_all, "b1_all": b1_all, "w2_all": w2_all,
            "shared_b2": shared_b2, "rb2": rb2_stack,
            "shared_mask": shared_mask, "expand_r": expand_r}


# ----------------------------------------------------------------------------
# References
# ----------------------------------------------------------------------------
def _expert_ref(x, w1, b1, w2, b2):
    return jax.nn.gelu(x @ w1 + b1, approximate=False) @ w2 + b2


def ref_forward_module(x, raw, top_k):
    """Pure-f32 replica of the PyTorch forward-loop semantics."""
    n_shared = raw["sw1"].shape[0]
    n_experts = raw["rw1"].shape[0]
    shared = sum(_expert_ref(x, raw["sw1"][s], raw["sb1"][s],
                             raw["sw2"][s], raw["sb2"][s])
                 for s in range(n_shared))
    probs = jax.nn.softmax(x @ raw["gw"] + raw["gb"], axis=-1)
    topk_p, topk_i = jax.lax.top_k(probs, top_k)
    routed = jnp.zeros_like(x)
    for k in range(top_k):
        for e in range(n_experts):
            mask = (topk_i[:, k] == e)[:, None]
            out_e = _expert_ref(x, raw["rw1"][e], raw["rb1"][e],
                                raw["rw2"][e], raw["rb2"][e])
            routed = routed + jnp.where(mask, out_e * topk_p[:, k:k + 1], 0.0)
    # TODO(synk): self.aux_loss is Python-side running state, not part of the
    # forward return value; it is intentionally not computed in the kernel.
    return routed + shared


def ref_forward_kernel_numerics(x, raw, packed, top_k):
    """Replicates the kernel's bf16-matmul numerics in plain JAX (tight check)."""
    bf = lambda a: a.astype(jnp.bfloat16).astype(jnp.float32)
    n_shared = raw["sw1"].shape[0]
    n_experts = raw["rw1"].shape[0]
    F = raw["sw1"].shape[2]

    probs = jax.nn.softmax(x @ raw["gw"] + raw["gb"], axis=-1)
    topk_p, topk_i = jax.lax.top_k(probs, top_k)
    weights = jnp.zeros_like(probs)
    for k in range(top_k):
        weights = weights + jax.nn.one_hot(topk_i[:, k], n_experts) * topk_p[:, k:k + 1]

    h = jax.nn.gelu(bf(x) @ bf(packed["w1_all"]) + packed["b1_all"],
                    approximate=False)
    cexp = jnp.concatenate(
        [jnp.ones((x.shape[0], n_shared * F), jnp.float32),
         jnp.repeat(weights, F, axis=1)], axis=1)
    hs = bf(h * cexp)
    out = hs @ bf(packed["w2_all"])
    out = out + packed["shared_b2"] + weights @ packed["rb2"]
    return out


if __name__ == "__main__":
    conf = Conf()
    batch, seq = 2, 8

    key = jax.random.PRNGKey(0)
    kx, kp = jax.random.split(key)
    x = jax.random.normal(kx, (batch, seq, conf.d_model), jnp.float32)
    raw = init_params(kp, conf)
    packed = pack_params(raw)

    x_tokens = x.reshape(batch * seq, conf.d_model)          # (N, D)
    out_tokens = deepseek_moe_forward(x_tokens, packed,
                                      top_k=conf.top_k, token_tile=128)
    out = out_tokens.reshape(batch, seq, conf.d_model)
    jax.block_until_ready(out)

    with jax.default_matmul_precision("float32"):
        ref_tight = ref_forward_kernel_numerics(x_tokens, raw, packed, conf.top_k)
        ref_exact = ref_forward_module(x_tokens, raw, conf.top_k)

    err_tight = float(jnp.max(jnp.abs(out_tokens - ref_tight)))
    err_exact = float(jnp.max(jnp.abs(out_tokens - ref_exact)))
    # Tight: same bf16 rounding as the kernel (slack only for the approx-recip
    # softmax and MXU accumulation order).  Loose: pure-f32 module semantics.
    assert jnp.allclose(out_tokens, ref_tight, atol=2e-2, rtol=2e-2), err_tight
    assert jnp.allclose(out_tokens, ref_exact, atol=1e-1, rtol=1e-1), err_exact

    print("KERNEL_OK")
</pallas_src>

<mosaic_0001>
module attributes {stable_mosaic.version = 11 : i64} {
  func.func @moe_kernel(%arg0: i32, %arg1: memref<128x32xf32, #tpu.memory_space<vmem>>, %arg2: memref<32x4xf32, #tpu.memory_space<vmem>>, %arg3: memref<1x4xf32, #tpu.memory_space<vmem>>, %arg4: memref<32x384xbf16, #tpu.memory_space<vmem>>, %arg5: memref<1x384xf32, #tpu.memory_space<vmem>>, %arg6: memref<384x32xbf16, #tpu.memory_space<vmem>>, %arg7: memref<1x32xf32, #tpu.memory_space<vmem>>, %arg8: memref<4x32xf32, #tpu.memory_space<vmem>>, %arg9: memref<1x384xf32, #tpu.memory_space<vmem>>, %arg10: memref<4x384xf32, #tpu.memory_space<vmem>>, %arg11: memref<128x32xf32, #tpu.memory_space<vmem>>) attributes {dimension_semantics = [#tpu.dimension_semantics<parallel>], iteration_bounds = array<i64: 1>, scalar_prefetch = 0 : i64, scratch_operands = 0 : i64, tpu.core_type = #tpu.core_type<tc>, window_params = [{transform_indices = @transform_0, window_bounds = array<i64: 128, 32>}, {pipeline_mode = #tpu.pipeline_mode<synchronous>, transform_indices = @transform_1, window_bounds = array<i64: 32, 4>}, {pipeline_mode = #tpu.pipeline_mode<synchronous>, transform_indices = @transform_2, window_bounds = array<i64: 1, 4>}, {pipeline_mode = #tpu.pipeline_mode<synchronous>, transform_indices = @transform_3, window_bounds = array<i64: 32, 384>}, {pipeline_mode = #tpu.pipeline_mode<synchronous>, transform_indices = @transform_4, window_bounds = array<i64: 1, 384>}, {pipeline_mode = #tpu.pipeline_mode<synchronous>, transform_indices = @transform_5, window_bounds = array<i64: 384, 32>}, {pipeline_mode = #tpu.pipeline_mode<synchronous>, transform_indices = @transform_6, window_bounds = array<i64: 1, 32>}, {pipeline_mode = #tpu.pipeline_mode<synchronous>, transform_indices = @transform_7, window_bounds = array<i64: 4, 32>}, {pipeline_mode = #tpu.pipeline_mode<synchronous>, transform_indices = @transform_8, window_bounds = array<i64: 1, 384>}, {pipeline_mode = #tpu.pipeline_mode<synchronous>, transform_indices = @transform_9, window_bounds = array<i64: 4, 384>}, {transform_indices = @transform_10, window_bounds = array<i64: 128, 32>}]} {
    %c0 = arith.constant 0 : index
    %c0_0 = arith.constant 0 : index
    %0 = vector.load %arg1[%c0, %c0_0] : memref<128x32xf32, #tpu.memory_space<vmem>>, vector<128x32xf32>
    %c0_1 = arith.constant 0 : index
    %c0_2 = arith.constant 0 : index
    %1 = vector.load %arg2[%c0_1, %c0_2] : memref<32x4xf32, #tpu.memory_space<vmem>>, vector<32x4xf32>
    %cst = arith.constant dense<0.000000e+00> : vector<128x4xf32>
    %2 = tpu.matmul %0, %1, %cst {dimension_numbers = #tpu.dot_dimension_numbers<[1], [0], [0], [1], [0, 0, 1, 1], [], []>} : vector<128x32xf32>, vector<32x4xf32>, vector<128x4xf32> -> vector<128x4xf32>
    %c0_3 = arith.constant 0 : index
    %c0_4 = arith.constant 0 : index
    %3 = vector.load %arg3[%c0_3, %c0_4] : memref<1x4xf32, #tpu.memory_space<vmem>>, vector<1x4xf32>
    %4 = vector.broadcast %3 : vector<1x4xf32> to vector<128x4xf32>
    %5 = arith.addf %2, %4 : vector<128x4xf32>
    %cst_5 = arith.constant dense<0xFF800000> : vector<128xf32>
    %6 = vector.multi_reduction <maximumf>, %5, %cst_5 [1] : vector<128x4xf32> to vector<128xf32>
    %7 = vector.shape_cast %6 : vector<128xf32> to vector<128x1xf32>
    %8 = vector.broadcast %7 : vector<128x1xf32> to vector<128x4xf32>
    %9 = arith.subf %5, %8 : vector<128x4xf32>
    %10 = math.exp %9 : vector<128x4xf32>
    %cst_6 = arith.constant dense<0.000000e+00> : vector<128xf32>
    %11 = vector.multi_reduction <add>, %10, %cst_6 [1] : vector<128x4xf32> to vector<128xf32>
    %12 = vector.shape_cast %11 : vector<128xf32> to vector<128x1xf32>
    %13 = tpu.reciprocal %12 {approx = true} : vector<128x1xf32> -> vector<128x1xf32>
    %14 = vector.broadcast %13 : vector<128x1xf32> to vector<128x4xf32>
    %15 = arith.mulf %10, %14 : vector<128x4xf32>
    %16 = tpu.iota {dimensions = array<i32: 1>} : vector<128x4xi32>
    %cst_7 = arith.constant 0.000000e+00 : f32
    %17 = vector.broadcast %cst_7 : f32 to vector<128x4xf32>
    %cst_8 = arith.constant dense<0xFF800000> : vector<128xf32>
    %18 = vector.multi_reduction <maximumf>, %15, %cst_8 [1] : vector<128x4xf32> to vector<128xf32>
    %19 = vector.shape_cast %18 : vector<128xf32> to vector<128x1xf32>
    %20 = vector.broadcast %19 : vector<128x1xf32> to vector<128x4xf32>
    %21 = arith.cmpf oeq, %15, %20 : vector<128x4xf32>
    %c4_i32 = arith.constant 4 : i32
    %22 = vector.broadcast %c4_i32 : i32 to vector<128x4xi32>
    %23 = arith.select %21, %16, %22 : vector<128x4xi1>, vector<128x4xi32>
    %cst_9 = arith.constant dense<2147483647> : vector<128xi32>
    %24 = vector.multi_reduction <minsi>, %23, %cst_9 [1] : vector<128x4xi32> to vector<128xi32>
    %25 = vector.shape_cast %24 : vector<128xi32> to vector<128x1xi32>
    %26 = vector.broadcast %25 : vector<128x1xi32> to vector<128x4xi32>
    %27 = arith.cmpi eq, %16, %26 : vector<128x4xi32>
    %cst_10 = arith.constant 0.000000e+00 : f32
    %28 = vector.broadcast %cst_10 : f32 to vector<128x4xf32>
    %29 = arith.select %27, %15, %28 : vector<128x4xi1>, vector<128x4xf32>
    %30 = arith.addf %17, %29 : vector<128x4xf32>
    %cst_11 = arith.constant 0xFF800000 : f32
    %31 = vector.broadcast %cst_11 : f32 to vector<128x4xf32>
    %32 = arith.select %27, %31, %15 : vector<128x4xi1>, vector<128x4xf32>
    %cst_12 = arith.constant dense<0xFF800000> : vector<128xf32>
    %33 = vector.multi_reduction <maximumf>, %32, %cst_12 [1] : vector<128x4xf32> to vector<128xf32>
    %34 = vector.shape_cast %33 : vector<128xf32> to vector<128x1xf32>
    %35 = vector.broadcast %34 : vector<128x1xf32> to vector<128x4xf32>
    %36 = arith.cmpf oeq, %32, %35 : vector<128x4xf32>
    %c4_i32_13 = arith.constant 4 : i32
    %37 = vector.broadcast %c4_i32_13 : i32 to vector<128x4xi32>
    %38 = arith.select %36, %16, %37 : vector<128x4xi1>, vector<128x4xi32>
    %cst_14 = arith.constant dense<2147483647> : vector<128xi32>
    %39 = vector.multi_reduction <minsi>, %38, %cst_14 [1] : vector<128x4xi32> to vector<128xi32>
    %40 = vector.shape_cast %39 : vector<128xi32> to vector<128x1xi32>
    %41 = vector.broadcast %40 : vector<128x1xi32> to vector<128x4xi32>
    %42 = arith.cmpi eq, %16, %41 : vector<128x4xi32>
    %cst_15 = arith.constant 0.000000e+00 : f32
    %43 = vector.broadcast %cst_15 : f32 to vector<128x4xf32>
    %44 = arith.select %42, %15, %43 : vector<128x4xi1>, vector<128x4xf32>
    %45 = arith.addf %30, %44 : vector<128x4xf32>
    %46 = arith.truncf %0 : vector<128x32xf32> to vector<128x32xbf16>
    %c0_16 = arith.constant 0 : index
    %c0_17 = arith.constant 0 : index
    %47 = vector.load %arg4[%c0_16, %c0_17] : memref<32x384xbf16, #tpu.memory_space<vmem>>, vector<32x384xbf16>
    %cst_18 = arith.constant dense<0.000000e+00> : vector<128x384xf32>
    %48 = tpu.matmul %46, %47, %cst_18 {dimension_numbers = #tpu.dot_dimension_numbers<[1], [0], [0], [1], [0, 0, 1, 1], [], []>} : vector<128x32xbf16>, vector<32x384xbf16>, vector<128x384xf32> -> vector<128x384xf32>
    %c0_19 = arith.constant 0 : index
    %c0_20 = arith.constant 0 : index
    %49 = vector.load %arg5[%c0_19, %c0_20] : memref<1x384xf32, #tpu.memory_space<vmem>>, vector<1x384xf32>
    %50 = vector.broadcast %49 : vector<1x384xf32> to vector<128x384xf32>
    %51 = arith.addf %48, %50 : vector<128x384xf32>
    %cst_21 = arith.constant 5.000000e-01 : f32
    %52 = vector.broadcast %cst_21 : f32 to vector<128x384xf32>
    %53 = arith.mulf %52, %51 : vector<128x384xf32>
    %cst_22 = arith.constant 0.707106769 : f32
    %54 = vector.broadcast %cst_22 : f32 to vector<128x384xf32>
    %55 = arith.mulf %51, %54 : vector<128x384xf32>
    %56 = math.erf %55 : vector<128x384xf32>
    %cst_23 = arith.constant 1.000000e+00 : f32
    %57 = vector.broadcast %cst_23 : f32 to vector<128x384xf32>
    %58 = arith.addf %57, %56 : vector<128x384xf32>
    %59 = arith.mulf %53, %58 : vector<128x384xf32>
    %c0_24 = arith.constant 0 : index
    %c0_25 = arith.constant 0 : index
    %60 = vector.load %arg9[%c0_24, %c0_25] : memref<1x384xf32, #tpu.memory_space<vmem>>, vector<1x384xf32>
    %c0_26 = arith.constant 0 : index
    %c0_27 = arith.constant 0 : index
    %61 = vector.load %arg10[%c0_26, %c0_27] : memref<4x384xf32, #tpu.memory_space<vmem>>, vector<4x384xf32>
    %cst_28 = arith.constant dense<0.000000e+00> : vector<128x384xf32>
    %62 = tpu.matmul %45, %61, %cst_28 {dimension_numbers = #tpu.dot_dimension_numbers<[1], [0], [0], [1], [0, 0, 1, 1], [], []>} : vector<128x4xf32>, vector<4x384xf32>, vector<128x384xf32> -> vector<128x384xf32>
    %63 = vector.broadcast %60 : vector<1x384xf32> to vector<128x384xf32>
    %64 = arith.addf %63, %62 : vector<128x384xf32>
    %65 = arith.mulf %59, %64 : vector<128x384xf32>
    %66 = arith.truncf %65 : vector<128x384xf32> to vector<128x384xbf16>
    %c0_29 = arith.constant 0 : index
    %c0_30 = arith.constant 0 : index
    %67 = vector.load %arg6[%c0_29, %c0_30] : memref<384x32xbf16, #tpu.memory_space<vmem>>, vector<384x32xbf16>
    %cst_31 = arith.constant dense<0.000000e+00> : vector<128x32xf32>
    %68 = tpu.matmul %66, %67, %cst_31 {dimension_numbers = #tpu.dot_dimension_numbers<[1], [0], [0], [1], [0, 0, 1, 1], [], []>} : vector<128x384xbf16>, vector<384x32xbf16>, vector<128x32xf32> -> vector<128x32xf32>
    %c0_32 = arith.constant 0 : index
    %c0_33 = arith.constant 0 : index
    %69 = vector.load %arg7[%c0_32, %c0_33] : memref<1x32xf32, #tpu.memory_space<vmem>>, vector<1x32xf32>
    %70 = vector.broadcast %69 : vector<1x32xf32> to vector<128x32xf32>
    %71 = arith.addf %68, %70 : vector<128x32xf32>
    %c0_34 = arith.constant 0 : index
    %c0_35 = arith.constant 0 : index
    %72 = vector.load %arg8[%c0_34, %c0_35] : memref<4x32xf32, #tpu.memory_space<vmem>>, vector<4x32xf32>
    %cst_36 = arith.constant dense<0.000000e+00> : vector<128x32xf32>
    %73 = tpu.matmul %45, %72, %cst_36 {dimension_numbers = #tpu.dot_dimension_numbers<[1], [0], [0], [1], [0, 0, 1, 1], [], []>} : vector<128x4xf32>, vector<4x32xf32>, vector<128x32xf32> -> vector<128x32xf32>
    %74 = arith.addf %71, %73 : vector<128x32xf32>
    %c0_37 = arith.constant 0 : index
    %c0_38 = arith.constant 0 : index
    %75 = vector.load %arg11[%c0_37, %c0_38] : memref<128x32xf32, #tpu.memory_space<vmem>>, vector<128x32xf32>
    tpu.vector_store %arg11[%c0_37, %c0_38], %74 {strides = array<i32>} : memref<128x32xf32, #tpu.memory_space<vmem>>, vector<128x32xf32>,
    return
  }
  func.func @transform_0(%arg0: i32) -> (i32, i32) {
    %c0_i32 = arith.constant 0 : i32
    %c0_i32_0 = arith.constant 0 : i32
    return %arg0, %c0_i32 : i32, i32
  }
  func.func @transform_1(%arg0: i32) -> (i32, i32) {
    %c0_i32 = arith.constant 0 : i32
    %c0_i32_0 = arith.constant 0 : i32
    %c0_i32_1 = arith.constant 0 : i32
    return %c0_i32, %c0_i32_0 : i32, i32
  }
  func.func @transform_2(%arg0: i32) -> (i32, i32) {
    %c0_i32 = arith.constant 0 : i32
    %c0_i32_0 = arith.constant 0 : i32
    %c0_i32_1 = arith.constant 0 : i32
    return %c0_i32, %c0_i32_0 : i32, i32
  }
  func.func @transform_3(%arg0: i32) -> (i32, i32) {
    %c0_i32 = arith.constant 0 : i32
    %c0_i32_0 = arith.constant 0 : i32
    %c0_i32_1 = arith.constant 0 : i32
    return %c0_i32, %c0_i32_0 : i32, i32
  }
  func.func @transform_4(%arg0: i32) -> (i32, i32) {
    %c0_i32 = arith.constant 0 : i32
    %c0_i32_0 = arith.constant 0 : i32
    %c0_i32_1 = arith.constant 0 : i32
    return %c0_i32, %c0_i32_0 : i32, i32
  }
  func.func @transform_5(%arg0: i32) -> (i32, i32) {
    %c0_i32 = arith.constant 0 : i32
    %c0_i32_0 = arith.constant 0 : i32
    %c0_i32_1 = arith.constant 0 : i32
    return %c0_i32, %c0_i32_0 : i32, i32
  }
  func.func @transform_6(%arg0: i32) -> (i32, i32) {
    %c0_i32 = arith.constant 0 : i32
    %c0_i32_0 = arith.constant 0 : i32
    %c0_i32_1 = arith.constant 0 : i32
    return %c0_i32, %c0_i32_0 : i32, i32
  }
  func.func @transform_7(%arg0: i32) -> (i32, i32) {
    %c0_i32 = arith.constant 0 : i32
    %c0_i32_0 = arith.constant 0 : i32
    %c0_i32_1 = arith.constant 0 : i32
    return %c0_i32, %c0_i32_0 : i32, i32
  }
  func.func @transform_8(%arg0: i32) -> (i32, i32) {
    %c0_i32 = arith.constant 0 : i32
    %c0_i32_0 = arith.constant 0 : i32
    %c0_i32_1 = arith.constant 0 : i32
    return %c0_i32, %c0_i32_0 : i32, i32
  }
  func.func @transform_9(%arg0: i32) -> (i32, i32) {
    %c0_i32 = arith.constant 0 : i32
    %c0_i32_0 = arith.constant 0 : i32
    %c0_i32_1 = arith.constant 0 : i32
    return %c0_i32, %c0_i32_0 : i32, i32
  }
  func.func @transform_10(%arg0: i32) -> (i32, i32) {
    %c0_i32 = arith.constant 0 : i32
    %c0_i32_0 = arith.constant 0 : i32
    return %arg0, %c0_i32 : i32, i32
  }
}

</mosaic_0001>

<bundles_post_ra>
// kernel: tpu_custom_call.1
= control target key start
LH: loop header
LB: loop body
LE: loop exit
PB: predicated region body
PF: predicated region fallthrough
CT: control target
= control target key end

     0   :  { %vm5583_vm0 = vcmask 261120   ;;  %vm257_vm1 = vcmask 31744   ;;  %s5542_s1 = inlined_call_operand.vmem [shape: f32[32,4], index: 1, kind: input, shape index: {}]   ;;  %s5543_s0 = inlined_call_operand.vmem [shape: f32[128,32], index: 0, kind: input, shape index: {}]   ;;  %s5544_s2 = inlined_call_operand.vmem [shape: f32[1,4], index: 2, kind: input, shape index: {}]   ;;  %s5545_s3 = inlined_call_operand.vmem [shape: bf16[32,384], index: 3, kind: input, shape index: {}]   ;;  %s5546_s9 = inlined_call_operand.vmem [shape: f32[4,384], index: 9, kind: input, shape index: {}]   ;;  %s5547_s5 = inlined_call_operand.vmem [shape: bf16[384,32], index: 5, kind: input, shape index: {}]   ;;  %s5548_s7 = inlined_call_operand.vmem [shape: f32[4,32], index: 7, kind: input, shape index: {}]   ;;  %s5549_s4 = inlined_call_operand.vmem [shape: f32[1,384], index: 4, kind: input, shape index: {}]   ;;  %s5550_s8 = inlined_call_operand.vmem [shape: f32[1,384], index: 8, kind: input, shape index: {}]   ;;  %s5551_s6 = inlined_call_operand.vmem [shape: f32[1,32], index: 6, kind: input, shape index: {}]   ;;  %s5552_s10 = inlined_call_operand.vmem [shape: f32[128,32], index: 10, kind: output, shape index: {}]  }
   0x1   :  { %v52_v0 = vld [vmem:[%s5542_s1] sm:$0xff]  ;;  %v53_v1 = vld [vmem:[%s5542_s1 + $0x8] sm:$0xff]  ;;  %v54_v2 = vld [vmem:[%s5542_s1 + $0x10] sm:$0xff] }
   0x2   :  { %v3204_v3 = vpack.c.bf16 %v53_v1, %v52_v0  ;;  %v55_v4 = vld [vmem:[%s5542_s1 + $0x18] sm:$0xff]  ;;  %v36_v5 = vld [vmem:[%s5543_s0] sm:$0xff]  ;;  %v38_v7 = vld [vmem:[%s5543_s0 + $0x10] sm:$0xff] }
   0x3   :  { %v3208_v6 = vpack.c.bf16 %v55_v4, %v54_v2  ;;  %3076 = vmatprep.mubr.msk.f32.mxu0 %vm5583_vm0, %v36_v5  ;;  %v39_v8 = vld [vmem:[%s5543_s0 + $0x18] sm:$0xff]  ;;  %v40_v9 = vld [vmem:[%s5543_s0 + $0x20] sm:$0xff]  ;;  %v41_v11 = vld [vmem:[%s5543_s0 + $0x28] sm:$0xff] }
   0x4   :  { %3205 = vmatprep.subr.bf16.mxu0 %v3204_v3  ;;  %v3493_v10 = vpack.c.bf16 %v39_v8, %v38_v7  ;;  %3212 = vmatprep.subr.bf16.mxu1 %v3204_v3  ;;  %v42_v12 = vld [vmem:[%s5543_s0 + $0x30] sm:$0xff]  ;;  %v43_v13 = vld [vmem:[%s5543_s0 + $0x38] sm:$0xff]  ;;  %v3504_v14 = vpack.c.bf16 %v41_v11, %v40_v9  ;;  %v44_v16 = vld [vmem:[%s5543_s0 + $0x40] sm:$0xff] }
   0x5   :  { %3207 = vmatpush3.bf16.msra.mxu0 %v3204_v3  ;;  %3214 = vmatpush3.bf16.msra.mxu1 %v3204_v3  ;;  %v3506_v15 = vpack.c.bf16 %v43_v13, %v42_v12  ;;  %v45_v17 = vld [vmem:[%s5543_s0 + $0x48] sm:$0xff]  ;;  %v46_v18 = vld [vmem:[%s5543_s0 + $0x50] sm:$0xff]  ;;  %v47_v20 = vld [vmem:[%s5543_s0 + $0x58] sm:$0xff] }
   0x6   :  { %3209 = vmatprep.subr.bf16.mxu0 %v3208_v6  ;;  %3213 = vmatprep.subr.bf16.mxu1 %v3208_v6  ;;  %v3517_v19 = vpack.c.bf16 %v45_v17, %v44_v16  ;;  %v48_v21 = vld [vmem:[%s5543_s0 + $0x60] sm:$0xff]  ;;  %v49_v22 = vld [vmem:[%s5543_s0 + $0x68] sm:$0xff]  ;;  %v3529_v23 = vpack.c.bf16 %v47_v20, %v46_v18  ;;  %v50_v25 = vld [vmem:[%s5543_s0 + $0x70] sm:$0xff] }
   0x7   :  { %3088 = vmatprep.mubr.msk.f32.mxu1 %vm5583_vm0, %v44_v16  ;;  %v3531_v24 = vpack.c.bf16 %v49_v22, %v48_v21  ;;  %v51_v26 = vld [vmem:[%s5543_s0 + $0x78] sm:$0xff]  ;;  %v37_v28 = vld [vmem:[%s5543_s0 + $0x8] sm:$0xff]  ;;  %v2808_v30 = vld [vmem:[%s5544_s2] ss:$0 sm:$0xff] }
   0x8   :  { %5613 = vst [vmem:[#allocation2_spill] sm:$0xff] %v3529_v23  ;;  %v3539_v27 = vpack.c.bf16 %v51_v26, %v50_v25  ;;  %v3556_v29 = vpack.c.bf16 %v37_v28, %v36_v5 }
   0x9   :  { %5614 = vst [vmem:[#allocation3_spill] sm:$0xff] %v3531_v24  ;;  %3211 = vmatpush3.bf16.msra.mxu0 %v3208_v6  ;;  %3215 = vmatpush3.bf16.msra.mxu1 %v3208_v6 }
   0xa   :  { %5615 = vst [vmem:[#allocation4_spill] sm:$0xff] %v3539_v27 }
   0xc   :  { %3077 = vmatmul.mubr.msk.f32.vlgmr.msra.gmra.mrb[0].mxu0 %vm5583_vm0, %v37_v28  ;;  %3089 = vmatmul.mubr.msk.f32.vlgmr.msra.gmra.mrb[0].mxu1 %vm5583_vm0, %v45_v17 }
   0xd   :  { %3079 = vmatprep.mubr.msk.f32.mxu0 %vm5583_vm0, %v38_v7  ;;  %3091 = vmatprep.mubr.msk.f32.mxu1 %vm5583_vm0, %v46_v18 }
  0x10   :  { %3080 = vmatmul.mubr.msk.f32.gmra.mrb[2].mxu0 %vm5583_vm0, %v39_v8  ;;  %3092 = vmatmul.mubr.msk.f32.gmra.mrb[2].mxu1 %vm5583_vm0, %v47_v20 }
  0x11   :  { %3082 = vmatprep.mubr.msk.f32.mxu0 %vm5583_vm0, %v40_v9  ;;  %3094 = vmatprep.mubr.msk.f32.mxu1 %vm5583_vm0, %v48_v21 }
  0x14   :  { %3083 = vmatmul.mubr.msk.f32.gmra.mrb[4].mxu0 %vm5583_vm0, %v41_v11  ;;  %3095 = vmatmul.mubr.msk.f32.gmra.mrb[4].mxu1 %vm5583_vm0, %v49_v22 }
  0x15   :  { %3085 = vmatprep.mubr.msk.f32.mxu0 %vm5583_vm0, %v42_v12  ;;  %3097 = vmatprep.mubr.msk.f32.mxu1 %vm5583_vm0, %v50_v25 }
  0x18   :  { %3086 = vmatmul.mubr.msk.f32.gmra.mrb[6].mxu0 %vm5583_vm0, %v43_v13  ;;  %3098 = vmatmul.mubr.msk.f32.gmra.mrb[6].mxu1 %vm5583_vm0, %v51_v26 }
  0x19   :  { %3104 = vmatprep.mubr.msk.bf16.mxu0 %vm5583_vm0, %v3556_v29 }
  0xdf   :  { %v3078_v31 = vpop.f32.mrb[0].mxu0  ;;  %v3090_v32 = vpop.f32.mrb[0].mxu1 }
  0xe0   :  { %v178_v33 = vpop.f32.mrb[1].mxu0  ;;  %v218_v34 = vpop.f32.mrb[1].mxu1  ;;  %v3565_v36 = vadd.f32 %v3078_v31, %v2808_v30  ;;  %v3585_v63 = vadd.f32 %v3090_v32, %v2808_v30 }
  0xe1   :  { %v179_v35 = vadd.f32 %v2808_v30, %v178_v33  ;;  %v3580_v60 = vadd.f32 %v2808_v30, %v218_v34 }
  0xe2   :  { %v261_v46 = vsel %vm257_vm1, %v3565_v36, -inf  ;;  %v285_v5 = vsel %vm257_vm1, %v3585_v63, -inf }
  0xe3   :  { %v3081_v37 = vpop.f32.mrb[2].mxu0  ;;  %v258_v38 = vsel %vm257_vm1, %v179_v35, -inf  ;;  %v3093_v39 = vpop.f32.mrb[2].mxu1  ;;  %v282_v2 = vsel %vm257_vm1, %v3580_v60, -inf }
  0xe4   :  { %v188_v40 = vpop.f32.mrb[3].mxu0  ;;  %259 = vmax.xlane.f32.xlu0 %v258_v38  ;;  %v228_v41 = vpop.f32.mrb[3].mxu1  ;;  %v3568_v43 = vadd.f32 %v3081_v37, %v2808_v30  ;;  %v3593_v3 = vadd.f32 %v3093_v39, %v2808_v30 }
  0xe5   :  { %v189_v42 = vadd.f32 %v2808_v30, %v188_v40  ;;  %v3587_v0 = vadd.f32 %v2808_v30, %v228_v41 }
  0xe6   :  { %v267_v53 = vsel %vm257_vm1, %v3568_v43, -inf  ;;  %v291_v9 = vsel %vm257_vm1, %v3593_v3, -inf }
  0xe7   :  { %v3084_v44 = vpop.f32.mrb[4].mxu0  ;;  %v264_v45 = vsel %vm257_vm1, %v189_v42, -inf  ;;  %v3096_v47 = vpop.f32.mrb[4].mxu1  ;;  %v288_v6 = vsel %vm257_vm1, %v3587_v0, -inf }
  0xe8   :  { %v198_v48 = vpop.f32.mrb[5].mxu0  ;;  %265 = vmax.xlane.f32.xlu1 %v264_v45  ;;  %262 = vmax.xlane.f32.xlu0 %v261_v46  ;;  %v238_v49 = vpop.f32.mrb[5].mxu1  ;;  %v3573_v50 = vadd.f32 %v3084_v44, %v2808_v30  ;;  %v3601_v7 = vadd.f32 %v3096_v47, %v2808_v30 }
  0xe9   :  { %v199_v51 = vadd.f32 %v2808_v30, %v198_v48  ;;  %v3595_v4 = vadd.f32 %v2808_v30, %v238_v49 }
  0xea   :  { %v273_v61 = vsel %vm257_vm1, %v3573_v50, -inf  ;;  %v297_v13 = vsel %vm257_vm1, %v3601_v7, -inf }
  0xeb   :  { %v3087_v52 = vpop.f32.mrb[6].mxu0  ;;  %v270_v54 = vsel %vm257_vm1, %v199_v51, -inf  ;;  %v3099_v55 = vpop.f32.mrb[6].mxu1  ;;  %v294_v11 = vsel %vm257_vm1, %v3595_v4, -inf }
  0xec   :  { %v208_v56 = vpop.f32.mrb[7].mxu0  ;;  %268 = vmax.xlane.f32.xlu1 %v267_v53  ;;  %271 = vmax.xlane.f32.xlu0 %v270_v54  ;;  %v248_v57 = vpop.f32.mrb[7].mxu1  ;;  %v3578_v58 = vadd.f32 %v3087_v52, %v2808_v30  ;;  %v3609_v12 = vadd.f32 %v3099_v55, %v2808_v30 }
  0xed   :  { %v209_v59 = vadd.f32 %v2808_v30, %v208_v56  ;;  %v3603_v8 = vadd.f32 %v2808_v30, %v248_v57 }
  0xee   :  { %v279_v1 = vsel %vm257_vm1, %v3578_v58, -inf  ;;  %v303_v17 = vsel %vm257_vm1, %v3609_v12, -inf }
  0xef   :  { %v276_v62 = vsel %vm257_vm1, %v209_v59, -inf  ;;  %v300_v16 = vsel %vm257_vm1, %v3603_v8, -inf }
  0xf0   :  { %274 = vmax.xlane.f32.xlu1 %v273_v61  ;;  %277 = vmax.xlane.f32.xlu0 %v276_v62 }
  0xf4   :  { %280 = vmax.xlane.f32.xlu1 %v279_v1  ;;  %283 = vmax.xlane.f32.xlu0 %v282_v2 }
  0xf8   :  { %286 = vmax.xlane.f32.xlu1 %v285_v5  ;;  %289 = vmax.xlane.f32.xlu0 %v288_v6 }
  0xfc   :  { %292 = vmax.xlane.f32.xlu1 %v291_v9  ;;  %295 = vmax.xlane.f32.xlu0 %v294_v11 }
 0x100   :  { %298 = vmax.xlane.f32.xlu1 %v297_v13  ;;  %301 = vmax.xlane.f32.xlu0 %v300_v16 }
 0x104   :  { %304 = vmax.xlane.f32.xlu1 %v303_v17 }
 0x171   :  { %v260_v18 = vpop.xlane.xlu0 %259 }
 0x172   :  { %v306_v20 = vsub.f32 %v179_v35, %v260_v18 }
 0x174   :  { %v322_v21 = vmul.f32 1.442695, %v306_v20 }
 0x175   :  { %v266_v22 = vpop.xlane.xlu1 %265  ;;  %v263_v25 = vpop.xlane.xlu0 %262 }
 0x176   :  { %3251 = vpow2.f32 %v322_v21  ;;  %v308_v26 = vsub.f32 %v189_v42, %v266_v22  ;;  %v307_v28 = vsub.f32 %v3565_v36, %v263_v25 }
 0x178   :  { %v326_v30 = vmul.f32 1.442695, %v308_v26  ;;  %v324_v31 = vmul.f32 1.442695, %v307_v28 }
 0x179   :  { %v269_v32 = vpop.xlane.xlu1 %268  ;;  %v272_v33 = vpop.xlane.xlu0 %271 }
 0x17a   :  { %3253 = vpow2.f32 %v326_v30  ;;  %v309_v34 = vsub.f32 %v3568_v43, %v269_v32  ;;  %v310_v37 = vsub.f32 %v199_v51, %v272_v33 }
 0x17b   :  { %3255 = vpow2.f32 %v324_v31 }
 0x17c   :  { %v328_v38 = vmul.f32 1.442695, %v309_v34  ;;  %v330_v39 = vmul.f32 1.442695, %v310_v37 }
 0x17d   :  { %v275_v40 = vpop.xlane.xlu1 %274  ;;  %v278_v35 = vpop.xlane.xlu0 %277 }
 0x17e   :  { %3257 = vpow2.f32 %v328_v38  ;;  %v311_v41 = vsub.f32 %v3573_v50, %v275_v40  ;;  %v312_v44 = vsub.f32 %v209_v59, %v278_v35 }
 0x17f   :  { %3259 = vpow2.f32 %v330_v39 }
 0x180   :  { %v3620_v42 = vpop.eup %3251  ;;  %v332_v36 = vmul.f32 1.442695, %v311_v41  ;;  %v334_v45 = vmul.f32 1.442695, %v312_v44 }
 0x181   :  { %v281_v46 = vpop.xlane.xlu1 %280  ;;  %v284_v47 = vpop.xlane.xlu0 %283  ;;  %v354_v43 = vsel %vm257_vm1, %v3620_v42, 0.0 }
 0x182   :  { %3261 = vpow2.f32 %v332_v36  ;;  %v313_v48 = vsub.f32 %v3578_v58, %v281_v46  ;;  %v314_v49 = vsub.f32 %v3580_v60, %v284_v47  ;;  %355 = vadd.xlane.f32.xlu0 %v354_v43 }
 0x183   :  { %3263 = vpow2.f32 %v334_v45 }
 0x184   :  { %v3626_v51 = vpop.eup %3253  ;;  %v336_v50 = vmul.f32 1.442695, %v313_v48  ;;  %v338_v52 = vmul.f32 1.442695, %v314_v49 }
 0x185   :  { %v3628_v53 = vpop.eup %3255  ;;  %v287_v54 = vpop.xlane.xlu1 %286  ;;  %v360_v56 = vsel %vm257_vm1, %v3626_v51, 0.0 }
 0x186   :  { %v290_v55 = vpop.xlane.xlu0 %289  ;;  %3265 = vpow2.f32 %v336_v50  ;;  %v315_v57 = vsub.f32 %v3585_v63, %v287_v54  ;;  %361 = vadd.xlane.f32.xlu0 %v360_v56  ;;  %v357_v59 = vsel %vm257_vm1, %v3628_v53, 0.0 }
 0x187   :  { %v316_v58 = vsub.f32 %v3587_v0, %v290_v55  ;;  %3267 = vpow2.f32 %v338_v52  ;;  %358 = vadd.xlane.f32.xlu1 %v357_v59 }
 0x188   :  { %v3636_v60 = vpop.eup %3257  ;;  %v340_v61 = vmul.f32 1.442695, %v315_v57 }
 0x189   :  { %v342_v62 = vmul.f32 1.442695, %v316_v58  ;;  %v3638_v1 = vpop.eup %3259  ;;  %v293_v2 = vpop.xlane.xlu1 %292  ;;  %v363_v6 = vsel %vm257_vm1, %v3636_v60, 0.0 }
 0x18a   :  { %v296_v5 = vpop.xlane.xlu0 %295  ;;  %3269 = vpow2.f32 %v340_v61  ;;  %v317_v63 = vsub.f32 %v3593_v3, %v293_v2  ;;  %v366_v9 = vsel %vm257_vm1, %v3638_v1, 0.0 }
 0x18b   :  { %v318_v0 = vsub.f32 %v3595_v4, %v296_v5  ;;  %3271 = vpow2.f32 %v342_v62  ;;  %364 = vadd.xlane.f32.xlu1 %v363_v6  ;;  %367 = vadd.xlane.f32.xlu0 %v366_v9 }
 0x18c   :  { %v3646_v11 = vpop.eup %3261  ;;  %v344_v13 = vmul.f32 1.442695, %v317_v63 }
 0x18d   :  { %v346_v16 = vmul.f32 1.442695, %v318_v0  ;;  %v3648_v17 = vpop.eup %3263  ;;  %v299_v18 = vpop.xlane.xlu1 %298  ;;  %v369_v21 = vsel %vm257_vm1, %v3646_v11, 0.0 }
 0x18e   :  { %v302_v20 = vpop.xlane.xlu0 %301  ;;  %3273 = vpow2.f32 %v344_v13  ;;  %v319_v3 = vsub.f32 %v3601_v7, %v299_v18  ;;  %v372_v22 = vsel %vm257_vm1, %v3648_v17, 0.0 }
 0x18f   :  { %v320_v4 = vsub.f32 %v3603_v8, %v302_v20  ;;  %3275 = vpow2.f32 %v346_v16  ;;  %370 = vadd.xlane.f32.xlu1 %v369_v21  ;;  %373 = vadd.xlane.f32.xlu0 %v372_v22 }
 0x190   :  { %v3656_v25 = vpop.eup %3265  ;;  %v348_v26 = vmul.f32 1.442695, %v319_v3 }
 0x191   :  { %v350_v28 = vmul.f32 1.442695, %v320_v4  ;;  %v3658_v30 = vpop.eup %3267  ;;  %v305_v31 = vpop.xlane.xlu1 %304  ;;  %v375_v32 = vsel %vm257_vm1, %v3656_v25, 0.0 }
 0x192   :  { %3277 = vpow2.f32 %v348_v26  ;;  %v321_v7 = vsub.f32 %v3609_v12, %v305_v31  ;;  %v378_v8 = vsel %vm257_vm1, %v3658_v30, 0.0 }
 0x193   :  { %3279 = vpow2.f32 %v350_v28  ;;  %376 = vadd.xlane.f32.xlu1 %v375_v32  ;;  %379 = vadd.xlane.f32.xlu0 %v378_v8 }
 0x194   :  { %v3665_v33 = vpop.eup %3269  ;;  %v352_v34 = vmul.f32 1.442695, %v321_v7 }
 0x195   :  { %v3667_v37 = vpop.eup %3271  ;;  %v381_v38 = vsel %vm257_vm1, %v3665_v33, 0.0 }
 0x196   :  { %3281 = vpow2.f32 %v352_v34  ;;  %v384_v39 = vsel %vm257_vm1, %v3667_v37, 0.0 }
 0x197   :  { %382 = vadd.xlane.f32.xlu1 %v381_v38  ;;  %385 = vadd.xlane.f32.xlu0 %v384_v39 }
 0x198   :  { %v3673_v12 = vpop.eup %3273 }
 0x199   :  { %v3675_v40 = vpop.eup %3275  ;;  %v387_v35 = vsel %vm257_vm1, %v3673_v12, 0.0 }
 0x19a   :  { %v390_v41 = vsel %vm257_vm1, %v3675_v40, 0.0 }
 0x19b   :  { %388 = vadd.xlane.f32.xlu1 %v387_v35  ;;  %391 = vadd.xlane.f32.xlu0 %v390_v41 }
 0x19c   :  { %v3681_v44 = vpop.eup %3277 }
 0x19d   :  { %v3683_v36 = vpop.eup %3279  ;;  %v393_v45 = vsel %vm257_vm1, %v3681_v44, 0.0 }
 0x19e   :  { %v396_v46 = vsel %vm257_vm1, %v3683_v36, 0.0 }
 0x19f   :  { %394 = vadd.xlane.f32.xlu1 %v393_v45  ;;  %397 = vadd.xlane.f32.xlu0 %v396_v46 }
 0x1a0   :  { %v3689_v47 = vpop.eup %3281 }
 0x1a1   :  { %v399_v43 = vsel %vm257_vm1, %v3689_v47, 0.0 }
 0x1a3   :  { %400 = vadd.xlane.f32.xlu1 %v399_v43 }
 0x20f   :  { %v356_v48 = vpop.xlane.xlu0 %355 }
 0x210   :  { %3283 = vrcp.f32 %v356_v48 }
 0x213   :  { %v362_v49 = vpop.xlane.xlu0 %361 }
 0x214   :  { %v359_v50 = vpop.xlane.xlu1 %358  ;;  %3285 = vrcp.f32 %v362_v49 }
 0x215   :  { %3287 = vrcp.f32 %v359_v50 }
 0x218   :  { %v365_v52 = vpop.xlane.xlu1 %364  ;;  %v368_v54 = vpop.xlane.xlu0 %367 }
 0x219   :  { %3289 = vrcp.f32 %v365_v52 }
 0x21a   :  { %v3284_v55 = vpop.eup %3283  ;;  %3291 = vrcp.f32 %v368_v54 }
 0x21b   :  { %v3694_v56 = vmul.f32 %v3284_v55, %v3620_v42 }
 0x21c   :  { %v371_v57 = vpop.xlane.xlu1 %370  ;;  %v374_v58 = vpop.xlane.xlu0 %373 }
 0x21d   :  { %3293 = vrcp.f32 %v371_v57  ;;  %v436_v59 = vsel %vm257_vm1, %v3694_v56, -inf }
 0x21e   :  { %v3286_v61 = vpop.eup %3285  ;;  %3295 = vrcp.f32 %v374_v58  ;;  %437 = vmax.xlane.f32.xlu0 %v436_v59 }
 0x21f   :  { %v3288_v62 = vpop.eup %3287  ;;  %v3699_v2 = vmul.f32 %v3286_v61, %v3626_v51 }
 0x220   :  { %v3702_v5 = vmul.f32 %v3288_v62, %v3628_v53  ;;  %v377_v6 = vpop.xlane.xlu1 %376  ;;  %v380_v63 = vpop.xlane.xlu0 %379  ;;  %v5553_v62 = vlaneseq }
 0x221   :  { %3297 = vrcp.f32 %v377_v6  ;;  %v442_v42 = vsel %vm257_vm1, %v3699_v2, -inf }
 0x222   :  { %3299 = vrcp.f32 %v380_v63  ;;  %v439_v0 = vsel %vm257_vm1, %v3702_v5, -inf  ;;  %443 = vmax.xlane.f32.xlu0 %v442_v42 }
 0x223   :  { %v3290_v9 = vpop.eup %3289  ;;  %440 = vmax.xlane.f32.xlu1 %v439_v0 }
 0x224   :  { %v3292_v13 = vpop.eup %3291  ;;  %v3709_v51 = vmul.f32 %v3290_v9, %v3636_v60  ;;  %v383_v16 = vpop.xlane.xlu1 %382 }
 0x225   :  { %v386_v53 = vpop.xlane.xlu0 %385  ;;  %v3712_v18 = vmul.f32 %v3292_v13, %v3638_v1  ;;  %3301 = vrcp.f32 %v383_v16 }
 0x226   :  { %3303 = vrcp.f32 %v386_v53  ;;  %v445_v20 = vsel %vm257_vm1, %v3709_v51, -inf }
 0x227   :  { %v3294_v21 = vpop.eup %3293  ;;  %446 = vmax.xlane.f32.xlu1 %v445_v20  ;;  %v448_v3 = vsel %vm257_vm1, %v3712_v18, -inf }
 0x228   :  { %v3296_v4 = vpop.eup %3295  ;;  %v3719_v22 = vmul.f32 %v3294_v21, %v3646_v11  ;;  %449 = vmax.xlane.f32.xlu0 %v448_v3  ;;  %v389_v60 = vpop.xlane.xlu1 %388 }
 0x229   :  { %v392_v26 = vpop.xlane.xlu0 %391  ;;  %v3722_v1 = vmul.f32 %v3296_v4, %v3648_v17  ;;  %3305 = vrcp.f32 %v389_v60 }
 0x22a   :  { %3307 = vrcp.f32 %v392_v26  ;;  %v451_v28 = vsel %vm257_vm1, %v3719_v22, -inf }
 0x22b   :  { %v3298_v31 = vpop.eup %3297  ;;  %452 = vmax.xlane.f32.xlu1 %v451_v28  ;;  %v454_v32 = vsel %vm257_vm1, %v3722_v1, -inf }
 0x22c   :  { %v3300_v7 = vpop.eup %3299  ;;  %v3729_v11 = vmul.f32 %v3298_v31, %v3656_v25  ;;  %455 = vmax.xlane.f32.xlu0 %v454_v32  ;;  %v395_v8 = vpop.xlane.xlu1 %394 }
 0x22d   :  { %v398_v34 = vpop.xlane.xlu0 %397  ;;  %v3732_v17 = vmul.f32 %v3300_v7, %v3658_v30  ;;  %3309 = vrcp.f32 %v395_v8 }
 0x22e   :  { %3311 = vrcp.f32 %v398_v34  ;;  %v457_v38 = vsel %vm257_vm1, %v3729_v11, -inf }
 0x22f   :  { %v3302_v39 = vpop.eup %3301  ;;  %458 = vmax.xlane.f32.xlu1 %v457_v38  ;;  %v460_v35 = vsel %vm257_vm1, %v3732_v17, -inf }
 0x230   :  { %v3304_v41 = vpop.eup %3303  ;;  %v3739_v25 = vmul.f32 %v3302_v39, %v3665_v33  ;;  %461 = vmax.xlane.f32.xlu0 %v460_v35  ;;  %v401_v45 = vpop.xlane.xlu1 %400 }
 0x231   :  { %v3742_v46 = vmul.f32 %v3304_v41, %v3667_v37  ;;  %3313 = vrcp.f32 %v401_v45 }
 0x232   :  { %5616 = vst [vmem:[#allocation5_spill] sm:$0xff] %v3739_v25  ;;  %v463_v30 = vsel %vm257_vm1, %v3739_v25, -inf }
 0x233   :  { %5617 = vst [vmem:[#allocation6_spill] sm:$0xff] %v3742_v46  ;;  %v3306_v43 = vpop.eup %3305  ;;  %464 = vmax.xlane.f32.xlu1 %v463_v30  ;;  %v466_v48 = vsel %vm257_vm1, %v3742_v46, -inf }
 0x234   :  { %v3308_v49 = vpop.eup %3307  ;;  %v3749_v50 = vmul.f32 %v3306_v43, %v3673_v12  ;;  %467 = vmax.xlane.f32.xlu0 %v466_v48 }
 0x235   :  { %v3752_v33 = vmul.f32 %v3308_v49, %v3675_v40 }
 0x236   :  { %5618 = vst [vmem:[#allocation7_spill] sm:$0xff] %v3749_v50  ;;  %v469_v37 = vsel %vm257_vm1, %v3749_v50, -inf }
 0x237   :  { %5619 = vst [vmem:[#allocation8_spill] sm:$0xff] %v3752_v33  ;;  %v3310_v52 = vpop.eup %3309  ;;  %470 = vmax.xlane.f32.xlu1 %v469_v37  ;;  %v472_v54 = vsel %vm257_vm1, %v3752_v33, -inf }
 0x238   :  { %v3312_v55 = vpop.eup %3311  ;;  %v3759_v57 = vmul.f32 %v3310_v52, %v3681_v44  ;;  %473 = vmax.xlane.f32.xlu0 %v472_v54 }
 0x239   :  { %v3762_v12 = vmul.f32 %v3312_v55, %v3683_v36  ;;  %v3774_v36 = vand.u32 127, %v5553_v62 }
 0x23a   :  { %5620 = vst [vmem:[#allocation9_spill] sm:$0xff] %v3759_v57  ;;  %v475_v40 = vsel %vm257_vm1, %v3759_v57, -inf }
 0x23b   :  { %5621 = vst [vmem:[#allocation10_spill] sm:$0xff] %v3762_v12  ;;  %v3314_v58 = vpop.eup %3313  ;;  %476 = vmax.xlane.f32.xlu1 %v475_v40  ;;  %v478_v59 = vsel %vm257_vm1, %v3762_v12, -inf }
 0x23c   :  { %v3769_v61 = vmul.f32 %v3314_v58, %v3689_v47  ;;  %479 = vmax.xlane.f32.xlu0 %v478_v59 }
 0x23e   :  { %5622 = vst [vmem:[#allocation11_spill] sm:$0xff] %v3769_v61  ;;  %v481_v44 = vsel %vm257_vm1, %v3769_v61, -inf }
 0x23f   :  { %482 = vmax.xlane.f32.xlu1 %v481_v44 }
 0x2ab   :  { %v438_v6 = vpop.xlane.xlu0 %437 }
 0x2ac   :  { %vm484_vm2 = vcmp.eq.f32.partialorder %v3694_v56, %v438_v6 }
 0x2ad   :  { %v500_v63 = vsel %vm484_vm2, %v3774_v36, 4 }
 0x2ae   :  { %v3779_v42 = vsel %vm257_vm1, %v500_v63, 2147483647 }
 0x2af   :  { %v444_v0 = vpop.xlane.xlu0 %443  ;;  %v518_v47 = vshra.s32 %v3779_v42, 16 }
 0x2b0   :  { %v441_v9 = vpop.xlane.xlu1 %440  ;;  %vm486_vm3 = vcmp.eq.f32.partialorder %v3699_v2, %v444_v0 }
 0x2b1   :  { %vm485_vm4 = vcmp.eq.f32.partialorder %v3702_v5, %v441_v9  ;;  %v502_v13 = vsel %vm486_vm3, %v3774_v36, 4  ;;  %v3785_v16 = vcvt.s32.f32 %v518_v47 }
 0x2b2   :  { %v501_v53 = vsel %vm485_vm4, %v3774_v36, 4  ;;  %v3789_v20 = vsel %vm257_vm1, %v502_v13, 2147483647 }
 0x2b3   :  { %v3792_v21 = vsel %vm257_vm1, %v501_v53, 2147483647  ;;  %521 = vmin.xlane.f32.xlu0 %v3785_v16  ;;  %v548_v3 = vshra.s32 %v3789_v20, 16 }
 0x2b4   :  { %v447_v4 = vpop.xlane.xlu1 %446  ;;  %v533_v60 = vshra.s32 %v3792_v21, 16 }
 0x2b5   :  { %vm487_vm5 = vcmp.eq.f32.partialorder %v3709_v51, %v447_v4  ;;  %v450_v26 = vpop.xlane.xlu0 %449  ;;  %v3798_v28 = vcvt.s32.f32 %v548_v3 }
 0x2b6   :  { %v503_v31 = vsel %vm487_vm5, %v3774_v36, 4  ;;  %vm488_vm6 = vcmp.eq.f32.partialorder %v3712_v18, %v450_v26  ;;  %v3802_v32 = vcvt.s32.f32 %v533_v60 }
 0x2b7   :  { %v3805_v7 = vsel %vm257_vm1, %v503_v31, 2147483647  ;;  %v504_v8 = vsel %vm488_vm6, %v3774_v36, 4  ;;  %551 = vmin.xlane.f32.xlu0 %v3798_v28 }
 0x2b8   :  { %v3810_v34 = vsel %vm257_vm1, %v504_v8, 2147483647  ;;  %536 = vmin.xlane.f32.xlu1 %v3802_v32  ;;  %v453_v38 = vpop.xlane.xlu1 %452  ;;  %v563_v39 = vshra.s32 %v3805_v7, 16 }
 0x2b9   :  { %vm489_vm7 = vcmp.eq.f32.partialorder %v3719_v22, %v453_v38  ;;  %v456_v35 = vpop.xlane.xlu0 %455  ;;  %v578_v41 = vshra.s32 %v3810_v34, 16 }
 0x2ba   :  { %v505_v45 = vsel %vm489_vm7, %v3774_v36, 4  ;;  %vm490_vm8 = vcmp.eq.f32.partialorder %v3722_v1, %v456_v35  ;;  %v3818_v30 = vcvt.s32.f32 %v563_v39 }
 0x2bb   :  { %v3821_v43 = vsel %vm257_vm1, %v505_v45, 2147483647  ;;  %v506_v48 = vsel %vm490_vm8, %v3774_v36, 4  ;;  %v3824_v49 = vcvt.s32.f32 %v578_v41 }
 0x2bc   :  { %v3827_v37 = vsel %vm257_vm1, %v506_v48, 2147483647  ;;  %566 = vmin.xlane.f32.xlu1 %v3818_v30  ;;  %v459_v52 = vpop.xlane.xlu1 %458  ;;  %v593_v54 = vshra.s32 %v3821_v43, 16 }
 0x2bd   :  { %vm491_vm9 = vcmp.eq.f32.partialorder %v3729_v11, %v459_v52  ;;  %581 = vmin.xlane.f32.xlu0 %v3824_v49  ;;  %v462_v55 = vpop.xlane.xlu0 %461  ;;  %v608_v40 = vshra.s32 %v3827_v37, 16 }
 0x2be   :  { %v507_v58 = vsel %vm491_vm9, %v3774_v36, 4  ;;  %vm492_vm10 = vcmp.eq.f32.partialorder %v3732_v17, %v462_v55  ;;  %v3836_v59 = vcvt.s32.f32 %v593_v54 }
 0x2bf   :  { %v3839_v44 = vsel %vm257_vm1, %v507_v58, 2147483647  ;;  %v508_v6 = vsel %vm492_vm10, %v3774_v36, 4  ;;  %v3842_v63 = vcvt.s32.f32 %v608_v40 }
 0x2c0   :  { %v3845_v0 = vsel %vm257_vm1, %v508_v6, 2147483647  ;;  %596 = vmin.xlane.f32.xlu1 %v3836_v59  ;;  %v465_v47 = vpop.xlane.xlu1 %464  ;;  %v623_v9 = vshra.s32 %v3839_v44, 16 }
 0x2c1   :  { %vm493_vm11 = vcmp.eq.f32.partialorder %v3739_v25, %v465_v47  ;;  %611 = vmin.xlane.f32.xlu0 %v3842_v63  ;;  %v468_v13 = vpop.xlane.xlu0 %467  ;;  %v638_v53 = vshra.s32 %v3845_v0, 16 }
 0x2c2   :  { %v509_v3 = vsel %vm493_vm11, %v3774_v36, 4  ;;  %vm494_vm12 = vcmp.eq.f32.partialorder %v3742_v46, %v468_v13  ;;  %v3854_v4 = vcvt.s32.f32 %v623_v9 }
 0x2c3   :  { %v3857_v60 = vsel %vm257_vm1, %v509_v3, 2147483647  ;;  %v510_v26 = vsel %vm494_vm12, %v3774_v36, 4  ;;  %v3860_v31 = vcvt.s32.f32 %v638_v53 }
 0x2c4   :  { %v3863_v8 = vsel %vm257_vm1, %v510_v26, 2147483647  ;;  %626 = vmin.xlane.f32.xlu1 %v3854_v4  ;;  %v471_v38 = vpop.xlane.xlu1 %470  ;;  %v653_v39 = vshra.s32 %v3857_v60, 16 }
 0x2c5   :  { %vm495_vm13 = vcmp.eq.f32.partialorder %v3749_v50, %v471_v38  ;;  %641 = vmin.xlane.f32.xlu0 %v3860_v31  ;;  %v474_v35 = vpop.xlane.xlu0 %473  ;;  %v668_v41 = vshra.s32 %v3863_v8, 16 }
 0x2c6   :  { %v511_v45 = vsel %vm495_vm13, %v3774_v36, 4  ;;  %vm496_vm14 = vcmp.eq.f32.partialorder %v3752_v33, %v474_v35  ;;  %v3872_v48 = vcvt.s32.f32 %v653_v39 }
 0x2c7   :  { %v3875_v52 = vsel %vm257_vm1, %v511_v45, 2147483647  ;;  %v512_v54 = vsel %vm496_vm14, %v3774_v36, 4  ;;  %v3878_v55 = vcvt.s32.f32 %v668_v41 }
 0x2c8   :  { %v3881_v40 = vsel %vm257_vm1, %v512_v54, 2147483647  ;;  %656 = vmin.xlane.f32.xlu1 %v3872_v48  ;;  %v477_v58 = vpop.xlane.xlu1 %476  ;;  %v683_v6 = vshra.s32 %v3875_v52, 16 }
 0x2c9   :  { %vm497_vm15 = vcmp.eq.f32.partialorder %v3759_v57, %v477_v58  ;;  %671 = vmin.xlane.f32.xlu0 %v3878_v55  ;;  %v480_v47 = vpop.xlane.xlu0 %479  ;;  %v698_v9 = vshra.s32 %v3881_v40, 16 }
 0x2ca   :  { %v513_v13 = vsel %vm497_vm15, %v3774_v36, 4  ;;  %vm498_vm2 = vcmp.eq.f32.partialorder %v3762_v12, %v480_v47  ;;  %v3890_v53 = vcvt.s32.f32 %v683_v6 }
 0x2cb   :  { %v3893_v3 = vsel %vm257_vm1, %v513_v13, 2147483647  ;;  %v514_v26 = vsel %vm498_vm2, %v3774_v36, 4  ;;  %v3896_v38 = vcvt.s32.f32 %v698_v9 }
 0x2cc   :  { %v3899_v39 = vsel %vm257_vm1, %v514_v26, 2147483647  ;;  %686 = vmin.xlane.f32.xlu1 %v3890_v53  ;;  %v483_v35 = vpop.xlane.xlu1 %482  ;;  %v713_v41 = vshra.s32 %v3893_v3, 16  ;;  %v517_v26 = vand.u32 65535, %v3779_v42  ;;  %v562_v42 = vand.u32 65535, %v3805_v7 }
 0x2cd   :  { %vm499_vm3 = vcmp.eq.f32.partialorder %v3769_v61, %v483_v35  ;;  %701 = vmin.xlane.f32.xlu0 %v3896_v38  ;;  %v728_v45 = vshra.s32 %v3899_v39, 16  ;;  %v607_v7 = vand.u32 65535, %v3827_v37  ;;  %v637_v37 = vand.u32 65535, %v3845_v0 }
 0x2ce   :  { %v515_v54 = vsel %vm499_vm3, %v3774_v36, 4  ;;  %v3907_v58 = vcvt.s32.f32 %v713_v41  ;;  %v519_v41 = vcvt.s32.f32 %v517_v26  ;;  %v564_v26 = vcvt.s32.f32 %v562_v42 }
 0x2cf   :  { %v3910_v6 = vsel %vm257_vm1, %v515_v54, 2147483647  ;;  %v3912_v47 = vcvt.s32.f32 %v728_v45  ;;  %v547_v54 = vand.u32 65535, %v3789_v20  ;;  %v532_v45 = vand.u32 65535, %v3792_v21 }
 0x2d0   :  { %716 = vmin.xlane.f32.xlu1 %v3907_v58  ;;  %v743_v9 = vshra.s32 %v3910_v6, 16  ;;  %v667_v0 = vand.u32 65535, %v3863_v8  ;;  %v697_v8 = vand.u32 65535, %v3881_v40  ;;  %v727_v40 = vand.u32 65535, %v3899_v39 }
 0x2d1   :  { %731 = vmin.xlane.f32.xlu0 %v3912_v47  ;;  %v534_v23 = vcvt.s32.f32 %v532_v45 }
 0x2d2   :  { %v3917_v13 = vcvt.s32.f32 %v743_v9  ;;  %v549_v9 = vcvt.s32.f32 %v547_v54 }
 0x2d4   :  { %746 = vmin.xlane.f32.xlu1 %v3917_v13 }
 0x340   :  { %v3921_v35 = vpop.xlane.xlu0 %521 }
 0x341   :  { %vm523_vm4 = vcmp.eq.f32.partialorder %v3785_v16, %v3921_v35  ;;  %v577_v16 = vand.u32 65535, %v3810_v34 }
 0x342   :  { %v524_v62 = vsel %vm523_vm4, %v519_v41, inf  ;;  %v592_v41 = vand.u32 65535, %v3821_v43  ;;  %v622_v43 = vand.u32 65535, %v3839_v44  ;;  %v652_v44 = vand.u32 65535, %v3857_v60 }
 0x343   :  { %525 = vmin.xlane.f32.xlu0 %v524_v62  ;;  %v682_v60 = vand.u32 65535, %v3875_v52  ;;  %v712_v52 = vand.u32 65535, %v3893_v3  ;;  %v742_v3 = vand.u32 65535, %v3910_v6 }
 0x344   :  { %v3927_v27 = vpop.xlane.xlu0 %551  ;;  %v594_v45 = vcvt.s32.f32 %v592_v41 }
 0x345   :  { %v3929_v24 = vpop.xlane.xlu1 %536  ;;  %vm553_vm5 = vcmp.eq.f32.partialorder %v3798_v28, %v3927_v27  ;;  %v579_v28 = vcvt.s32.f32 %v577_v16  ;;  %v624_v16 = vcvt.s32.f32 %v622_v43 }
 0x346   :  { %vm538_vm6 = vcmp.eq.f32.partialorder %v3802_v32, %v3929_v24  ;;  %v554_v20 = vsel %vm553_vm5, %v549_v9, inf }
 0x347   :  { %v539_v21 = vsel %vm538_vm6, %v534_v23, inf  ;;  %555 = vmin.xlane.f32.xlu0 %v554_v20 }
 0x348   :  { %540 = vmin.xlane.f32.xlu1 %v539_v21 }
 0x349   :  { %v3937_v62 = vpop.xlane.xlu1 %566 }
 0x34a   :  { %v3940_v54 = vpop.xlane.xlu0 %581  ;;  %vm568_vm7 = vcmp.eq.f32.partialorder %v3818_v30, %v3937_v62  ;;  %v609_v30 = vcvt.s32.f32 %v607_v7 }
 0x34b   :  { %v569_v32 = vsel %vm568_vm7, %v564_v26, inf  ;;  %vm583_vm8 = vcmp.eq.f32.partialorder %v3824_v49, %v3940_v54 }
 0x34c   :  { %570 = vmin.xlane.f32.xlu1 %v569_v32  ;;  %v584_v23 = vsel %vm583_vm8, %v579_v28, inf  ;;  %v654_v28 = vcvt.s32.f32 %v652_v44  ;;  %v744_v44 = vcvt.s32.f32 %v742_v3 }
 0x34d   :  { %585 = vmin.xlane.f32.xlu0 %v584_v23  ;;  %v3947_v34 = vpop.xlane.xlu1 %596 }
 0x34e   :  { %v3950_v9 = vpop.xlane.xlu0 %611  ;;  %vm598_vm9 = vcmp.eq.f32.partialorder %v3836_v59, %v3947_v34  ;;  %v639_v59 = vcvt.s32.f32 %v637_v37 }
 0x34f   :  { %v599_v42 = vsel %vm598_vm9, %v594_v45, inf  ;;  %vm613_vm10 = vcmp.eq.f32.partialorder %v3842_v63, %v3950_v9  ;;  %v684_v45 = vcvt.s32.f32 %v682_v60 }
 0x350   :  { %600 = vmin.xlane.f32.xlu1 %v599_v42  ;;  %v614_v49 = vsel %vm613_vm10, %v609_v30, inf  ;;  %v714_v42 = vcvt.s32.f32 %v712_v52 }
 0x351   :  { %615 = vmin.xlane.f32.xlu0 %v614_v49  ;;  %v3957_v20 = vpop.xlane.xlu1 %626 }
 0x352   :  { %v3960_v21 = vpop.xlane.xlu0 %641  ;;  %vm628_vm11 = vcmp.eq.f32.partialorder %v3854_v4, %v3957_v20  ;;  %v669_v4 = vcvt.s32.f32 %v667_v0 }
 0x353   :  { %v629_v26 = vsel %vm628_vm11, %v624_v16, inf  ;;  %vm643_vm12 = vcmp.eq.f32.partialorder %v3860_v31, %v3960_v21 }
 0x354   :  { %630 = vmin.xlane.f32.xlu1 %v629_v26  ;;  %v644_v63 = vsel %vm643_vm12, %v639_v59, inf  ;;  %v528_v59 = vcvt.f32.s32 %v3921_v35 }
 0x355   :  { %645 = vmin.xlane.f32.xlu0 %v644_v63  ;;  %v3967_v41 = vpop.xlane.xlu1 %656 }
 0x356   :  { %v3970_v7 = vpop.xlane.xlu0 %671  ;;  %vm658_vm13 = vcmp.eq.f32.partialorder %v3872_v48, %v3967_v41  ;;  %v699_v48 = vcvt.s32.f32 %v697_v8  ;;  %v529_v26 = vshll.u32 %v528_v59, 16  ;;  %v573_v8 = vcvt.f32.s32 %v3937_v62 }
 0x357   :  { %v659_v32 = vsel %vm658_vm13, %v654_v28, inf  ;;  %vm673_vm14 = vcmp.eq.f32.partialorder %v3878_v55, %v3970_v7  ;;  %v633_v59 = vcvt.f32.s32 %v3957_v20 }
 0x358   :  { %660 = vmin.xlane.f32.xlu1 %v659_v32  ;;  %v674_v31 = vsel %vm673_vm14, %v669_v4, inf  ;;  %v588_v32 = vcvt.f32.s32 %v3940_v54  ;;  %v574_v54 = vshll.u32 %v573_v8, 16 }
 0x359   :  { %675 = vmin.xlane.f32.xlu0 %v674_v31  ;;  %v3977_v23 = vpop.xlane.xlu1 %686 }
 0x35a   :  { %v3980_v43 = vpop.xlane.xlu0 %701  ;;  %vm688_vm15 = vcmp.eq.f32.partialorder %v3890_v53, %v3977_v23  ;;  %v729_v53 = vcvt.s32.f32 %v727_v40 }
 0x35b   :  { %v689_v30 = vsel %vm688_vm15, %v684_v45, inf  ;;  %vm703_vm2 = vcmp.eq.f32.partialorder %v3896_v38, %v3980_v43 }
 0x35c   :  { %690 = vmin.xlane.f32.xlu1 %v689_v30  ;;  %v704_v55 = vsel %vm703_vm2, %v699_v48, inf  ;;  %v589_v48 = vshll.u32 %v588_v32, 16  ;;  %v603_v30 = vcvt.f32.s32 %v3947_v34 }
 0x35d   :  { %705 = vmin.xlane.f32.xlu0 %v704_v55  ;;  %v3987_v37 = vpop.xlane.xlu1 %716 }
 0x35e   :  { %v3990_v49 = vpop.xlane.xlu0 %731  ;;  %vm718_vm3 = vcmp.eq.f32.partialorder %v3907_v58, %v3987_v37  ;;  %v558_v58 = vcvt.f32.s32 %v3927_v27 }
 0x35f   :  { %v719_v16 = vsel %vm718_vm3, %v714_v42, inf  ;;  %vm733_vm4 = vcmp.eq.f32.partialorder %v3912_v47, %v3990_v49  ;;  %v543_v47 = vcvt.f32.s32 %v3929_v24 }
 0x360   :  { %720 = vmin.xlane.f32.xlu1 %v719_v16  ;;  %v734_v38 = vsel %vm733_vm4, %v729_v53, inf  ;;  %v559_v60 = vshll.u32 %v558_v58, 16  ;;  %v618_v53 = vcvt.f32.s32 %v3950_v9 }
 0x361   :  { %735 = vmin.xlane.f32.xlu0 %v734_v38  ;;  %v3996_v39 = vpop.xlane.xlu1 %746  ;;  %v544_v35 = vshll.u32 %v543_v47, 16 }
 0x362   :  { %vm748_vm5 = vcmp.eq.f32.partialorder %v3917_v13, %v3996_v39 }
 0x363   :  { %v749_v6 = vsel %vm748_vm5, %v744_v44, inf }
 0x364   :  { %750 = vmin.xlane.f32.xlu1 %v749_v6 }
 0x3d0   :  { %v526_v0 = vpop.xlane.xlu0 %525 }
 0x3d1   :  { %v527_v63 = vcvt.f32.s32 %v526_v0  ;;  %v604_v0 = vshll.u32 %v603_v30, 16  ;;  %v678_v30 = vcvt.f32.s32 %v3970_v7 }
 0x3d3   :  { %v4003_v28 = vadd.s32 %v529_v26, %v527_v63  ;;  %v648_v26 = vcvt.f32.s32 %v3960_v21 }
 0x3d4   :  { %v556_v4 = vpop.xlane.xlu0 %555 }
 0x3d5   :  { %v541_v13 = vpop.xlane.xlu1 %540  ;;  %v557_v31 = vcvt.f32.s32 %v556_v4  ;;  %vm756_vm6 = vcmp.eq.s32.totalorder %v3774_v36, %v4003_v28 }
 0x3d6   :  { %v542_v27 = vcvt.f32.s32 %v541_v13  ;;  %v4013_v24 = vsel %vm756_vm6, -inf, %v3694_v56  ;;  %v634_v13 = vshll.u32 %v633_v59, 16 }
 0x3d7   :  { %v4015_v45 = vadd.s32 %v559_v60, %v557_v31  ;;  %v820_v62 = vsel %vm257_vm1, %v4013_v24, -inf  ;;  %v619_v60 = vshll.u32 %v618_v53, 16 }
 0x3d8   :  { %v4019_v52 = vadd.s32 %v544_v35, %v542_v27  ;;  %821 = vmax.xlane.f32.xlu0 %v820_v62  ;;  %v649_v62 = vshll.u32 %v648_v26, 16 }
 0x3d9   :  { %v571_v40 = vpop.xlane.xlu1 %570  ;;  %vm758_vm7 = vcmp.eq.s32.totalorder %v3774_v36, %v4015_v45 }
 0x3da   :  { %v572_v55 = vcvt.f32.s32 %v571_v40  ;;  %v586_v42 = vpop.xlane.xlu0 %585  ;;  %vm757_vm8 = vcmp.eq.s32.totalorder %v3774_v36, %v4019_v52  ;;  %v4030_v3 = vsel %vm758_vm7, -inf, %v3699_v2  ;;  %v774_v28 = vsel %vm758_vm7, %v3699_v2, 0.0 }
 0x3db   :  { %v587_v16 = vcvt.f32.s32 %v586_v42  ;;  %v4037_v38 = vsel %vm757_vm8, -inf, %v3702_v5  ;;  %v826_v34 = vsel %vm257_vm1, %v4030_v3, -inf }
 0x3dc   :  { %v4041_v44 = vadd.s32 %v574_v54, %v572_v55  ;;  %v823_v6 = vsel %vm257_vm1, %v4037_v38, -inf  ;;  %827 = vmax.xlane.f32.xlu0 %v826_v34  ;;  %v663_v54 = vcvt.f32.s32 %v3967_v41 }
 0x3dd   :  { %v4046_v58 = vadd.s32 %v589_v48, %v587_v16  ;;  %824 = vmax.xlane.f32.xlu1 %v823_v6  ;;  %v601_v9 = vpop.xlane.xlu1 %600  ;;  %v693_v16 = vcvt.f32.s32 %v3977_v23 }
 0x3de   :  { %v602_v63 = vcvt.f32.s32 %v601_v9  ;;  %v616_v47 = vpop.xlane.xlu0 %615  ;;  %vm759_vm9 = vcmp.eq.s32.totalorder %v3774_v36, %v4041_v44  ;;  %v664_v9 = vshll.u32 %v663_v54, 16 }
 0x3df   :  { %v617_v4 = vcvt.f32.s32 %v616_v47  ;;  %v4055_v8 = vsel %vm759_vm9, -inf, %v3709_v51  ;;  %vm760_vm10 = vcmp.eq.s32.totalorder %v3774_v36, %v4046_v58  ;;  %v679_v47 = vshll.u32 %v678_v30, 16 }
 0x3e0   :  { %v4059_v20 = vadd.s32 %v604_v0, %v602_v63  ;;  %v829_v21 = vsel %vm257_vm1, %v4055_v8, -inf  ;;  %v4067_v32 = vsel %vm760_vm10, -inf, %v3712_v18  ;;  %v708_v0 = vcvt.f32.s32 %v3980_v43 }
 0x3e1   :  { %v4069_v31 = vadd.s32 %v619_v60, %v617_v4  ;;  %830 = vmax.xlane.f32.xlu1 %v829_v21  ;;  %v631_v35 = vpop.xlane.xlu1 %630  ;;  %v832_v27 = vsel %vm257_vm1, %v4067_v32, -inf }
 0x3e2   :  { %v632_v48 = vcvt.f32.s32 %v631_v35  ;;  %833 = vmax.xlane.f32.xlu0 %v832_v27  ;;  %v646_v40 = vpop.xlane.xlu0 %645  ;;  %vm761_vm11 = vcmp.eq.s32.totalorder %v3774_v36, %v4059_v20  ;;  %v709_v54 = vshll.u32 %v708_v0, 16 }
 0x3e3   :  { %v647_v55 = vcvt.f32.s32 %v646_v40  ;;  %v4081_v42 = vsel %vm761_vm11, -inf, %v3719_v22  ;;  %vm762_vm12 = vcmp.eq.s32.totalorder %v3774_v36, %v4069_v31 }
 0x3e4   :  { %v4085_v53 = vadd.s32 %v634_v13, %v632_v48  ;;  %v835_v41 = vsel %vm257_vm1, %v4081_v42, -inf  ;;  %v4093_v7 = vsel %vm762_vm12, -inf, %v3722_v1  ;;  %v694_v13 = vshll.u32 %v693_v16, 16 }
 0x3e5   :  { %v4096_v34 = vadd.s32 %v649_v62, %v647_v55  ;;  %836 = vmax.xlane.f32.xlu1 %v835_v41  ;;  %v661_v6 = vpop.xlane.xlu1 %660  ;;  %v838_v59 = vsel %vm257_vm1, %v4093_v7, -inf  ;;  %v723_v48 = vcvt.f32.s32 %v3987_v37  ;;  %v738_v55 = vcvt.f32.s32 %v3990_v49 }
 0x3e6   :  { %v662_v26 = vcvt.f32.s32 %v661_v6  ;;  %839 = vmax.xlane.f32.xlu0 %v838_v59  ;;  %v676_v63 = vpop.xlane.xlu0 %675  ;;  %vm763_vm13 = vcmp.eq.s32.totalorder %v3774_v36, %v4085_v53 }
 0x3e7   :  { %v677_v60 = vcvt.f32.s32 %v676_v63  ;;  %v4107_v23 = vsel %vm763_vm13, -inf, %v3729_v11  ;;  %vm764_vm14 = vcmp.eq.s32.totalorder %v3774_v36, %v4096_v34  ;;  %v753_v63 = vcvt.f32.s32 %v3996_v39 }
 0x3e8   :  { %v4111_v4 = vadd.s32 %v664_v9, %v662_v26  ;;  %v841_v43 = vsel %vm257_vm1, %v4107_v23, -inf  ;;  %v4119_v21 = vsel %vm764_vm14, -inf, %v3732_v17  ;;  %v724_v26 = vshll.u32 %v723_v48, 16 }
 0x3e9   :  { %v4121_v35 = vadd.s32 %v679_v47, %v677_v60  ;;  %842 = vmax.xlane.f32.xlu1 %v841_v43  ;;  %v691_v27 = vpop.xlane.xlu1 %690  ;;  %v844_v62 = vsel %vm257_vm1, %v4119_v21, -inf  ;;  %v739_v43 = vshll.u32 %v738_v55, 16  ;;  %v754_v55 = vshll.u32 %v753_v63, 16 }
 0x3ea   :  { %5623 = vst [vmem:[#allocation12_spill] sm:$0xff] %v4111_v4  ;;  %v692_v40 = vcvt.f32.s32 %v691_v27  ;;  %845 = vmax.xlane.f32.xlu0 %v844_v62  ;;  %v706_v30 = vpop.xlane.xlu0 %705  ;;  %vm765_vm15 = vcmp.eq.s32.totalorder %v3774_v36, %v4111_v4  ;;  %v3226_v4 = vld [vmem:[%s5545_s3 + $0x20] ss:$12 sps:$4 sm:$0xff]  }
 0x3eb   :  { %5624 = vst [vmem:[#allocation13_spill] sm:$0xff] %v4121_v35  ;;  %v707_v41 = vcvt.f32.s32 %v706_v30  ;;  %v4133_v16 = vsel %vm765_vm15, -inf, %v3739_v25  ;;  %vm766_vm2 = vcmp.eq.s32.totalorder %v3774_v36, %v4121_v35  ;;  %v1728_v25 = vld [vmem:[%s5546_s9] sm:$0xff] }
 0x3ec   :  { %v4137_v6 = vadd.s32 %v694_v13, %v692_v40  ;;  %v847_v37 = vsel %vm257_vm1, %v4133_v16, -inf  ;;  %v4145_v49 = vsel %vm766_vm2, -inf, %v3742_v46 }
 0x3ed   :  { %v4147_v59 = vadd.s32 %v709_v54, %v707_v41  ;;  %848 = vmax.xlane.f32.xlu1 %v847_v37  ;;  %v721_v9 = vpop.xlane.xlu1 %720  ;;  %v850_v0 = vsel %vm257_vm1, %v4145_v49, -inf }
 0x3ee   :  { %5625 = vst [vmem:[#allocation14_spill] sm:$0xff] %v4137_v6  ;;  %v722_v47 = vcvt.f32.s32 %v721_v9  ;;  %851 = vmax.xlane.f32.xlu0 %v850_v0  ;;  %v736_v60 = vpop.xlane.xlu0 %735  ;;  %vm5560_vm3 = vcmp.eq.s32.totalorder %v3774_v36, %v4137_v6 }
 0x3ef   :  { %5626 = vst [vmem:[#allocation15_spill] sm:$0xff] %v4147_v59  ;;  %v737_v13 = vcvt.f32.s32 %v736_v60  ;;  %v4158_v27 = vsel %vm5560_vm3, -inf, %v3749_v50  ;;  %vm5557_vm4 = vcmp.eq.s32.totalorder %v3774_v36, %v4147_v59 }
 0x3f0   :  { %v4162_v62 = vadd.s32 %v724_v26, %v722_v47  ;;  %v853_v39 = vsel %vm257_vm1, %v4158_v27, -inf  ;;  %v4170_v54 = vsel %vm5557_vm4, -inf, %v3752_v33 }
 0x3f1   :  { %v4172_v48 = vadd.s32 %v739_v43, %v737_v13  ;;  %854 = vmax.xlane.f32.xlu1 %v853_v39  ;;  %v751_v40 = vpop.xlane.xlu1 %750  ;;  %v856_v30 = vsel %vm257_vm1, %v4170_v54, -inf }
 0x3f2   :  { %5627 = vst [vmem:[#allocation16_spill] sm:$0xff] %v4162_v62  ;;  %v752_v41 = vcvt.f32.s32 %v751_v40  ;;  %857 = vmax.xlane.f32.xlu0 %v856_v30  ;;  %vm5558_vm5 = vcmp.eq.s32.totalorder %v3774_v36, %v4162_v62 }
 0x3f3   :  { %5628 = vst [vmem:[#allocation17_spill] sm:$0xff] %v4172_v48  ;;  %v4182_v37 = vsel %vm5558_vm5, -inf, %v3759_v57  ;;  %vm5559_vm4 = vcmp.eq.s32.totalorder %v3774_v36, %v4172_v48 }
 0x3f4   :  { %v4186_v9 = vadd.s32 %v754_v55, %v752_v41  ;;  %v859_v0 = vsel %vm257_vm1, %v4182_v37, -inf  ;;  %v4194_v26 = vsel %vm5559_vm4, -inf, %v3762_v12 }
 0x3f5   :  { %860 = vmax.xlane.f32.xlu1 %v859_v0  ;;  %v862_v63 = vsel %vm257_vm1, %v4194_v26, -inf }
 0x3f6   :  { %5629 = vst [vmem:[#allocation18_spill] sm:$0xff] %v4186_v9  ;;  %863 = vmax.xlane.f32.xlu0 %v862_v63  ;;  %vm5561_vm5 = vcmp.eq.s32.totalorder %v3774_v36, %v4186_v9 }
 0x3f7   :  { %v4204_v47 = vsel %vm5561_vm5, -inf, %v3769_v61 }
 0x3f8   :  { %v865_v60 = vsel %vm257_vm1, %v4204_v47, -inf }
 0x3f9   :  { %866 = vmax.xlane.f32.xlu1 %v865_v60 }
 0x465   :  { %v822_v43 = vpop.xlane.xlu0 %821 }
 0x466   :  { %vm868_vm4 = vcmp.eq.f32.partialorder %v4013_v24, %v822_v43 }
 0x467   :  { %v884_v13 = vsel %vm868_vm4, %v3774_v36, 4 }
 0x468   :  { %v4211_v39 = vsel %vm257_vm1, %v884_v13, 2147483647 }
 0x469   :  { %v828_v40 = vpop.xlane.xlu0 %827  ;;  %v902_v30 = vshra.s32 %v4211_v39, 16 }
 0x46a   :  { %v825_v55 = vpop.xlane.xlu1 %824  ;;  %vm870_vm3 = vcmp.eq.f32.partialorder %v4030_v3, %v828_v40 }
 0x46b   :  { %vm869_vm5 = vcmp.eq.f32.partialorder %v4037_v38, %v825_v55  ;;  %v886_v41 = vsel %vm870_vm3, %v3774_v36, 4  ;;  %v4217_v0 = vcvt.s32.f32 %v902_v30 }
 0x46c   :  { %v885_v63 = vsel %vm869_vm5, %v3774_v36, 4  ;;  %v4221_v24 = vsel %vm257_vm1, %v886_v41, 2147483647 }
 0x46d   :  { %v4224_v60 = vsel %vm257_vm1, %v885_v63, 2147483647  ;;  %v932_v43 = vshra.s32 %v4221_v24, 16  ;;  %905 = vmin.xlane.f32.xlu0 %v4217_v0 }
 0x46e   :  { %v831_v13 = vpop.xlane.xlu1 %830  ;;  %v917_v3 = vshra.s32 %v4224_v60, 16 }
 0x46f   :  { %vm871_vm4 = vcmp.eq.f32.partialorder %v4055_v8, %v831_v13  ;;  %v834_v38 = vpop.xlane.xlu0 %833  ;;  %v4230_v40 = vcvt.s32.f32 %v932_v43 }
 0x470   :  { %v887_v30 = vsel %vm871_vm4, %v3774_v36, 4  ;;  %vm872_vm3 = vcmp.eq.f32.partialorder %v4067_v32, %v834_v38  ;;  %v4234_v55 = vcvt.s32.f32 %v917_v3 }
 0x471   :  { %v4237_v41 = vsel %vm257_vm1, %v887_v30, 2147483647  ;;  %v888_v63 = vsel %vm872_vm3, %v3774_v36, 4  ;;  %935 = vmin.xlane.f32.xlu0 %v4230_v40 }
 0x472   :  { %v947_v9 = vshra.s32 %v4237_v41, 16  ;;  %v4243_v8 = vsel %vm257_vm1, %v888_v63, 2147483647  ;;  %920 = vmin.xlane.f32.xlu1 %v4234_v55  ;;  %v837_v43 = vpop.xlane.xlu1 %836 }
 0x473   :  { %v962_v13 = vshra.s32 %v4243_v8, 16  ;;  %vm873_vm5 = vcmp.eq.f32.partialorder %v4081_v42, %v837_v43  ;;  %v840_v32 = vpop.xlane.xlu0 %839 }
 0x474   :  { %v889_v3 = vsel %vm873_vm5, %v3774_v36, 4  ;;  %vm874_vm4 = vcmp.eq.f32.partialorder %v4093_v7, %v840_v32  ;;  %v4250_v38 = vcvt.s32.f32 %v947_v9 }
 0x475   :  { %v4253_v30 = vsel %vm257_vm1, %v889_v3, 2147483647  ;;  %v890_v63 = vsel %vm874_vm4, %v3774_v36, 4  ;;  %v4256_v61 = vcvt.s32.f32 %v962_v13 }
 0x476   :  { %v977_v48 = vshra.s32 %v4253_v30, 16  ;;  %v4260_v12 = vsel %vm257_vm1, %v890_v63, 2147483647  ;;  %950 = vmin.xlane.f32.xlu1 %v4250_v38  ;;  %v843_v42 = vpop.xlane.xlu1 %842 }
 0x477   :  { %v992_v43 = vshra.s32 %v4260_v12, 16  ;;  %vm875_vm3 = vcmp.eq.f32.partialorder %v4107_v23, %v843_v42  ;;  %965 = vmin.xlane.f32.xlu0 %v4256_v61  ;;  %v846_v7 = vpop.xlane.xlu0 %845 }
 0x478   :  { %v891_v9 = vsel %vm875_vm3, %v3774_v36, 4  ;;  %vm876_vm5 = vcmp.eq.f32.partialorder %v4119_v21, %v846_v7  ;;  %v4268_v13 = vcvt.s32.f32 %v977_v48 }
 0x479   :  { %v4271_v32 = vsel %vm257_vm1, %v891_v9, 2147483647  ;;  %v892_v3 = vsel %vm876_vm5, %v3774_v36, 4  ;;  %v4274_v63 = vcvt.s32.f32 %v992_v43 }
 0x47a   :  { %v1007_v62 = vshra.s32 %v4271_v32, 16  ;;  %v4278_v23 = vsel %vm257_vm1, %v892_v3, 2147483647  ;;  %980 = vmin.xlane.f32.xlu1 %v4268_v13  ;;  %v849_v42 = vpop.xlane.xlu1 %848 }
 0x47b   :  { %v1022_v57 = vshra.s32 %v4278_v23, 16  ;;  %vm877_vm4 = vcmp.eq.f32.partialorder %v4133_v16, %v849_v42  ;;  %995 = vmin.xlane.f32.xlu0 %v4274_v63  ;;  %v852_v21 = vpop.xlane.xlu0 %851 }
 0x47c   :  { %v893_v48 = vsel %vm877_vm4, %v3774_v36, 4  ;;  %vm878_vm3 = vcmp.eq.f32.partialorder %v4145_v49, %v852_v21  ;;  %v4286_v43 = vcvt.s32.f32 %v1007_v62 }
 0x47d   :  { %v4289_v7 = vsel %vm257_vm1, %v893_v48, 2147483647  ;;  %v894_v9 = vsel %vm878_vm3, %v3774_v36, 4  ;;  %v4292_v3 = vcvt.s32.f32 %v1022_v57 }
 0x47e   :  { %v1037_v59 = vshra.s32 %v4289_v7, 16  ;;  %v4296_v16 = vsel %vm257_vm1, %v894_v9, 2147483647  ;;  %1010 = vmin.xlane.f32.xlu1 %v4286_v43  ;;  %v855_v42 = vpop.xlane.xlu1 %854 }
 0x47f   :  { %v1052_v33 = vshra.s32 %v4296_v16, 16  ;;  %vm879_vm5 = vcmp.eq.f32.partialorder %v4158_v27, %v855_v42  ;;  %1025 = vmin.xlane.f32.xlu0 %v4292_v3  ;;  %v858_v49 = vpop.xlane.xlu0 %857 }
 0x480   :  { %v895_v62 = vsel %vm879_vm5, %v3774_v36, 4  ;;  %vm880_vm4 = vcmp.eq.f32.partialorder %v4170_v54, %v858_v49  ;;  %v4304_v57 = vcvt.s32.f32 %v1037_v59 }
 0x481   :  { %v4307_v21 = vsel %vm257_vm1, %v895_v62, 2147483647  ;;  %v896_v48 = vsel %vm880_vm4, %v3774_v36, 4  ;;  %v4310_v9 = vcvt.s32.f32 %v1052_v33 }
 0x482   :  { %v1067_v6 = vshra.s32 %v4307_v21, 16  ;;  %v4314_v27 = vsel %vm257_vm1, %v896_v48, 2147483647  ;;  %1040 = vmin.xlane.f32.xlu1 %v4304_v57  ;;  %v861_v42 = vpop.xlane.xlu1 %860 }
 0x483   :  { %v1082_v50 = vshra.s32 %v4314_v27, 16  ;;  %vm881_vm3 = vcmp.eq.f32.partialorder %v4182_v37, %v861_v42  ;;  %1055 = vmin.xlane.f32.xlu0 %v4310_v9  ;;  %v864_v59 = vpop.xlane.xlu0 %863 }
 0x484   :  { %v897_v54 = vsel %vm881_vm3, %v3774_v36, 4  ;;  %vm882_vm5 = vcmp.eq.f32.partialorder %v4194_v26, %v864_v59  ;;  %v4322_v33 = vcvt.s32.f32 %v1067_v6  ;;  %vm5584_vm3 = vcmask 1043456  }
 0x485   :  { %v4325_v49 = vsel %vm257_vm1, %v897_v54, 2147483647  ;;  %v898_v62 = vsel %vm882_vm5, %v3774_v36, 4  ;;  %v4328_v48 = vcvt.s32.f32 %v1082_v50 }
 0x486   :  { %v1097_v35 = vshra.s32 %v4325_v49, 16  ;;  %v4332_v37 = vsel %vm257_vm1, %v898_v62, 2147483647  ;;  %1070 = vmin.xlane.f32.xlu1 %v4322_v33  ;;  %v867_v42 = vpop.xlane.xlu1 %866 }
 0x487   :  { %v1112_v46 = vshra.s32 %v4332_v37, 16  ;;  %vm883_vm4 = vcmp.eq.f32.partialorder %v4204_v47, %v867_v42  ;;  %1085 = vmin.xlane.f32.xlu0 %v4328_v48  ;;  %v3411_v47 = vmov 0   ;;  %v3223_v42 = vld [vmem:[%s5545_s3 + $0x1c] ss:$12 sps:$4 sm:$0xff]  }
 0x488   :  { %v899_v6 = vsel %vm883_vm4, %v3774_v36, 4  ;;  %v4339_v26 = vcvt.s32.f32 %v1097_v35  ;;  %v3218_v35 = vld [vmem:[%s5545_s3] ss:$12 sps:$4 sm:$0xff]   ;;  %1309 = vmatprep.mubr.bf16.mxu1 %v3411_v47 }
 0x489   :  { %v4342_v50 = vsel %vm257_vm1, %v899_v6, 2147483647  ;;  %v4344_v59 = vcvt.s32.f32 %v1112_v46  ;;  %v3220_v46 = vld [vmem:[%s5545_s3 + $0x4] ss:$12 sps:$4 sm:$0xff]  }
 0x48a   :  { %v1127_v54 = vshra.s32 %v4342_v50, 16  ;;  %1100 = vmin.xlane.f32.xlu1 %v4339_v26  ;;  %1277 = vmatprep.subr.bf16.mxu1 %v3220_v46  ;;  %v3221_v6 = vld [vmem:[%s5545_s3 + $0x18] ss:$12 sps:$4 sm:$0xff]   ;;  %v1729_v46 = vld [vmem:[%s5546_s9 + $0x8] sm:$0xf] }
 0x48b   :  { %1115 = vmin.xlane.f32.xlu0 %v4344_v59  ;;  %1278 = vmatpush1.bf16.msra.mxu1 %v3218_v35  ;;  %v1732_v35 = vcombine.high %v1728_v25, %v1728_v25 }
 0x48c   :  { %v4349_v62 = vcvt.s32.f32 %v1127_v54  ;;  %v3225_v54 = vld [vmem:[%s5545_s3 + $0x8] ss:$12 sps:$4 sm:$0xff]   ;;  %1279 = vmatprep.subr.bf16.mxu1 %v3223_v42 }
 0x48d   :  { %3100 = vmatprep.subr.bf16.mxu0 %v3225_v54 }
 0x48e   :  { %1130 = vmin.xlane.f32.xlu1 %v4349_v62  ;;  %3101 = vmatpush3.bf16.msra.mxu0 %v3225_v54 }
 0x48f   :  { %1280 = vmatpush1.bf16.msra.mxu1 %v3221_v6  ;;  %3102 = vmatprep.subr.bf16.mxu0 %v3226_v4 }
 0x490   :  { %3120 = vmatprep.subr.msk.mxu1 %vm5584_vm3, %v1729_v46 }
 0x492   :  { %2831 = vmatmul.mubr.msk.bf16.vlgmr.msra.gmra.mrb[8].mxu1 %vm5583_vm0, %v3556_v29  ;;  %3103 = vmatpush3.bf16.msra.mxu0 %v3226_v4  ;;  %v5630_v29 = vld [vmem:[#allocation2_spill] sm:$0xff]  ;;  %v5631_v4 = vld [vmem:[#allocation3_spill] sm:$0xff] }
 0x493   :  { %1319 = vmatprep.mubr.bf16.mxu1 %v3411_v47  ;;  %3121 = vmatpush3.msk.msra.mxu1 %vm5584_vm3, %v1729_v46  ;;  %v946_v46 = vand.u32 65535, %v4237_v41 }
 0x494   :  { %2847 = vmatprep.subr.msk.mxu0 %vm5584_vm3, %v1732_v35 }
 0x495   :  { %3105 = vmatmul.mubr.msk.bf16.vlgmr.msra.gmra.mrb[8].mxu0 %vm5583_vm0, %v3493_v10  ;;  %v948_v41 = vcvt.s32.f32 %v946_v46 }
 0x496   :  { %3108 = vmatprep.mubr.msk.bf16.mxu0 %vm5583_vm0, %v3504_v14  ;;  %2848 = vmatpush1.msk.msra.mxu0 %vm5584_vm3, %v1728_v25 }
 0x49a   :  { %2832 = vmatmul.mubr.msk.bf16.gmra.mrb[12].mxu1 %vm5583_vm0, %v3493_v10  ;;  %v5632_v10 = vld [vmem:[#allocation4_spill] sm:$0xff] }
 0x49b   :  { %1329 = vmatprep.mubr.bf16.mxu1 %v3411_v47 }
 0x49d   :  { %3109 = vmatmul.mubr.msk.bf16.gmra.mrb[12].mxu0 %vm5583_vm0, %v3506_v15 }
 0x49e   :  { %3112 = vmatprep.mubr.msk.bf16.mxu0 %vm5583_vm0, %v3517_v19 }
 0x4a2   :  { %2833 = vmatmul.mubr.msk.bf16.gmra.mrb[16].mxu1 %vm5583_vm0, %v3504_v14  ;;  %v901_v14 = vand.u32 65535, %v4211_v39 }
 0x4a3   :  { %1339 = vmatprep.mubr.bf16.mxu1 %v3411_v47 }
 0x4a4   :  { %v903_v42 = vcvt.s32.f32 %v901_v14 }
 0x4a5   :  { %3113 = vmatmul.mubr.msk.bf16.gmra.mrb[16].mxu0 %vm5583_vm0, %v5630_v29 }
 0x4a6   :  { %3116 = vmatprep.mubr.msk.bf16.mxu0 %vm5583_vm0, %v5631_v4 }
 0x4aa   :  { %2834 = vmatmul.mubr.msk.bf16.gmra.mrb[20].mxu1 %vm5583_vm0, %v3506_v15  ;;  %v931_v15 = vand.u32 65535, %v4221_v24  ;;  %v961_v24 = vand.u32 65535, %v4243_v8 }
 0x4ab   :  { %1349 = vmatprep.mubr.bf16.mxu1 %v3411_v47 }
 0x4ac   :  { %v963_v8 = vcvt.s32.f32 %v961_v24 }
 0x4ad   :  { %3117 = vmatmul.mubr.msk.bf16.gmra.mrb[20].mxu0 %vm5583_vm0, %v5632_v10 }
 0x4b2   :  { %2835 = vmatmul.mubr.msk.bf16.gmra.mrb[24].mxu1 %vm5583_vm0, %v3517_v19  ;;  %v916_v19 = vand.u32 65535, %v4224_v60 }
 0x4b3   :  { %1359 = vmatprep.mubr.bf16.mxu1 %v3411_v47 }
 0x4b4   :  { %v918_v39 = vcvt.s32.f32 %v916_v19 }
 0x4ba   :  { %2836 = vmatmul.mubr.msk.bf16.gmra.mrb[28].mxu1 %vm5583_vm0, %v5630_v29  ;;  %v976_v29 = vand.u32 65535, %v4253_v30 }
 0x4bb   :  { %1369 = vmatprep.mubr.bf16.mxu1 %v3411_v47 }
 0x4c2   :  { %2837 = vmatmul.mubr.msk.bf16.gmra.mrb[32].mxu1 %vm5583_vm0, %v5631_v4 }
 0x4c3   :  { %1379 = vmatprep.mubr.bf16.mxu1 %v3411_v47  ;;  %v933_v47 = vcvt.s32.f32 %v931_v15  ;;  %v1006_v15 = vand.u32 65535, %v4271_v32  ;;  %v1036_v32 = vand.u32 65535, %v4289_v7  ;;  %v1066_v7 = vand.u32 65535, %v4307_v21 }
 0x4c4   :  { %v1096_v21 = vand.u32 65535, %v4325_v49 }
 0x4c5   :  { %v1008_v46 = vcvt.s32.f32 %v1006_v15  ;;  %v1126_v15 = vand.u32 65535, %v4342_v50 }
 0x4c7   :  { %v1128_v50 = vcvt.s32.f32 %v1126_v15 }
 0x4ca   :  { %2838 = vmatmul.mubr.msk.bf16.gmra.mrb[36].mxu1 %vm5583_vm0, %v5632_v10  ;;  %v991_v10 = vand.u32 65535, %v4260_v12  ;;  %v1021_v12 = vand.u32 65535, %v4278_v23  ;;  %v1051_v23 = vand.u32 65535, %v4296_v16  ;;  %v1081_v16 = vand.u32 65535, %v4314_v27 }
 0x4cb   :  { %v1111_v27 = vand.u32 65535, %v4332_v37  ;;  %v1098_v37 = vcvt.s32.f32 %v1096_v21 }
 0x4cc   :  { %v993_v19 = vcvt.s32.f32 %v991_v10 }
 0x4fa   :  { %v4412_v25 = vpop.xlane.xlu0 %905 }
 0x4fb   :  { %vm907_vm5 = vcmp.eq.f32.partialorder %v4217_v0, %v4412_v25 }
 0x4fc   :  { %v908_v6 = vsel %vm907_vm5, %v903_v42, inf  ;;  %v978_v42 = vcvt.s32.f32 %v976_v29  ;;  %v1053_v29 = vcvt.s32.f32 %v1051_v23 }
 0x4fd   :  { %909 = vmin.xlane.f32.xlu0 %v908_v6 }
 0x4fe   :  { %v4417_v54 = vpop.xlane.xlu0 %935 }
 0x4ff   :  { %v4420_v35 = vpop.xlane.xlu1 %920  ;;  %vm937_vm4 = vcmp.eq.f32.partialorder %v4230_v40, %v4417_v54 }
 0x500   :  { %vm922_vm0 = vcmp.eq.f32.partialorder %v4234_v55, %v4420_v35  ;;  %v938_v60 = vsel %vm937_vm4, %v933_v47, inf }
 0x501   :  { %v923_v0 = vsel %vm922_vm0, %v918_v39, inf  ;;  %939 = vmin.xlane.f32.xlu0 %v938_v60  ;;  %v1023_v39 = vcvt.s32.f32 %v1021_v12  ;;  %v1113_v12 = vcvt.s32.f32 %v1111_v27  ;;  %v942_v27 = vcvt.f32.s32 %v4417_v54 }
 0x502   :  { %924 = vmin.xlane.f32.xlu1 %v923_v0  ;;  %v1038_v0 = vcvt.s32.f32 %v1036_v32 }
 0x503   :  { %v4428_v4 = vpop.xlane.xlu1 %950 }
 0x504   :  { %vm952_vm5 = vcmp.eq.f32.partialorder %v4250_v38, %v4428_v4  ;;  %v4433_v40 = vpop.xlane.xlu0 %965 }
 0x505   :  { %vm967_vm3 = vcmp.eq.f32.partialorder %v4256_v61, %v4433_v40  ;;  %v953_v55 = vsel %vm952_vm5, %v948_v41, inf  ;;  %v972_v54 = vcvt.f32.s32 %v4433_v40 }
 0x506   :  { %954 = vmin.xlane.f32.xlu1 %v953_v55  ;;  %v968_v14 = vsel %vm967_vm3, %v963_v8, inf  ;;  %v1068_v8 = vcvt.s32.f32 %v1066_v7  ;;  %v1083_v55 = vcvt.s32.f32 %v1081_v16 }
 0x507   :  { %969 = vmin.xlane.f32.xlu0 %v968_v14  ;;  %v4438_v30 = vpop.xlane.xlu1 %980  ;;  %v5585_v14 = vmov 0.0  }
 0x508   :  { %vm982_vm0 = vcmp.eq.f32.partialorder %v4268_v13, %v4438_v30  ;;  %v4443_v38 = vpop.xlane.xlu0 %995  ;;  %1852 = vmatprep.mubr.f32.mxu0 %v5585_v14 }
 0x509   :  { %vm997_vm4 = vcmp.eq.f32.partialorder %v4274_v63, %v4443_v38  ;;  %v983_v61 = vsel %vm982_vm0, %v978_v42, inf }
 0x50a   :  { %984 = vmin.xlane.f32.xlu1 %v983_v61  ;;  %v998_v6 = vsel %vm997_vm4, %v993_v19, inf }
 0x50b   :  { %999 = vmin.xlane.f32.xlu0 %v998_v6  ;;  %v4448_v47 = vpop.xlane.xlu1 %1010 }
 0x50c   :  { %vm1012_vm3 = vcmp.eq.f32.partialorder %v4286_v43, %v4448_v47  ;;  %v4453_v13 = vpop.xlane.xlu0 %1025 }
 0x50d   :  { %vm1027_vm5 = vcmp.eq.f32.partialorder %v4292_v3, %v4453_v13  ;;  %v1013_v63 = vsel %vm1012_vm3, %v1008_v46, inf }
 0x50e   :  { %1014 = vmin.xlane.f32.xlu1 %v1013_v63  ;;  %v1028_v24 = vsel %vm1027_vm5, %v1023_v39, inf }
 0x50f   :  { %1029 = vmin.xlane.f32.xlu0 %v1028_v24  ;;  %v4458_v60 = vpop.xlane.xlu1 %1040 }
 0x510   :  { %vm1042_vm0 = vcmp.eq.f32.partialorder %v4304_v57, %v4458_v60  ;;  %v4463_v43 = vpop.xlane.xlu0 %1055  ;;  %v1047_v20 = vcvt.f32.s32 %v4458_v60 }
 0x511   :  { %vm1057_vm4 = vcmp.eq.f32.partialorder %v4310_v9, %v4463_v43  ;;  %v1043_v3 = vsel %vm1042_vm0, %v1038_v0, inf }
 0x512   :  { %1044 = vmin.xlane.f32.xlu1 %v1043_v3  ;;  %v1058_v41 = vsel %vm1057_vm4, %v1053_v29, inf  ;;  %v912_v29 = vcvt.f32.s32 %v4412_v25  ;;  %v1048_v53 = vshll.u32 %v1047_v20, 16 }
 0x513   :  { %1059 = vmin.xlane.f32.xlu0 %v1058_v41  ;;  %v4468_v10 = vpop.xlane.xlu1 %1070 }
 0x514   :  { %vm1072_vm3 = vcmp.eq.f32.partialorder %v4322_v33, %v4468_v10  ;;  %v4473_v57 = vpop.xlane.xlu0 %1085  ;;  %v1077_v31 = vcvt.f32.s32 %v4468_v10 }
 0x515   :  { %vm1087_vm5 = vcmp.eq.f32.partialorder %v4328_v48, %v4473_v57  ;;  %v1073_v9 = vsel %vm1072_vm3, %v1068_v8, inf }
 0x516   :  { %1074 = vmin.xlane.f32.xlu1 %v1073_v9  ;;  %v1088_v49 = vsel %vm1087_vm5, %v1083_v55, inf }
 0x517   :  { %1089 = vmin.xlane.f32.xlu0 %v1088_v49  ;;  %v4479_v42 = vpop.xlane.xlu1 %1100  ;;  %v913_v49 = vshll.u32 %v912_v29, 16 }
 0x518   :  { %vm1102_vm0 = vcmp.eq.f32.partialorder %v4339_v26, %v4479_v42  ;;  %v4483_v33 = vpop.xlane.xlu0 %1115  ;;  %v4494_v26 = vld [vmem:[%s5547_s5 + $0x80] sm:$0xff]  }
 0x519   :  { %vm1117_vm4 = vcmp.eq.f32.partialorder %v4344_v59, %v4483_v33  ;;  %v1103_v19 = vsel %vm1102_vm0, %v1098_v37, inf  ;;  %3146 = vmatprep.subr.bf16.mxu0 %v4494_v26  ;;  %v3231_v59 = vld [vmem:[%s5547_s5 + $0x40] sm:$0xff]  }
 0x51a   :  { %1104 = vmin.xlane.f32.xlu1 %v1103_v19  ;;  %v1118_v48 = vsel %vm1117_vm4, %v1113_v12, inf  ;;  %2971 = vmatprep.subr.bf16.mxu1 %v3231_v59  ;;  %v927_v12 = vcvt.f32.s32 %v4420_v35  ;;  %v957_v59 = vcvt.f32.s32 %v4428_v4  ;;  %v772_v35 = vsel %vm756_vm6, %v3694_v56, 0.0 }
 0x51b   :  { %1119 = vmin.xlane.f32.xlu0 %v1118_v48  ;;  %v4487_v61 = vpop.xlane.xlu1 %1130  ;;  %v943_v48 = vshll.u32 %v942_v27, 16 }
 0x51c   :  { %vm1132_vm3 = vcmp.eq.f32.partialorder %v4349_v62, %v4487_v61 }
 0x51d   :  { %v1133_v6 = vsel %vm1132_vm3, %v1128_v50, inf }
 0x51e   :  { %1134 = vmin.xlane.f32.xlu1 %v1133_v6 }
 0x565   :  { %v4500_v32 = vpop.f32.mrb[8].mxu1 }
 0x566   :  { %v4502_v46 = vpop.f32.mrb[9].mxu1 }
 0x567   :  { %v4504_v23 = vpop.f32.mrb[10].mxu1 }
 0x568   :  { %v4506_v62 = vpop.f32.mrb[11].mxu1  ;;  %v4508_v39 = vpop.f32.mrb[8].mxu0 }
 0x569   :  { %v4510_v63 = vpop.f32.mrb[9].mxu0 }
 0x56a   :  { %v4512_v24 = vpop.f32.mrb[10].mxu0 }
 0x56b   :  { %v4514_v7 = vpop.f32.mrb[11].mxu0 }
 0x56d   :  { %v4516_v0 = vpop.f32.mrb[12].mxu1 }
 0x56e   :  { %v4518_v16 = vpop.f32.mrb[13].mxu1 }
 0x56f   :  { %v4521_v3 = vpop.f32.mrb[14].mxu1 }
 0x570   :  { %v4523_v41 = vpop.f32.mrb[15].mxu1  ;;  %v4525_v21 = vpop.f32.mrb[12].mxu0 }
 0x571   :  { %v4527_v8 = vpop.f32.mrb[13].mxu0 }
 0x572   :  { %v4530_v9 = vpop.f32.mrb[14].mxu0 }
 0x573   :  { %5633 = vst [vmem:[#allocation2_spill] sm:$0xff] %v4530_v9  ;;  %v4532_v37 = vpop.f32.mrb[15].mxu0 }
 0x574   :  { %5634 = vst [vmem:[#allocation3_spill] sm:$0xff] %v4532_v37 }
 0x575   :  { %v4535_v19 = vpop.f32.mrb[16].mxu1 }
 0x576   :  { %v4537_v6 = vpop.f32.mrb[17].mxu1 }
 0x578   :  { %v4551_v4 = vpop.f32.mrb[16].mxu0 }
 0x579   :  { %v4558_v9 = vpop.f32.mrb[17].mxu0 }
 0x58a   :  { %v910_v55 = vpop.xlane.xlu0 %909 }
 0x58b   :  { %v911_v15 = vcvt.f32.s32 %v910_v55  ;;  %v4542_v55 = vpop.f32.mrb[18].mxu1 }
 0x58c   :  { %v4549_v37 = vpop.f32.mrb[19].mxu1 }
 0x58d   :  { %v914_v25 = vadd.s32 %v913_v49, %v911_v15  ;;  %v928_v49 = vshll.u32 %v927_v12, 16  ;;  %v773_v12 = vsel %vm757_vm8, %v3702_v5, 0.0 }
 0x58e   :  { %v940_v50 = vpop.xlane.xlu0 %939 }
 0x58f   :  { %vm1140_vm5 = vcmp.eq.s32.totalorder %v3774_v36, %v914_v25  ;;  %v925_v14 = vpop.xlane.xlu1 %924  ;;  %v941_v29 = vcvt.f32.s32 %v940_v50  ;;  %v3228_v50 = vld [vmem:[%s5547_s5 + $0x88] sm:$0xff]  }
 0x590   :  { %v1156_v27 = vsel %vm1140_vm5, %v3694_v56, 0.0  ;;  %v926_v15 = vcvt.f32.s32 %v925_v14  ;;  %v4564_v14 = vpop.f32.mrb[18].mxu0 }
 0x591   :  { %v4553_v40 = vadd.f32 %v1156_v27, %v772_v35  ;;  %v944_v25 = vadd.s32 %v943_v48, %v941_v29  ;;  %5636 = vst [vmem:[#allocation19_spill] sm:$0xff] %v4564_v14  ;;  %v958_v48 = vshll.u32 %v957_v59, 16  ;;  %v973_v29 = vshll.u32 %v972_v54, 16  ;;  %v4575_v45 = vpop.f32.mrb[19].mxu0 }
 0x592   :  { %v929_v56 = vadd.s32 %v928_v49, %v926_v15  ;;  %5637 = vst [vmem:[#allocation20_spill] sm:$0xff] %v4575_v45  ;;  %v987_v49 = vcvt.f32.s32 %v4438_v30  ;;  %v5638_v54 = vmov 0.0   ;;  %v1002_v15 = vcvt.f32.s32 %v4443_v38  ;;  %v4586_v45 = vpop.f32.mrb[20].mxu1 }
 0x593   :  { %5635 = vst [vmem:[#allocation4_spill] sm:$0xff] %v4553_v40  ;;  %vm1142_vm6 = vcmp.eq.s32.totalorder %v3774_v36, %v944_v25  ;;  %v955_v35 = vpop.xlane.xlu1 %954  ;;  %2849 = vmatmul.mubr.msk.f32.vlgmr.msra.gmra.mrb[24].mxu0 %vm257_vm1, %v4553_v40  ;;  %3122 = vmatprep.mubr.msk.f32.mxu1 %vm257_vm1, %v4553_v40  ;;  %v1017_v38 = vcvt.f32.s32 %v4448_v47 }
 0x594   :  { %vm1141_vm7 = vcmp.eq.s32.totalorder %v3774_v36, %v929_v56  ;;  %v1158_v52 = vsel %vm1142_vm6, %v3699_v2, 0.0  ;;  %v956_v27 = vcvt.f32.s32 %v955_v35  ;;  %v970_v59 = vpop.xlane.xlu0 %969  ;;  %1858 = vmatprep.mubr.f32.mxu0 %v5638_v54  ;;  %3147 = vmatpush3.bf16.msra.mxu0 %v4494_v26  ;;  %v4590_v2 = vpop.f32.mrb[21].mxu1  ;;  %v3232_v35 = vld [vmem:[%s5547_s5] sm:$0xff]   ;;  %v1003_v47 = vshll.u32 %v1002_v15, 16 }
 0x595   :  { %v1157_v25 = vsel %vm1141_vm7, %v3702_v5, 0.0  ;;  %v4584_v14 = vadd.f32 %v1158_v52, %v774_v28  ;;  %v971_v40 = vcvt.f32.s32 %v970_v59  ;;  %3148 = vmatprep.subr.bf16.mxu0 %v3228_v50  ;;  %v775_v5 = vsel %vm759_vm9, %v3709_v51, 0.0  ;;  %v4600_v52 = vpop.f32.mrb[22].mxu1 }
 0x596   :  { %v4588_v30 = vadd.f32 %v1157_v25, %v773_v12  ;;  %v959_v56 = vadd.s32 %v958_v48, %v956_v27  ;;  %v3229_v12 = vld [vmem:[%s5547_s5 + $0x90] sm:$0xff]   ;;  %v988_v48 = vshll.u32 %v987_v49, 16  ;;  %v1032_v27 = vcvt.f32.s32 %v4453_v13  ;;  %v4611_v44 = vpop.f32.mrb[23].mxu1  ;;  %v4618_v13 = vpop.f32.mrb[20].mxu0 }
 0x597   :  { %5639 = vst [vmem:[#allocation21_spill] sm:$0xff] %v4584_v14  ;;  %v974_v26 = vadd.s32 %v973_v29, %v971_v40  ;;  %v985_v28 = vpop.xlane.xlu1 %984  ;;  %v776_v49 = vsel %vm760_vm10, %v3712_v18, 0.0  ;;  %v1018_v58 = vshll.u32 %v1017_v38, 16  ;;  %v4660_v60 = vpop.f32.mrb[24].mxu1 }
 0x598   :  { %5640 = vst [vmem:[#allocation22_spill] sm:$0xff] %v4588_v30  ;;  %vm1143_vm8 = vcmp.eq.s32.totalorder %v3774_v36, %v959_v56  ;;  %v986_v59 = vcvt.f32.s32 %v985_v28  ;;  %v1000_v25 = vpop.xlane.xlu0 %999  ;;  %2850 = vmatmul.mubr.msk.f32.gmra.mrb[26].mxu0 %vm257_vm1, %v4588_v30  ;;  %3123 = vmatmul.mubr.msk.f32.vlgmr.msra.gmra.mrb[40].mxu1 %vm257_vm1, %v4588_v30  ;;  %v3233_v28 = vld [vmem:[%s5547_s5 + $0x48] sm:$0xff]  }
 0x599   :  { %v1159_v40 = vsel %vm1143_vm8, %v3709_v51, 0.0  ;;  %vm1144_vm9 = vcmp.eq.s32.totalorder %v3774_v36, %v974_v26  ;;  %v1001_v29 = vcvt.f32.s32 %v1000_v25  ;;  %3125 = vmatprep.mubr.msk.f32.mxu1 %vm257_vm1, %v4584_v14  ;;  %1864 = vmatprep.mubr.f32.mxu0 %v5638_v54  ;;  %v4627_v26 = vpop.f32.mrb[21].mxu0  ;;  %v777_v25 = vsel %vm761_vm11, %v3719_v22, 0.0 }
 0x59a   :  { %v4624_v56 = vadd.f32 %v1159_v40, %v775_v5  ;;  %v1160_v15 = vsel %vm1144_vm9, %v3712_v18, 0.0  ;;  %v989_v51 = vadd.s32 %v988_v48, %v986_v59  ;;  %3149 = vmatpush3.bf16.msra.mxu0 %v3228_v50  ;;  %2972 = vmatpush3.bf16.msra.mxu1 %v3232_v35  ;;  %v3230_v18 = vld [vmem:[%s5547_s5 + $0x98] sm:$0xff]   ;;  %v4641_v50 = vpop.f32.mrb[22].mxu0  ;;  %v3235_v35 = vld [vmem:[%s5547_s5 + $0x8] sm:$0xff]   ;;  %v1033_v48 = vshll.u32 %v1032_v27, 16 }
 0x59b   :  { %v4636_v30 = vadd.f32 %v1160_v15, %v776_v49  ;;  %v1004_v5 = vadd.s32 %v1003_v47, %v1001_v29  ;;  %v1015_v40 = vpop.xlane.xlu1 %1014  ;;  %3150 = vmatprep.subr.bf16.mxu0 %v3229_v12  ;;  %v4652_v47 = vpop.f32.mrb[23].mxu0  ;;  %v1062_v29 = vcvt.f32.s32 %v4463_v43  ;;  %v778_v15 = vsel %vm762_vm12, %v3722_v1, 0.0  ;;  %2973 = vmatprep.subr.bf16.mxu1 %v3233_v28  ;;  %v3237_v28 = vld [vmem:[%s5547_s5 + $0x10] sm:$0xff]  }
 0x59c   :  { %5641 = vst [vmem:[#allocation23_spill] sm:$0xff] %v4624_v56  ;;  %vm1145_vm10 = vcmp.eq.s32.totalorder %v3774_v36, %v989_v51  ;;  %v1016_v38 = vcvt.f32.s32 %v1015_v40  ;;  %v1030_v59 = vpop.xlane.xlu0 %1029  ;;  %2851 = vmatmul.mubr.msk.f32.gmra.mrb[28].mxu0 %vm257_vm1, %v4584_v14  ;;  %3126 = vmatmul.mubr.msk.f32.gmra.mrb[42].mxu1 %vm257_vm1, %v4624_v56  ;;  %v4669_v40 = vpop.f32.mrb[25].mxu1 }
 0x59d   :  { %5642 = vst [vmem:[#allocation24_spill] sm:$0xff] %v4636_v30  ;;  %v1161_v49 = vsel %vm1145_vm10, %v3719_v22, 0.0  ;;  %vm1146_vm11 = vcmp.eq.s32.totalorder %v3774_v36, %v1004_v5  ;;  %v1031_v27 = vcvt.f32.s32 %v1030_v59  ;;  %3128 = vmatprep.mubr.msk.f32.mxu1 %vm257_vm1, %v4636_v30  ;;  %1870 = vmatprep.mubr.f32.mxu0 %v5638_v54  ;;  %v3236_v5 = vld [vmem:[%s5547_s5 + $0x50] sm:$0xff]   ;;  %v779_v59 = vsel %vm763_vm13, %v3729_v11, 0.0 }
 0x59e   :  { %v4666_v51 = vadd.f32 %v1161_v49, %v777_v25  ;;  %v1162_v43 = vsel %vm1146_vm11, %v3722_v1, 0.0  ;;  %v1019_v22 = vadd.s32 %v1018_v58, %v1016_v38  ;;  %3151 = vmatpush3.bf16.msra.mxu0 %v3229_v12  ;;  %v4681_v58 = vpop.f32.mrb[26].mxu1  ;;  %v3234_v12 = vld [vmem:[%s5547_s5 + $0xa0] sm:$0xff]   ;;  %2974 = vmatpush3.bf16.msra.mxu1 %v3235_v35  ;;  %v1092_v38 = vcvt.f32.s32 %v4473_v57 }
 0x59f   :  { %v4679_v25 = vadd.f32 %v1162_v43, %v778_v15  ;;  %v1034_v49 = vadd.s32 %v1033_v48, %v1031_v27  ;;  %v1045_v1 = vpop.xlane.xlu1 %1044  ;;  %3152 = vmatprep.subr.bf16.mxu0 %v3230_v18  ;;  %v4695_v27 = vpop.f32.mrb[27].mxu1  ;;  %v1063_v35 = vshll.u32 %v1062_v29, 16  ;;  %v780_v57 = vsel %vm764_vm14, %v3732_v17, 0.0  ;;  %2975 = vmatprep.subr.bf16.mxu1 %v3236_v5 }
 0x5a0   :  { %5643 = vst [vmem:[#allocation25_spill] sm:$0xff] %v4666_v51  ;;  %vm1147_vm12 = vcmp.eq.s32.totalorder %v3774_v36, %v1019_v22  ;;  %v1046_v10 = vcvt.f32.s32 %v1045_v1  ;;  %v1060_v48 = vpop.xlane.xlu0 %1059  ;;  %2852 = vmatmul.mubr.msk.f32.gmra.mrb[30].mxu0 %vm257_vm1, %v4624_v56  ;;  %3129 = vmatmul.mubr.msk.f32.gmra.mrb[44].mxu1 %vm257_vm1, %v4666_v51  ;;  %v1078_v56 = vshll.u32 %v1077_v31, 16  ;;  %v1093_v5 = vshll.u32 %v1092_v38, 16  ;;  %v5649_v38 = vld [vmem:[#allocation6_spill] sm:$0xff] }
 0x5a1   :  { %5644 = vst [vmem:[#allocation26_spill] sm:$0xff] %v4679_v25  ;;  %v1163_v15 = vsel %vm1147_vm12, %v3729_v11, 0.0  ;;  %vm1148_vm13 = vcmp.eq.s32.totalorder %v3774_v36, %v1034_v49  ;;  %v1061_v20 = vcvt.f32.s32 %v1060_v48  ;;  %3131 = vmatprep.mubr.msk.f32.mxu1 %vm257_vm1, %v4679_v25  ;;  %1876 = vmatprep.mubr.f32.mxu0 %v5638_v54  ;;  %v3238_v11 = vld [vmem:[%s5547_s5 + $0x58] sm:$0xff]   ;;  %v3241_v1 = vld [vmem:[%s5547_s5 + $0x60] sm:$0xff]   ;;  %vm5677_vm11 = vcmask 1043456  }
 0x5a2   :  { %v4706_v43 = vadd.f32 %v1163_v15, %v779_v59  ;;  %v1164_v22 = vsel %vm1148_vm13, %v3732_v17, 0.0  ;;  %v1049_v29 = vadd.s32 %v1048_v53, %v1046_v10  ;;  %3153 = vmatpush3.bf16.msra.mxu0 %v3230_v18  ;;  %v5646_v49 = vld [vmem:[#allocation5_spill] sm:$0xff]  ;;  %2976 = vmatpush3.bf16.msra.mxu1 %v3237_v28  ;;  %v3239_v17 = vld [vmem:[%s5547_s5 + $0xa8] sm:$0xff]   ;;  %v1107_v53 = vcvt.f32.s32 %v4479_v42  ;;  %v4736_v42 = vpop.f32.mrb[28].mxu1  ;;  %vm5733_vm12 = vmmov %vm5677_vm11 }
 0x5a3   :  { %v781_v48 = vsel %vm765_vm15, %v5646_v49, 0.0  ;;  %v4716_v14 = vadd.f32 %v1164_v22, %v780_v57  ;;  %v1064_v34 = vadd.s32 %v1063_v35, %v1061_v20  ;;  %v1075_v59 = vpop.xlane.xlu1 %1074  ;;  %3154 = vmatprep.subr.bf16.mxu0 %v3234_v12  ;;  %v3240_v18 = vld [vmem:[%s5547_s5 + $0x18] sm:$0xff]   ;;  %v1122_v28 = vcvt.f32.s32 %v4483_v33  ;;  %2977 = vmatprep.subr.bf16.mxu1 %v3238_v11 }
 0x5a4   :  { %5645 = vst [vmem:[#allocation27_spill] sm:$0xff] %v4706_v43  ;;  %vm1149_vm14 = vcmp.eq.s32.totalorder %v3774_v36, %v1049_v29  ;;  %v1076_v31 = vcvt.f32.s32 %v1075_v59  ;;  %v1090_v10 = vpop.xlane.xlu0 %1089  ;;  %2853 = vmatmul.mubr.msk.f32.gmra.mrb[32].mxu0 %vm257_vm1, %v4636_v30  ;;  %3132 = vmatmul.mubr.msk.f32.gmra.mrb[46].mxu1 %vm257_vm1, %v4706_v43  ;;  %v782_v57 = vsel %vm766_vm2, %v5649_v38, 0.0  ;;  %v5653_v59 = vld [vmem:[#allocation14_spill] sm:$0xff]  ;;  %v1137_v11 = vcvt.f32.s32 %v4487_v61  ;;  %v5656_v61 = vld [vmem:[#allocation8_spill] sm:$0xff] }
 0x5a5   :  { %5648 = vst [vmem:[#allocation5_spill] sm:$0xff] %v4716_v14  ;;  %v1165_v35 = vsel %vm1149_vm14, %v5646_v49, 0.0  ;;  %vm1150_vm15 = vcmp.eq.s32.totalorder %v3774_v36, %v1064_v34  ;;  %v1091_v15 = vcvt.f32.s32 %v1090_v10  ;;  %3134 = vmatprep.mubr.msk.f32.mxu1 %vm257_vm1, %v4716_v14  ;;  %1882 = vmatprep.mubr.f32.mxu0 %v5638_v54  ;;  %v4745_v49 = vpop.f32.mrb[29].mxu1  ;;  %v5652_v34 = vld [vmem:[#allocation7_spill] sm:$0xff]  ;;  %vm5654_vm0 = vcmp.eq.s32.totalorder %v3774_v36, %v5653_v59 }
 0x5a6   :  { %v4742_v22 = vadd.f32 %v1165_v35, %v781_v48  ;;  %v1166_v33 = vsel %vm1150_vm15, %v5649_v38, 0.0  ;;  %v1079_v29 = vadd.s32 %v1078_v56, %v1076_v31  ;;  %3155 = vmatpush3.bf16.msra.mxu0 %v3234_v12  ;;  %v783_v10 = vsel %vm5654_vm0, %v5652_v34, 0.0  ;;  %v4756_v30 = vpop.f32.mrb[30].mxu1  ;;  %2978 = vmatpush3.bf16.msra.mxu1 %v3240_v18  ;;  %v3242_v56 = vld [vmem:[%s5547_s5 + $0x20] sm:$0xff]  }
 0x5a7   :  { %v4754_v20 = vadd.f32 %v1166_v33, %v782_v57  ;;  %v1094_v48 = vadd.s32 %v1093_v5, %v1091_v15  ;;  %v1105_v35 = vpop.xlane.xlu1 %1104  ;;  %3156 = vmatprep.subr.bf16.mxu0 %v3239_v17  ;;  %v1108_v12 = vshll.u32 %v1107_v53, 16  ;;  %v4767_v5 = vpop.f32.mrb[31].mxu1  ;;  %v1123_v18 = vshll.u32 %v1122_v28, 16  ;;  %v5657_v57 = vld [vmem:[#allocation15_spill] sm:$0xff]  ;;  %2979 = vmatprep.subr.bf16.mxu1 %v3241_v1 }
 0x5a8   :  { %5651 = vst [vmem:[#allocation12_spill] sm:$0xff] %v4742_v22  ;;  %vm1151_vm2 = vcmp.eq.s32.totalorder %v3774_v36, %v1079_v29  ;;  %v1106_v31 = vcvt.f32.s32 %v1105_v35  ;;  %v1120_v38 = vpop.xlane.xlu0 %1119  ;;  %2854 = vmatmul.mubr.msk.f32.gmra.mrb[34].mxu0 %vm257_vm1, %v4666_v51  ;;  %3135 = vmatmul.mubr.msk.f32.gmra.mrb[48].mxu1 %vm257_vm1, %v4742_v22  ;;  %vm5658_vm3 = vcmp.eq.s32.totalorder %v3774_v36, %v5657_v57 }
 0x5a9   :  { %5655 = vst [vmem:[#allocation6_spill] sm:$0xff] %v4754_v20  ;;  %v1167_v15 = vsel %vm1151_vm2, %v5652_v34, 0.0  ;;  %vm1152_vm4 = vcmp.eq.s32.totalorder %v3774_v36, %v1094_v48  ;;  %v1121_v53 = vcvt.f32.s32 %v1120_v38  ;;  %3137 = vmatprep.mubr.msk.f32.mxu1 %vm257_vm1, %v4754_v20  ;;  %1888 = vmatprep.mubr.f32.mxu0 %v5638_v54  ;;  %v784_v33 = vsel %vm5658_vm3, %v5656_v61, 0.0 }
 0x5aa   :  { %v4778_v29 = vadd.f32 %v1167_v15, %v783_v10  ;;  %v1168_v59 = vsel %vm1152_vm4, %v5656_v61, 0.0  ;;  %v1109_v28 = vadd.s32 %v1108_v12, %v1106_v31  ;;  %3157 = vmatpush3.bf16.msra.mxu0 %v3239_v17  ;;  %2980 = vmatpush3.bf16.msra.mxu1 %v3242_v56  ;;  %v1138_v38 = vshll.u32 %v1137_v11, 16  ;;  %v5661_v10 = vld [vmem:[#allocation9_spill] sm:$0xff]  ;;  %v5662_v12 = vld [vmem:[#allocation16_spill] sm:$0xff]  ;;  %v4797_v56 = vpop.f32.mrb[32].mxu1  ;;  %v5664_v11 = vld [vmem:[#allocation10_spill] sm:$0xff] }
 0x5ab   :  { %v4781_v34 = vadd.f32 %v1168_v59, %v784_v33  ;;  %v1124_v48 = vadd.s32 %v1123_v18, %v1121_v53  ;;  %v1135_v35 = vpop.xlane.xlu1 %1134  ;;  %vm5663_vm6 = vcmp.eq.s32.totalorder %v3774_v36, %v5662_v12  ;;  %v5665_v31 = vld [vmem:[#allocation17_spill] sm:$0xff]  ;;  %v4806_v57 = vpop.f32.mrb[33].mxu1 }
 0x5ac   :  { %5659 = vst [vmem:[#allocation13_spill] sm:$0xff] %v4778_v29  ;;  %vm1153_vm5 = vcmp.eq.s32.totalorder %v3774_v36, %v1109_v28  ;;  %v1136_v51 = vcvt.f32.s32 %v1135_v35  ;;  %2855 = vmatmul.mubr.msk.f32.gmra.mrb[36].mxu0 %vm257_vm1, %v4679_v25  ;;  %3138 = vmatmul.mubr.msk.f32.gmra.mrb[50].mxu1 %vm257_vm1, %v4778_v29  ;;  %v785_v17 = vsel %vm5663_vm6, %v5661_v10, 0.0  ;;  %vm5666_vm8 = vcmp.eq.s32.totalorder %v3774_v36, %v5665_v31  ;;  %v4810_v59 = vpop.f32.mrb[34].mxu1  ;;  %v5670_v35 = vld [vmem:[#allocation18_spill] sm:$0xff]  ;;  %v3245_v31 = vld [vmem:[%s5547_s5 + $0x28] sm:$0xff]  }
 0x5ad   :  { %5660 = vst [vmem:[#allocation7_spill] sm:$0xff] %v4781_v34  ;;  %v1169_v1 = vsel %vm1153_vm5, %v5661_v10, 0.0  ;;  %vm1154_vm7 = vcmp.eq.s32.totalorder %v3774_v36, %v1124_v48  ;;  %3140 = vmatprep.mubr.msk.f32.mxu1 %vm257_vm1, %v4781_v34  ;;  %1894 = vmatprep.mubr.f32.mxu0 %v5638_v54  ;;  %v786_v18 = vsel %vm5666_vm8, %v5664_v11, 0.0  ;;  %v4817_v28 = vpop.f32.mrb[35].mxu1  ;;  %v5669_v48 = vld [vmem:[#allocation11_spill] sm:$0xff]  ;;  %vm5671_vm10 = vcmp.eq.s32.totalorder %v3774_v36, %v5670_v35  ;;  %v3249_v35 = vld [vmem:[%s5547_s5 + $0xb8] sm:$0xff]  }
 0x5ae   :  { %v4803_v15 = vadd.f32 %v1169_v1, %v785_v17  ;;  %v1170_v53 = vsel %vm1154_vm7, %v5664_v11, 0.0  ;;  %v1139_v61 = vadd.s32 %v1138_v38, %v1136_v51  ;;  %v787_v51 = vsel %vm5671_vm10, %v5669_v48, 0.0  ;;  %v4834_v12 = vpop.f32.mrb[36].mxu1  ;;  %v3243_v11 = vld [vmem:[%s5547_s5 + $0x68] sm:$0xff]  }
 0x5af   :  { %v4808_v33 = vadd.f32 %v1170_v53, %v786_v18  ;;  %2981 = vmatprep.subr.bf16.mxu1 %v3243_v11  ;;  %v3244_v18 = vld [vmem:[%s5547_s5 + $0xb0] sm:$0xff]  }
 0x5b0   :  { %5667 = vst [vmem:[#allocation14_spill] sm:$0xff] %v4803_v15  ;;  %vm1155_vm9 = vcmp.eq.s32.totalorder %v3774_v36, %v1139_v61  ;;  %2856 = vmatmul.mubr.msk.f32.gmra.mrb[38].mxu0 %vm257_vm1, %v4706_v43  ;;  %3141 = vmatmul.mubr.msk.f32.gmra.mrb[52].mxu1 %vm257_vm1, %v4803_v15  ;;  %v4836_v36 = vpop.f32.mrb[37].mxu1  ;;  %v3247_v53 = vld [vmem:[%s5547_s5 + $0x30] sm:$0xff]   ;;  %v3248_v61 = vld [vmem:[%s5547_s5 + $0x78] sm:$0xff]  }
 0x5b1   :  { %5668 = vst [vmem:[#allocation8_spill] sm:$0xff] %v4808_v33  ;;  %v1171_v38 = vsel %vm1155_vm9, %v5669_v48, 0.0  ;;  %3143 = vmatprep.mubr.msk.f32.mxu1 %vm257_vm1, %v4808_v33  ;;  %1900 = vmatprep.mubr.f32.mxu0 %v5638_v54  ;;  %5673 = vst [vmem:[#allocation9_spill] sm:$0xff] %v4836_v36  ;;  %v4838_v17 = vpop.f32.mrb[38].mxu1  ;;  %v3250_v48 = vld [vmem:[%s5547_s5 + $0x38] sm:$0xff]  }
 0x5b2   :  { %v4827_v10 = vadd.f32 %v1171_v38, %v787_v51  ;;  %5674 = vst [vmem:[#allocation16_spill] sm:$0xff] %v4838_v17  ;;  %v4842_v1 = vpop.f32.mrb[39].mxu1  ;;  %2982 = vmatpush3.bf16.msra.mxu1 %v3245_v31  ;;  %3158 = vmatprep.subr.bf16.mxu0 %v3244_v18  ;;  %v4889_v51 = vld [vmem:[%s5548_s7] sm:$0xf]  ;;  %v5678_v38 = vlaneseq }
 0x5b3   :  { %5675 = vst [vmem:[#allocation10_spill] sm:$0xff] %v4842_v1  ;;  %3159 = vmatpush3.bf16.msra.mxu0 %v3244_v18  ;;  %5676 = vst [vmem:[#allocation17_spill] sm:$0xff] %v4889_v51  ;;  %v1204_v18 = vld [vmem:[%s5549_s4] sm:$0x7] }
 0x5b4   :  { %5672 = vst [vmem:[#allocation15_spill] sm:$0xff] %v4827_v10  ;;  %2857 = vmatmul.mubr.msk.f32.gmra.mrb[40].mxu0 %vm257_vm1, %v4716_v14  ;;  %3144 = vmatmul.mubr.msk.f32.gmra.mrb[54].mxu1 %vm257_vm1, %v4827_v10  ;;  %v4894_v11 = vshrl.u32 %v5678_v38, 7 }
 0x5b5   :  { %1906 = vmatprep.mubr.f32.mxu0 %v5638_v54  ;;  %3160 = vmatprep.subr.bf16.mxu0 %v3249_v35 }
 0x5b6   :  { %v5594_v31 = vsub.s32 0, %v4894_v11 }
 0x5b7   :  { %3161 = vmatpush3.bf16.msra.mxu0 %v3249_v35 }
 0x5b8   :  { %2858 = vmatmul.mubr.msk.f32.gmra.mrb[42].mxu0 %vm257_vm1, %v4742_v22  ;;  %3178 = vmatprep.subr.msk.mxu0 %vm5677_vm11, %v4889_v51 }
 0x5b9   :  { %1912 = vmatprep.mubr.f32.mxu0 %v5638_v54 }
 0x5bc   :  { %2859 = vmatmul.mubr.msk.f32.gmra.mrb[44].mxu0 %vm257_vm1, %v4754_v20 }
 0x5bd   :  { %1918 = vmatprep.mubr.f32.mxu0 %v5638_v54 }
 0x5c0   :  { %2860 = vmatmul.mubr.msk.f32.gmra.mrb[46].mxu0 %vm257_vm1, %v4778_v29 }
 0x5c1   :  { %1924 = vmatprep.mubr.f32.mxu0 %v5638_v54 }
 0x5c4   :  { %2861 = vmatmul.mubr.msk.f32.gmra.mrb[48].mxu0 %vm257_vm1, %v4781_v34 }
 0x5c5   :  { %1930 = vmatprep.mubr.f32.mxu0 %v5638_v54 }
 0x5c8   :  { %2862 = vmatmul.mubr.msk.f32.gmra.mrb[50].mxu0 %vm257_vm1, %v4803_v15 }
 0x5c9   :  { %1936 = vmatprep.mubr.f32.mxu0 %v5638_v54 }
 0x5cc   :  { %2863 = vmatmul.mubr.msk.f32.gmra.mrb[52].mxu0 %vm257_vm1, %v4808_v33 }
 0x5cd   :  { %1942 = vmatprep.mubr.f32.mxu0 %v5638_v54  ;;  %v3246_v54 = vld [vmem:[%s5547_s5 + $0x70] sm:$0xff]  }
 0x5ce   :  { %2983 = vmatprep.subr.bf16.mxu1 %v3246_v54  ;;  %v5597_v54 = vsub.s32 1, %v4894_v11 }
 0x5cf   :  { %2984 = vmatpush3.bf16.msra.mxu1 %v3247_v53  ;;  %v4903_v53 = vrot.slane %v1204_v18, %v5594_v31 }
 0x5d0   :  { %2864 = vmatmul.mubr.msk.f32.gmra.mrb[54].mxu0 %vm257_vm1, %v4827_v10  ;;  %2985 = vmatprep.subr.bf16.mxu1 %v3248_v61  ;;  %v5600_v61 = vsub.s32 2, %v4894_v11 }
 0x5d1   :  { %v1312_v35 = vadd.f32 %v4500_v32, %v4903_v53  ;;  %v1316_v31 = vadd.f32 %v4504_v23, %v4903_v53  ;;  %v1326_v23 = vadd.f32 %v4521_v3, %v4903_v53  ;;  %v4936_v22 = vadd.f32 %v4535_v19, %v4903_v53 }
 0x5d2   :  { %v4914_v38 = vrot.slane %v1204_v18, %v5600_v61 }
 0x5d3   :  { %2986 = vmatpush3.bf16.msra.mxu1 %v3250_v48  ;;  %v4908_v48 = vrot.slane %v1204_v18, %v5597_v54  ;;  %v1535_v15 = vmul.f32 0.70710677, %v1312_v35  ;;  %v1538_v29 = vmul.f32 0.70710677, %v1316_v31  ;;  %v1322_v18 = vadd.f32 %v4516_v0, %v4903_v53 }
 0x5d4   :  { %v1433_v54 = vadd.f32 %v4508_v39, %v4914_v38  ;;  %v1425_v32 = vadd.f32 %v4510_v63, %v4914_v38  ;;  %v1436_v3 = vadd.f32 %v4512_v24, %v4914_v38 }
 0x5d5   :  { %v1314_v10 = vadd.f32 %v4502_v46, %v4908_v48  ;;  %v1318_v33 = vadd.f32 %v4506_v62, %v4908_v48  ;;  %v1324_v46 = vadd.f32 %v4518_v16, %v4908_v48  ;;  %3315 = verf.f32 %v1535_v15 }
 0x5d6   :  { %v1543_v62 = vmul.f32 0.70710677, %v1433_v54  ;;  %v1328_v39 = vadd.f32 %v4523_v41, %v4908_v48  ;;  %v1537_v20 = vmul.f32 0.70710677, %v1425_v32  ;;  %v1541_v63 = vmul.f32 0.70710677, %v1322_v18 }
 0x5d7   :  { %v1536_v34 = vmul.f32 0.70710677, %v1314_v10  ;;  %v1539_v61 = vmul.f32 0.70710677, %v1318_v33  ;;  %v1542_v0 = vmul.f32 0.70710677, %v1324_v46  ;;  %v4940_v16 = vadd.f32 %v4537_v6, %v4908_v48 }
 0x5d8   :  { %v1544_v15 = vmul.f32 0.70710677, %v1326_v23  ;;  %v1545_v41 = vmul.f32 0.70710677, %v1328_v39  ;;  %v4950_v19 = vmul.f32 0.5, %v1314_v10  ;;  %v4955_v6 = vadd.f32 %v4549_v37, %v4908_v48 }
 0x5d9   :  { %3317 = verf.f32 %v1536_v34  ;;  %v4944_v34 = vmul.f32 0.5, %v1312_v35  ;;  %v1548_v24 = vmul.f32 0.70710677, %v4940_v16  ;;  %v1428_v35 = vadd.f32 %v4514_v7, %v4914_v38 }
 0x5da   :  { %3319 = verf.f32 %v1538_v29  ;;  %v4948_v29 = vadd.f32 %v4542_v55, %v4903_v53  ;;  %v4962_v55 = vmul.f32 0.5, %v1318_v33  ;;  %v1546_v10 = vmul.f32 0.70710677, %v1436_v3 }
 0x5db   :  { %3321 = verf.f32 %v1539_v61  ;;  %v1547_v61 = vmul.f32 0.70710677, %v4936_v22  ;;  %v1551_v7 = vmul.f32 0.70710677, %v4955_v6  ;;  %v4976_v33 = vmul.f32 0.5, %v1425_v32 }
 0x5dc   :  { %3323 = verf.f32 %v1543_v62  ;;  %v4957_v62 = vmul.f32 0.5, %v1316_v31  ;;  %v1550_v37 = vmul.f32 0.70710677, %v4948_v29  ;;  %v4971_v31 = vadd.f32 %v4590_v2, %v4908_v48 }
 0x5dd   :  { %3325 = verf.f32 %v1537_v20  ;;  %v4966_v20 = vadd.f32 %v4586_v45, %v4903_v53  ;;  %v4980_v14 = vmul.f32 0.5, %v1322_v18  ;;  %v1540_v2 = vmul.f32 0.70710677, %v1428_v35 }
 0x5de   :  { %3327 = verf.f32 %v1541_v63  ;;  %v4973_v63 = vmul.f32 0.5, %v1433_v54  ;;  %v4986_v54 = vmul.f32 0.5, %v1324_v46  ;;  %v4989_v25 = vmul.f32 0.5, %v1428_v35 }
 0x5df   :  { %3329 = verf.f32 %v1542_v0  ;;  %v3316_v0 = vpop.eup %3315  ;;  %v1554_v18 = vmul.f32 0.70710677, %v4971_v31  ;;  %v4998_v1 = vmul.f32 0.5, %v1328_v39  ;;  %v1449_v46 = vadd.f32 %v4525_v21, %v4914_v38 }
 0x5e0   :  { %3331 = verf.f32 %v1544_v15  ;;  %5679 = vst [vmem:[#allocation11_spill] sm:$0xff] %v4973_v63  ;;  %v4978_v15 = vmul.f32 0.5, %v1436_v3  ;;  %5681 = vst [vmem:[#allocation28_spill] sm:$0xff] %v4986_v54  ;;  %v4991_v3 = vmul.f32 0.5, %v1326_v23  ;;  %v5004_v35 = vadd.f32 %v4527_v8, %v4914_v38  ;;  %v5685_v8 = vld [vmem:[#allocation3_spill] sm:$0xff] }
 0x5e1   :  { %3333 = verf.f32 %v1545_v41  ;;  %v4984_v41 = vadd.f32 %v4600_v52, %v4903_v53  ;;  %5683 = vst [vmem:[#allocation30_spill] sm:$0xff] %v4998_v1  ;;  %v5015_v17 = vadd.f32 1.0, %v3316_v0  ;;  %v5019_v21 = vadd.f32 %v4669_v40, %v4908_v48 }
 0x5e2   :  { %3335 = verf.f32 %v1547_v61  ;;  %5680 = vst [vmem:[#allocation18_spill] sm:$0xff] %v4978_v15  ;;  %v1553_v61 = vmul.f32 0.70710677, %v4966_v20  ;;  %5682 = vst [vmem:[#allocation29_spill] sm:$0xff] %v4991_v3  ;;  %v5023_v36 = vadd.f32 %v5685_v8, %v4914_v38  ;;  %v5037_v40 = vmul.f32 0.5, %v4936_v22 }
 0x5e3   :  { %v3318_v45 = vpop.eup %3317  ;;  %3337 = verf.f32 %v1548_v24  ;;  %v4996_v24 = vadd.f32 %v4611_v44, %v4908_v48  ;;  %v5684_v44 = vld [vmem:[#allocation2_spill] sm:$0xff]  ;;  %v5039_v8 = vmul.f32 0.5, %v1449_v46  ;;  %v1560_v22 = vmul.f32 0.70710677, %v5019_v21 }
 0x5e4   :  { %v3320_v43 = vpop.eup %3319  ;;  %3339 = verf.f32 %v1546_v10  ;;  %v1556_v10 = vmul.f32 0.70710677, %v4984_v41  ;;  %v5013_v39 = vadd.f32 %v5684_v44, %v4914_v38  ;;  %v5025_v51 = vadd.f32 1.0, %v3318_v45  ;;  %5686 = vst [vmem:[#allocation2_spill] sm:$0xff] %v5037_v40 }
 0x5e5   :  { %v3322_v32 = vpop.eup %3321  ;;  %3341 = verf.f32 %v1550_v37  ;;  %v5009_v37 = vadd.f32 %v4660_v60, %v4903_v53  ;;  %v1557_v60 = vmul.f32 0.70710677, %v4996_v24  ;;  %v5030_v44 = vadd.f32 %v4681_v58, %v4903_v53  ;;  %5687 = vst [vmem:[#allocation3_spill] sm:$0xff] %v5039_v8 }
 0x5e6   :  { %v3324_v52 = vpop.eup %3323  ;;  %3343 = verf.f32 %v1551_v7  ;;  %v5034_v1 = vadd.f32 1.0, %v3322_v32  ;;  %v5042_v45 = vmul.f32 0.5, %v4940_v16  ;;  %v1358_v58 = vadd.f32 %v4695_v27, %v4908_v48 }
 0x5e7   :  { %v3326_v23 = vpop.eup %3325  ;;  %3345 = verf.f32 %v1540_v2  ;;  %v5049_v32 = vadd.f32 1.0, %v3324_v52  ;;  %v5057_v16 = vmul.f32 0.5, %v4948_v29  ;;  %v5065_v52 = vmul.f32 0.5, %v4955_v6 }
 0x5e8   :  { %v3328_v7 = vpop.eup %3327  ;;  %3347 = verf.f32 %v1553_v61  ;;  %v5032_v61 = vadd.f32 1.0, %v3320_v43  ;;  %5688 = vst [vmem:[#allocation31_spill] sm:$0xff] %v5042_v45  ;;  %v5051_v54 = vadd.f32 1.0, %v3326_v23  ;;  %v1555_v23 = vmul.f32 0.70710677, %v1449_v46 }
 0x5e9   :  { %v3330_v2 = vpop.eup %3329  ;;  %3349 = verf.f32 %v1554_v18  ;;  %v1559_v18 = vmul.f32 0.70710677, %v5009_v37  ;;  %v5047_v43 = vadd.f32 1.0, %v3328_v7  ;;  %5689 = vst [vmem:[#allocation32_spill] sm:$0xff] %v5049_v32  ;;  %5690 = vst [vmem:[#allocation33_spill] sm:$0xff] %v5057_v16  ;;  %v5079_v46 = vmul.f32 0.5, %v4984_v41 }
 0x5ea   :  { %v3332_v0 = vpop.eup %3331  ;;  %3351 = verf.f32 %v1556_v10  ;;  %v5054_v40 = vadd.f32 1.0, %v3330_v2  ;;  %v1562_v10 = vmul.f32 0.70710677, %v5030_v44  ;;  %v5070_v2 = vmul.f32 0.5, %v4966_v20 }
 0x5eb   :  { %v3334_v3 = vpop.eup %3333  ;;  %3353 = verf.f32 %v1557_v60  ;;  %v5060_v27 = vadd.f32 1.0, %v3332_v0  ;;  %v1563_v29 = vmul.f32 0.70710677, %v1358_v58  ;;  %v5075_v0 = vmul.f32 0.5, %v4971_v31  ;;  %5693 = vst [vmem:[#allocation36_spill] sm:$0xff] %v5079_v46 }
 0x5ec   :  { %v3336_v63 = vpop.eup %3335  ;;  %v5062_v7 = vadd.f32 1.0, %v3334_v3  ;;  %5691 = vst [vmem:[#allocation34_spill] sm:$0xff] %v5070_v2  ;;  %3355 = verf.f32 %v1559_v18  ;;  %v1549_v3 = vmul.f32 0.70710677, %v5004_v35  ;;  %v1362_v20 = vadd.f32 %v4736_v42, %v4903_v53 }
 0x5ed   :  { %v3338_v8 = vpop.eup %3337  ;;  %v5067_v15 = vadd.f32 1.0, %v3336_v63  ;;  %5692 = vst [vmem:[#allocation35_spill] sm:$0xff] %v5075_v0  ;;  %3357 = verf.f32 %v1560_v22  ;;  %v1558_v63 = vmul.f32 0.70710677, %v5013_v39  ;;  %v1552_v31 = vmul.f32 0.70710677, %v5023_v36 }
 0x5ee   :  { %v3340_v45 = vpop.eup %3339  ;;  %v5072_v16 = vadd.f32 1.0, %v3338_v8  ;;  %3359 = verf.f32 %v1562_v10  ;;  %v1364_v8 = vadd.f32 %v4745_v49, %v4908_v48  ;;  %v5092_v41 = vmul.f32 0.5, %v4996_v24 }
 0x5ef   :  { %v3342_v32 = vpop.eup %3341  ;;  %3361 = verf.f32 %v1555_v23  ;;  %v1465_v10 = vadd.f32 %v4551_v4, %v4914_v38  ;;  %v5096_v42 = vadd.f32 1.0, %v3340_v45  ;;  %v5102_v23 = vadd.f32 %v4756_v30, %v4903_v53 }
 0x5f0   :  { %v3344_v60 = vpop.eup %3343  ;;  %v5084_v2 = vadd.f32 1.0, %v3342_v32  ;;  %5694 = vst [vmem:[#allocation37_spill] sm:$0xff] %v5092_v41  ;;  %3363 = verf.f32 %v1563_v29  ;;  %v1565_v24 = vmul.f32 0.70710677, %v1362_v20  ;;  %v5109_v29 = vadd.f32 %v4767_v5, %v4908_v48 }
 0x5f1   :  { %v3346_v6 = vpop.eup %3345  ;;  %v5089_v0 = vadd.f32 1.0, %v3344_v60  ;;  %3365 = verf.f32 %v1549_v3  ;;  %5695 = vst [vmem:[#allocation38_spill] sm:$0xff] %v5102_v23  ;;  %v5105_v60 = vmul.f32 0.5, %v5009_v37  ;;  %v1566_v3 = vmul.f32 0.70710677, %v1364_v8 }
 0x5f2   :  { %v3348_v18 = vpop.eup %3347  ;;  %v5098_v32 = vadd.f32 1.0, %v3346_v6  ;;  %3367 = verf.f32 %v1558_v63  ;;  %5697 = vst [vmem:[#allocation40_spill] sm:$0xff] %v5109_v29  ;;  %v5116_v30 = vmul.f32 0.5, %v5019_v21  ;;  %v5119_v41 = vmul.f32 0.5, %v5030_v44 }
 0x5f3   :  { %v3350_v22 = vpop.eup %3349  ;;  %5696 = vst [vmem:[#allocation39_spill] sm:$0xff] %v5105_v60  ;;  %v5111_v4 = vadd.f32 1.0, %v3348_v18  ;;  %3369 = verf.f32 %v1552_v31  ;;  %v5122_v37 = vmul.f32 0.5, %v5004_v35  ;;  %v1567_v63 = vmul.f32 0.70710677, %v1465_v10  ;;  %v5702_v35 = vld [vmem:[#allocation19_spill] sm:$0xff] }
 0x5f4   :  { %v3352_v49 = vpop.eup %3351  ;;  %v5113_v45 = vadd.f32 1.0, %v3350_v22  ;;  %5698 = vst [vmem:[#allocation41_spill] sm:$0xff] %v5116_v30  ;;  %5699 = vst [vmem:[#allocation42_spill] sm:$0xff] %v5119_v41  ;;  %v5126_v5 = vmul.f32 0.5, %v1358_v58  ;;  %v1568_v18 = vmul.f32 0.70710677, %v5102_v23  ;;  %v1457_v31 = vadd.f32 %v4558_v9, %v4914_v38 }
 0x5f5   :  { %v3354_v6 = vpop.eup %3353  ;;  %v5124_v60 = vadd.f32 1.0, %v3352_v49  ;;  %v5132_v21 = vmul.f32 0.5, %v5013_v39  ;;  %3371 = verf.f32 %v1565_v24  ;;  %v1569_v44 = vmul.f32 0.70710677, %v5109_v29  ;;  %v5704_v23 = vld [vmem:[#allocation20_spill] sm:$0xff] }
 0x5f6   :  { %5701 = vst [vmem:[#allocation44_spill] sm:$0xff] %v5126_v5  ;;  %v3356_v22 = vpop.eup %3355  ;;  %v1468_v41 = vadd.f32 %v5702_v35, %v4914_v38  ;;  %v5137_v49 = vadd.f32 1.0, %v3354_v6  ;;  %v5140_v58 = vmul.f32 0.5, %v5023_v36  ;;  %3373 = verf.f32 %v1566_v3 }
 0x5f7   :  { %5700 = vst [vmem:[#allocation43_spill] sm:$0xff] %v5124_v60  ;;  %v3358_v30 = vpop.eup %3357  ;;  %v1460_v9 = vadd.f32 %v5704_v23, %v4914_v38  ;;  %v5144_v60 = vmul.f32 0.5, %v1362_v20  ;;  %v5146_v39 = vmul.f32 0.5, %v1364_v8  ;;  %3375 = verf.f32 %v1567_v63 }
 0x5f8   :  { %5703 = vst [vmem:[#allocation19_spill] sm:$0xff] %v5137_v49  ;;  %v3360_v5 = vpop.eup %3359  ;;  %v5150_v24 = vadd.f32 %v4797_v56, %v4903_v53  ;;  %v5152_v6 = vadd.f32 1.0, %v3356_v22  ;;  %3377 = verf.f32 %v1568_v18  ;;  %v5154_v36 = vmul.f32 0.5, %v1465_v10  ;;  %v1727_v56 = vld [vmem:[%s5550_s8] sm:$0x7] }
 0x5f9   :  { %5705 = vst [vmem:[#allocation20_spill] sm:$0xff] %v5144_v60  ;;  %5706 = vst [vmem:[#allocation45_spill] sm:$0xff] %v5146_v39  ;;  %v3362_v35 = vpop.eup %3361  ;;  %v1561_v3 = vmul.f32 0.70710677, %v1457_v31  ;;  %3379 = verf.f32 %v1569_v44  ;;  %v1570_v23 = vmul.f32 0.70710677, %v1468_v41  ;;  %v5158_v20 = vadd.f32 %v4806_v57, %v4908_v48 }
 0x5fa   :  { %5707 = vst [vmem:[#allocation46_spill] sm:$0xff] %v5150_v24  ;;  %5708 = vst [vmem:[#allocation47_spill] sm:$0xff] %v5152_v6  ;;  %v3364_v29 = vpop.eup %3363  ;;  %v5162_v8 = vadd.f32 %v4810_v59, %v4903_v53  ;;  %v5167_v18 = vadd.f32 1.0, %v3358_v30  ;;  %v5169_v10 = vadd.f32 1.0, %v3360_v5  ;;  %v5171_v22 = vmul.f32 0.5, %v1457_v31 }
 0x5fb   :  { %5709 = vst [vmem:[#allocation48_spill] sm:$0xff] %v5158_v20  ;;  %v3366_v63 = vpop.eup %3365  ;;  %v1564_v44 = vmul.f32 0.70710677, %v1460_v9  ;;  %v5173_v60 = vmul.f32 0.5, %v1468_v41  ;;  %v5175_v57 = vmul.f32 0.5, %v1460_v9  ;;  %v1481_v6 = vadd.f32 %v4618_v13, %v4914_v38 }
 0x5fc   :  { %5710 = vst [vmem:[#allocation49_spill] sm:$0xff] %v5162_v8  ;;  %5711 = vst [vmem:[#allocation50_spill] sm:$0xff] %v5167_v18  ;;  %v3368_v39 = vpop.eup %3367  ;;  %v1571_v59 = vmul.f32 0.70710677, %v5150_v24  ;;  %v5180_v46 = vadd.f32 1.0, %v3362_v35  ;;  %3381 = verf.f32 %v1561_v3  ;;  %v1473_v30 = vadd.f32 %v4627_v26, %v4914_v38 }
 0x5fd   :  { %5712 = vst [vmem:[#allocation51_spill] sm:$0xff] %v5169_v10  ;;  %v3370_v49 = vpop.eup %3369  ;;  %v5713_v5 = vsub.s32 0, %v4894_v11  ;;  %v5188_v41 = vadd.f32 1.0, %v3364_v29  ;;  %3383 = verf.f32 %v1570_v23  ;;  %v1572_v9 = vmul.f32 0.70710677, %v5158_v20 }
 0x5fe   :  { %v5715_v24 = vsub.s32 1, %v4894_v11  ;;  %v5195_v13 = vadd.f32 1.0, %v3366_v63  ;;  %v5197_v35 = vadd.f32 1.0, %v3368_v39  ;;  %3385 = verf.f32 %v1564_v44 }
 0x5ff   :  { %v5186_v31 = vrot.slane %v1727_v56, %v5713_v5  ;;  %5714 = vst [vmem:[#allocation52_spill] sm:$0xff] %v5188_v41  ;;  %v5201_v26 = vadd.f32 %v4817_v28, %v4908_v48  ;;  %v3372_v3 = vpop.eup %3371  ;;  %v5203_v5 = vadd.f32 1.0, %v3370_v49  ;;  %3387 = verf.f32 %v1571_v59 }
 0x600   :  { %v5193_v10 = vrot.slane %v1727_v56, %v5715_v24  ;;  %v5206_v29 = vmul.f32 0.70710677, %v5162_v8  ;;  %v1579_v23 = vmul.f32 0.70710677, %v1481_v6  ;;  %v5208_v24 = vpop.eup %3373  ;;  %v1573_v63 = vmul.f32 0.70710677, %v1473_v30 }
 0x601   :  { %5716 = vst [vmem:[#allocation53_spill] sm:$0xff] %v5201_v26  ;;  %5718 = vst [vmem:[#allocation55_spill] sm:$0xff] %v5208_v24  ;;  %v5212_v39 = vadd.f32 %v4641_v50, %v4914_v38  ;;  %v1679_v28 = vmul.f32 %v5015_v17, %v4944_v34  ;;  %v3376_v41 = vpop.eup %3375  ;;  %3389 = verf.f32 %v1572_v9  ;;  %v1680_v59 = vmul.f32 %v5025_v51, %v4950_v19 }
 0x602   :  { %5717 = vst [vmem:[#allocation54_spill] sm:$0xff] %v5206_v29  ;;  %v5719_v24 = vsub.s32 2, %v4894_v11  ;;  %v5224_v18 = vpop.eup %3377  ;;  %v5226_v50 = vadd.f32 1.0, %v3372_v3  ;;  %v5229_v17 = vmul.f32 0.70710677, %v5201_v26  ;;  %v5231_v34 = vmul.f32 0.5, %v1481_v6 }
 0x603   :  { %5720 = vst [vmem:[#allocation56_spill] sm:$0xff] %v5224_v18  ;;  %v5235_v9 = vpop.eup %3379  ;;  %3391 = verf.f32 %v1579_v23  ;;  %v5237_v51 = vmul.f32 0.5, %v1473_v30  ;;  %v5241_v11 = vadd.f32 %v4652_v47, %v4914_v38  ;;  %v1582_v3 = vmul.f32 0.70710677, %v5212_v39 }
 0x604   :  { %v5222_v29 = vrot.slane %v1727_v56, %v5719_v24  ;;  %5721 = vst [vmem:[#allocation57_spill] sm:$0xff] %v5226_v50  ;;  %5722 = vst [vmem:[#allocation58_spill] sm:$0xff] %v5235_v9  ;;  %v5243_v56 = vadd.f32 1.0, %v3376_v41  ;;  %3393 = verf.f32 %v1573_v63  ;;  %v5248_v6 = vadd.f32 %v4834_v12, %v4903_v53 }
 0x605   :  { %v1682_v30 = vmul.f32 %v5032_v61, %v4957_v62  ;;  %v1684_v47 = vmul.f32 %v5098_v32, %v4989_v25 }
 0x606   :  { %v3382_v63 = vpop.eup %3381 }
 0x607   :  { %v5262_v61 = vpop.eup %3383 }
 0x666   :  { %v1854_v20 = vpop.f32.mrb[24].mxu0 }
 0x667   :  { %v2110_v44 = vadd.f32 %v5186_v31, %v1854_v20  ;;  %v1856_v49 = vpop.f32.mrb[25].mxu0 }
 0x668   :  { %v2111_v8 = vadd.f32 %v5193_v10, %v1856_v49  ;;  %v1681_v49 = vmul.f32 %v5051_v54, %v4976_v33  ;;  %v5724_v33 = vld [vmem:[#allocation28_spill] sm:$0xff] }
 0x669   :  { %v5233_v20 = vmul.f32 %v2110_v44, %v1679_v28  ;;  %v1683_v44 = vmul.f32 %v5034_v1, %v4962_v55  ;;  %v5723_v55 = vld [vmem:[#allocation18_spill] sm:$0xff]  ;;  %v1686_v54 = vmul.f32 %v5054_v40, %v5724_v33  ;;  %v5727_v33 = vld [vmem:[#allocation29_spill] sm:$0xff] }
 0x66a   :  { %v2159_v19 = vmul.f32 %v2111_v8, %v1680_v59  ;;  %v1576_v59 = vmul.f32 0.70710677, %v5241_v11 }
 0x66b   :  { %v1860_v24 = vpop.f32.mrb[26].mxu0  ;;  %v3124_v28 = vpop.f32.mrb[40].mxu1 }
 0x66c   :  { %v2113_v23 = vadd.f32 %v5186_v31, %v1860_v24  ;;  %v2115_v38 = vadd.f32 %v3124_v28, %v5222_v29  ;;  %v1862_v8 = vpop.f32.mrb[27].mxu0  ;;  %v2015_v41 = vpop.f32.mrb[41].mxu1  ;;  %v1685_v24 = vmul.f32 %v5047_v43, %v4980_v14  ;;  %v5725_v43 = vld [vmem:[#allocation11_spill] sm:$0xff]  ;;  %3395 = verf.f32 %v1576_v59  ;;  %v5728_v59 = vld [vmem:[#allocation30_spill] sm:$0xff] }
 0x66d   :  { %v2114_v12 = vadd.f32 %v5193_v10, %v1862_v8  ;;  %v2112_v62 = vadd.f32 %v5222_v29, %v2015_v41  ;;  %v3386_v28 = vpop.eup %3385  ;;  %v1690_v8 = vmul.f32 %v5096_v42, %v5723_v55  ;;  %v5282_v55 = vadd.f32 1.0, %v3382_v63 }
 0x66e   :  { %v2161_v25 = vmul.f32 %v2113_v23, %v1682_v30  ;;  %v2163_v32 = vmul.f32 %v2115_v38, %v1684_v47  ;;  %v5271_v41 = vpop.eup %3387  ;;  %v5726_v47 = vld [vmem:[#allocation32_spill] sm:$0xff]  ;;  %3397 = verf.f32 %v1582_v3  ;;  %v1689_v3 = vmul.f32 %v5062_v7, %v5728_v59 }
 0x66f   :  { %v2162_v26 = vmul.f32 %v2114_v12, %v1683_v44  ;;  %v2160_v9 = vmul.f32 %v2112_v62, %v1681_v49  ;;  %v1866_v1 = vpop.f32.mrb[28].mxu0  ;;  %v3127_v50 = vpop.f32.mrb[42].mxu1  ;;  %v1687_v38 = vmul.f32 %v5726_v47, %v5725_v43  ;;  %v1688_v43 = vmul.f32 %v5060_v27, %v5727_v33  ;;  %v5731_v33 = vld [vmem:[#allocation3_spill] sm:$0xff] }
 0x670   :  { %v2206_v18 = vpack.c.bf16 %v2161_v25, %v5233_v20  ;;  %v2116_v30 = vadd.f32 %v5186_v31, %v1866_v1  ;;  %v2121_v23 = vadd.f32 %v3127_v50, %v5222_v29  ;;  %v1868_v14 = vpop.f32.mrb[29].mxu0  ;;  %v2025_v44 = vpop.f32.mrb[43].mxu1 }
 0x671   :  { %v2117_v12 = vadd.f32 %v5193_v10, %v1868_v14  ;;  %v2118_v42 = vadd.f32 %v5222_v29, %v2025_v44  ;;  %v2207_v49 = vpack.c.bf16 %v2162_v26, %v2159_v19  ;;  %v2208_v62 = vpack.c.bf16 %v2163_v32, %v2160_v9  ;;  %v5280_v40 = vpop.eup %3389 }
 0x672   :  { %v5284_v20 = vmul.f32 %v2116_v30, %v1685_v24  ;;  %v2169_v25 = vmul.f32 %v2121_v23, %v1690_v8  ;;  %v5288_v26 = vpop.eup %3391  ;;  %v1696_v19 = vmul.f32 %v5203_v5, %v5140_v58  ;;  %v1693_v30 = vmul.f32 %v5195_v13, %v5122_v37  ;;  %v5729_v5 = vld [vmem:[#allocation2_spill] sm:$0xff] }
 0x673   :  { %v2165_v50 = vmul.f32 %v2117_v12, %v1686_v54  ;;  %v2166_v1 = vmul.f32 %v2118_v42, %v1687_v38  ;;  %v1872_v47 = vpop.f32.mrb[30].mxu0  ;;  %v3130_v14 = vpop.f32.mrb[44].mxu1  ;;  %2461 = vmatprep.mubr.bf16.mxu1 %v2207_v49  ;;  %3162 = vmatprep.mubr.bf16.mxu0 %v2208_v62  ;;  %v1660_v38 = vadd.f32 1.0, %v3386_v28  ;;  %v1691_v12 = vmul.f32 %v5067_v15, %v5729_v5 }
 0x674   :  { %v2119_v9 = vadd.f32 %v5186_v31, %v1872_v47  ;;  %v2127_v63 = vadd.f32 %v3130_v14, %v5222_v29  ;;  %v1874_v32 = vpop.f32.mrb[31].mxu0  ;;  %v2035_v24 = vpop.f32.mrb[45].mxu1  ;;  %2462 = vmatmul.mubr.bf16.vlgmr.msra.gmra.mrb[56].mxu1 %v2206_v18  ;;  %v1702_v18 = vmul.f32 %v5197_v35, %v5132_v21  ;;  %v5732_v47 = vld [vmem:[#allocation17_spill] sm:$0xff] }
 0x675   :  { %v3394_v27 = vpop.eup %3393  ;;  %v2211_v8 = vpack.c.bf16 %v2169_v25, %v2166_v1  ;;  %v2120_v54 = vadd.f32 %v5193_v10, %v1874_v32  ;;  %v2124_v23 = vadd.f32 %v5222_v29, %v2035_v24  ;;  %v5730_v25 = vld [vmem:[#allocation31_spill] sm:$0xff] }
 0x676   :  { %v2167_v44 = vmul.f32 %v2119_v9, %v1688_v43  ;;  %v2175_v58 = vmul.f32 %v2127_v63, %v1696_v19  ;;  %v1692_v1 = vmul.f32 %v5072_v16, %v5730_v25  ;;  %v1699_v43 = vmul.f32 %v5180_v46, %v5731_v33 }
 0x677   :  { %v2168_v42 = vmul.f32 %v2120_v54, %v1689_v3  ;;  %v2172_v7 = vmul.f32 %v2124_v23, %v1693_v30  ;;  %v1878_v49 = vpop.f32.mrb[32].mxu0  ;;  %v3133_v62 = vpop.f32.mrb[46].mxu1  ;;  %3163 = vmatmul.mubr.bf16.vlgmr.msra.gmra.mrb[56].mxu0 %v2211_v8  ;;  %v1666_v19 = vadd.f32 1.0, %v5262_v61  ;;  %v1528_v63 = vmul.f32 0.5, %v5241_v11  ;;  %v5734_v8 = vld [vmem:[#allocation33_spill] sm:$0xff] }
 0x678   :  { %v2122_v37 = vadd.f32 %v5186_v31, %v1878_v49  ;;  %v2133_v13 = vadd.f32 %v3133_v62, %v5222_v29  ;;  %v1880_v28 = vpop.f32.mrb[33].mxu0  ;;  %v2045_v15 = vpop.f32.mrb[47].mxu1  ;;  %3179 = vmatpush3.msk.msra.mxu0 %vm5733_vm12, %v5732_v47  ;;  %v2209_v14 = vpack.c.bf16 %v2167_v44, %v5284_v20  ;;  %v1669_v32 = vadd.f32 1.0, %v3394_v27  ;;  %v5736_v62 = vld [vmem:[#allocation35_spill] sm:$0xff] }
 0x679   :  { %v2123_v21 = vadd.f32 %v5193_v10, %v1880_v28  ;;  %v2130_v35 = vadd.f32 %v5222_v29, %v2045_v15  ;;  %v2210_v9 = vpack.c.bf16 %v2168_v42, %v2165_v50  ;;  %v2214_v16 = vpack.c.bf16 %v2175_v58, %v2172_v7  ;;  %v3396_v23 = vpop.eup %3395 }
 0x67a   :  { %v2170_v59 = vmul.f32 %v2122_v37, %v1691_v12  ;;  %v2181_v3 = vmul.f32 %v2133_v13, %v1702_v18  ;;  %v1694_v54 = vmul.f32 %v5084_v2, %v5734_v8  ;;  %v1708_v44 = vmul.f32 %v1660_v38, %v5175_v57  ;;  %v3398_v5 = vpop.eup %3397  ;;  %v5735_v57 = vld [vmem:[#allocation34_spill] sm:$0xff]  ;;  %v5737_v8 = vld [vmem:[#allocation36_spill] sm:$0xff] }
 0x67b   :  { %v2171_v46 = vmul.f32 %v2123_v21, %v1692_v1  ;;  %v2178_v24 = vmul.f32 %v2130_v35, %v1699_v43  ;;  %v1884_v30 = vpop.f32.mrb[34].mxu0  ;;  %v3136_v20 = vpop.f32.mrb[48].mxu1  ;;  %2469 = vmatprep.mubr.bf16.mxu1 %v2210_v9  ;;  %3166 = vmatprep.mubr.bf16.mxu0 %v2214_v16  ;;  %v1695_v11 = vmul.f32 %v5089_v0, %v5065_v52  ;;  %v1672_v0 = vadd.f32 1.0, %v3396_v23  ;;  %v5740_v23 = vld [vmem:[#allocation19_spill] sm:$0xff] }
 0x67c   :  { %v2125_v50 = vadd.f32 %v5186_v31, %v1884_v30  ;;  %v2139_v61 = vadd.f32 %v3136_v20, %v5222_v29  ;;  %v1886_v27 = vpop.f32.mrb[35].mxu0  ;;  %v2055_v58 = vpop.f32.mrb[49].mxu1  ;;  %2470 = vmatmul.mubr.bf16.gmra.mrb[60].mxu1 %v2209_v14  ;;  %v1705_v12 = vmul.f32 %v5282_v55, %v5171_v22  ;;  %v1697_v38 = vmul.f32 %v5111_v4, %v5735_v57 }
 0x67d   :  { %v2126_v2 = vadd.f32 %v5193_v10, %v1886_v27  ;;  %v2136_v42 = vadd.f32 %v5222_v29, %v2055_v58  ;;  %v2217_v7 = vpack.c.bf16 %v2181_v3, %v2178_v24  ;;  %v1698_v52 = vmul.f32 %v5113_v45, %v5736_v62 }
 0x67e   :  { %v2173_v49 = vmul.f32 %v2125_v50, %v1694_v54  ;;  %v2187_v18 = vmul.f32 %v2139_v61, %v1708_v44  ;;  %v1714_v13 = vmul.f32 %v1666_v19, %v5173_v60  ;;  %v1711_v43 = vmul.f32 %v5243_v56, %v5154_v36  ;;  %v5738_v54 = vld [vmem:[#allocation43_spill] sm:$0xff] }
 0x67f   :  { %v2174_v25 = vmul.f32 %v2126_v2, %v1695_v11  ;;  %v2184_v1 = vmul.f32 %v2136_v42, %v1705_v12  ;;  %v1890_v37 = vpop.f32.mrb[36].mxu0  ;;  %v3139_v28 = vpop.f32.mrb[50].mxu1  ;;  %3167 = vmatmul.mubr.bf16.gmra.mrb[60].mxu0 %v2217_v7  ;;  %v1675_v60 = vadd.f32 1.0, %v5288_v26  ;;  %v1534_v35 = vmul.f32 0.5, %v5212_v39  ;;  %v5739_v26 = vld [vmem:[#allocation37_spill] sm:$0xff]  ;;  %v5742_v42 = vld [vmem:[#allocation39_spill] sm:$0xff] }
 0x680   :  { %v2128_v22 = vadd.f32 %v5186_v31, %v1890_v37  ;;  %v2145_v55 = vadd.f32 %v3139_v28, %v5222_v29  ;;  %v1892_v33 = vpop.f32.mrb[37].mxu0  ;;  %v2065_v4 = vpop.f32.mrb[51].mxu1  ;;  %v2212_v15 = vpack.c.bf16 %v2173_v49, %v2170_v59  ;;  %v1678_v19 = vadd.f32 1.0, %v3398_v5  ;;  %v5741_v5 = vld [vmem:[#allocation9_spill] sm:$0xff]  ;;  %v5743_v7 = vld [vmem:[#allocation47_spill] sm:$0xff] }
 0x681   :  { %v2129_v45 = vadd.f32 %v5193_v10, %v1892_v33  ;;  %v2142_v47 = vadd.f32 %v5222_v29, %v2065_v4  ;;  %v2213_v14 = vpack.c.bf16 %v2174_v25, %v2171_v46  ;;  %v2220_v21 = vpack.c.bf16 %v2187_v18, %v2184_v1 }
 0x682   :  { %v2176_v9 = vmul.f32 %v2128_v22, %v1697_v38  ;;  %v2193_v16 = vmul.f32 %v2145_v55, %v1714_v13  ;;  %v1700_v36 = vmul.f32 %v5738_v54, %v5737_v8  ;;  %v1720_v46 = vmul.f32 %v1672_v0, %v1528_v63  ;;  %v5744_v0 = vld [vmem:[#allocation41_spill] sm:$0xff] }
 0x683   :  { %v2177_v3 = vmul.f32 %v2129_v45, %v1698_v52  ;;  %v2190_v24 = vmul.f32 %v2142_v47, %v1711_v43  ;;  %v1896_v56 = vpop.f32.mrb[38].mxu0  ;;  %v3142_v59 = vpop.f32.mrb[52].mxu1  ;;  %2477 = vmatprep.mubr.bf16.mxu1 %v2213_v14  ;;  %3170 = vmatprep.mubr.bf16.mxu0 %v2220_v21  ;;  %v1701_v39 = vmul.f32 %v5740_v23, %v5739_v26  ;;  %v1577_v45 = vmul.f32 0.70710677, %v5248_v6 }
 0x684   :  { %v2131_v30 = vadd.f32 %v5186_v31, %v1896_v56  ;;  %v2151_v20 = vadd.f32 %v3142_v59, %v5222_v29  ;;  %v1898_v50 = vpop.f32.mrb[39].mxu0  ;;  %v2075_v44 = vpop.f32.mrb[53].mxu1  ;;  %2478 = vmatmul.mubr.bf16.gmra.mrb[64].mxu1 %v2212_v15  ;;  %v1717_v11 = vmul.f32 %v1669_v32, %v5237_v51  ;;  %v5352_v2 = vadd.f32 %v5741_v5, %v4908_v48  ;;  %v5745_v51 = vld [vmem:[#allocation50_spill] sm:$0xff]  ;;  %v5752_v59 = vld [vmem:[#allocation44_spill] sm:$0xff] }
 0x685   :  { %v2132_v61 = vadd.f32 %v5193_v10, %v1898_v50  ;;  %v2148_v27 = vadd.f32 %v5222_v29, %v2075_v44  ;;  %v2223_v58 = vpack.c.bf16 %v2193_v16, %v2190_v24  ;;  %v1703_v49 = vmul.f32 %v5743_v7, %v5742_v42  ;;  %v5746_v15 = vld [vmem:[#allocation54_spill] sm:$0xff]  ;;  %v5750_v24 = vld [vmem:[#allocation51_spill] sm:$0xff]  ;;  %v5756_v44 = vld [vmem:[#allocation56_spill] sm:$0xff] }
 0x686   :  { %v2179_v63 = vmul.f32 %v2131_v30, %v1700_v36  ;;  %v2199_v12 = vmul.f32 %v2151_v20, %v1720_v46  ;;  %v1726_v62 = vmul.f32 %v1678_v19, %v1534_v35  ;;  %v1704_v32 = vmul.f32 %v5745_v51, %v5744_v0  ;;  %v5747_v35 = vld [vmem:[#allocation16_spill] sm:$0xff] }
 0x687   :  { %v2180_v18 = vmul.f32 %v2132_v61, %v1701_v39  ;;  %v2196_v57 = vmul.f32 %v2148_v27, %v1717_v11  ;;  %v1902_v38 = vpop.f32.mrb[40].mxu0  ;;  %v3145_v52 = vpop.f32.mrb[54].mxu1  ;;  %3171 = vmatmul.mubr.bf16.gmra.mrb[64].mxu0 %v2223_v58  ;;  %v1723_v13 = vmul.f32 %v1675_v60, %v5231_v34  ;;  %3399 = verf.f32 %v5746_v15  ;;  %v5753_v30 = vld [vmem:[#allocation52_spill] sm:$0xff] }
 0x688   :  { %v2134_v25 = vadd.f32 %v5186_v31, %v1902_v38  ;;  %v2157_v1 = vadd.f32 %v3145_v52, %v5222_v29  ;;  %v1904_v37 = vpop.f32.mrb[41].mxu0  ;;  %v2085_v28 = vpop.f32.mrb[55].mxu1  ;;  %v2215_v22 = vpack.c.bf16 %v2179_v63, %v2176_v9  ;;  %v1578_v21 = vmul.f32 0.70710677, %v5352_v2  ;;  %v5755_v39 = vld [vmem:[#allocation40_spill] sm:$0xff]  ;;  %v5760_v38 = vld [vmem:[#allocation58_spill] sm:$0xff] }
 0x689   :  { %v2135_v55 = vadd.f32 %v5193_v10, %v1904_v37  ;;  %v2154_v33 = vadd.f32 %v5222_v29, %v2085_v28  ;;  %v2216_v43 = vpack.c.bf16 %v2180_v18, %v2177_v3  ;;  %v2226_v4 = vpack.c.bf16 %v2199_v12, %v2196_v57  ;;  %v5748_v29 = vld [vmem:[#allocation10_spill] sm:$0xff]  ;;  %v5757_v63 = vld [vmem:[#allocation20_spill] sm:$0xff]  ;;  %v5758_v12 = vld [vmem:[#allocation57_spill] sm:$0xff] }
 0x68a   :  { %v2182_v47 = vmul.f32 %v2134_v25, %v1703_v49  ;;  %v2205_v14 = vmul.f32 %v2157_v1, %v1726_v62  ;;  %v5368_v16 = vadd.f32 %v5747_v35, %v4903_v53  ;;  %3401 = verf.f32 %v5229_v17  ;;  %v5749_v3 = vld [vmem:[#allocation42_spill] sm:$0xff]  ;;  %v5751_v53 = vld [vmem:[#allocation55_spill] sm:$0xff]  ;;  %v5759_v18 = vld [vmem:[#allocation4_spill] sm:$0xff] }
 0x68b   :  { %v2183_v34 = vmul.f32 %v2135_v55, %v1704_v32  ;;  %v2202_v60 = vmul.f32 %v2154_v33, %v1723_v13  ;;  %v1908_v9 = vpop.f32.mrb[42].mxu0  ;;  %2485 = vmatprep.mubr.bf16.mxu1 %v2216_v43  ;;  %3174 = vmatprep.mubr.bf16.mxu0 %v2226_v4  ;;  %v5373_v19 = vadd.f32 %v5748_v29, %v4908_v48  ;;  %v1662_v56 = vadd.f32 1.0, %v5751_v53  ;;  %v5754_v17 = vld [vmem:[#allocation38_spill] sm:$0xff]  ;;  %v5761_v52 = vld [vmem:[#allocation45_spill] sm:$0xff]  ;;  %v5763_v15 = vld [vmem:[#allocation48_spill] sm:$0xff] }
 0x68c   :  { %v1706_v8 = vmul.f32 %v5750_v24, %v5749_v3  ;;  %v2137_v54 = vadd.f32 %v5186_v31, %v1908_v9  ;;  %v1910_v36 = vpop.f32.mrb[43].mxu0  ;;  %2486 = vmatmul.mubr.bf16.gmra.mrb[68].mxu1 %v2215_v22  ;;  %v1707_v46 = vmul.f32 %v5753_v30, %v5752_v59  ;;  %v1520_v23 = vmul.f32 0.5, %v5754_v17  ;;  %v5762_v1 = vld [vmem:[#allocation46_spill] sm:$0xff]  ;;  %v5765_v29 = vld [vmem:[#allocation53_spill] sm:$0xff] }
 0x68d   :  { %v2138_v20 = vadd.f32 %v5193_v10, %v1910_v36  ;;  %v2229_v26 = vpack.c.bf16 %v2205_v14, %v2202_v60  ;;  %v1521_v48 = vmul.f32 0.5, %v5755_v39  ;;  %3403 = verf.f32 %v1577_v45  ;;  %v5764_v60 = vld [vmem:[#allocation49_spill] sm:$0xff] }
 0x68e   :  { %v2185_v50 = vmul.f32 %v2137_v54, %v1706_v8  ;;  %v1664_v61 = vadd.f32 1.0, %v5756_v44  ;;  %3405 = verf.f32 %v1578_v21  ;;  %v1580_v11 = vmul.f32 0.70710677, %v5368_v16  ;;  %v5766_v8 = vld [vmem:[#allocation22_spill] sm:$0xff]  ;;  %v5767_v59 = vld [vmem:[#allocation21_spill] sm:$0xff]  ;;  %v5768_v44 = vld [vmem:[#allocation23_spill] sm:$0xff] }
 0x68f   :  { %v2186_v27 = vmul.f32 %v2138_v20, %v1707_v46  ;;  %v1914_v58 = vpop.f32.mrb[44].mxu0  ;;  %3175 = vmatmul.mubr.bf16.gmra.mrb[68].mxu0 %v2229_v26  ;;  %v1581_v5 = vmul.f32 0.70710677, %v5373_v19  ;;  %v1709_v42 = vmul.f32 %v5758_v12, %v5757_v63  ;;  %v1665_v62 = vadd.f32 1.0, %v5760_v38  ;;  %v5769_v63 = vld [vmem:[#allocation24_spill] sm:$0xff] }
 0x690   :  { %v2140_v7 = vadd.f32 %v5186_v31, %v1914_v58  ;;  %v1916_v49 = vpop.f32.mrb[45].mxu0  ;;  %3180 = vmatprep.mubr.msk.f32.mxu0 %vm257_vm1, %v5759_v18  ;;  %v2218_v57 = vpack.c.bf16 %v2185_v50, %v2182_v47  ;;  %v1710_v0 = vmul.f32 %v1662_v56, %v5761_v52  ;;  %v1523_v37 = vmul.f32 0.5, %v5762_v1 }
 0x691   :  { %v2141_v51 = vadd.f32 %v5193_v10, %v1916_v49  ;;  %v2219_v32 = vpack.c.bf16 %v2186_v27, %v2183_v34  ;;  %3407 = verf.f32 %v1580_v11  ;;  %v3400_v22 = vpop.eup %3399  ;;  %v1667_v55 = vadd.f32 1.0, %v5271_v41 }
 0x692   :  { %v2188_v25 = vmul.f32 %v2140_v7, %v1709_v42  ;;  %3409 = verf.f32 %v1581_v5  ;;  %v1712_v33 = vmul.f32 %v1664_v61, %v1520_v23  ;;  %v1524_v45 = vmul.f32 0.5, %v5763_v15 }
 0x693   :  { %v2189_v13 = vmul.f32 %v2141_v51, %v1710_v0  ;;  %v1920_v28 = vpop.f32.mrb[46].mxu0  ;;  %2493 = vmatprep.mubr.bf16.mxu1 %v2219_v32  ;;  %v1668_v47 = vadd.f32 1.0, %v5280_v40  ;;  %v1713_v14 = vmul.f32 %v1665_v62, %v1521_v48  ;;  %v1526_v9 = vmul.f32 0.5, %v5764_v60  ;;  %v5770_v51 = vld [vmem:[#allocation25_spill] sm:$0xff] }
 0x694   :  { %v2143_v43 = vadd.f32 %v5186_v31, %v1920_v28  ;;  %v1922_v4 = vpop.f32.mrb[47].mxu0  ;;  %2494 = vmatmul.mubr.bf16.gmra.mrb[72].mxu1 %v2218_v57  ;;  %v3402_v35 = vpop.eup %3401  ;;  %v1527_v3 = vmul.f32 0.5, %v5765_v29  ;;  %v1670_v36 = vadd.f32 1.0, %v3400_v22  ;;  %v1715_v53 = vmul.f32 %v1667_v55, %v1523_v37  ;;  %v5771_v37 = vld [vmem:[#allocation26_spill] sm:$0xff] }
 0x695   :  { %v2144_v21 = vadd.f32 %v5193_v10, %v1922_v4  ;;  %v1671_v20 = vadd.f32 1.0, %v3402_v35  ;;  %v1716_v26 = vmul.f32 %v1668_v47, %v1524_v45  ;;  %v1529_v61 = vmul.f32 0.5, %v5248_v6  ;;  %v5772_v4 = vld [vmem:[#allocation27_spill] sm:$0xff]  ;;  %v5775_v29 = vld [vmem:[#allocation6_spill] sm:$0xff] }
 0x696   :  { %v2191_v34 = vmul.f32 %v2143_v43, %v1712_v33  ;;  %v1718_v27 = vmul.f32 %v1670_v36, %v1526_v9  ;;  %v1530_v42 = vmul.f32 0.5, %v5352_v2  ;;  %v1532_v6 = vmul.f32 0.5, %v5368_v16  ;;  %v5774_v9 = vld [vmem:[#allocation12_spill] sm:$0xff] }
 0x697   :  { %v2192_v41 = vmul.f32 %v2144_v21, %v1713_v14  ;;  %v1926_v24 = vpop.f32.mrb[48].mxu0  ;;  %3181 = vmatmul.mubr.msk.f32.vlgmr.msra.gmra.mrb[72].mxu0 %vm257_vm1, %v5766_v8  ;;  %v3404_v54 = vpop.eup %3403  ;;  %v1719_v49 = vmul.f32 %v1671_v20, %v1527_v3  ;;  %v1533_v62 = vmul.f32 0.5, %v5373_v19  ;;  %v5773_v14 = vld [vmem:[#allocation5_spill] sm:$0xff]  ;;  %v5778_v8 = vld [vmem:[#allocation14_spill] sm:$0xff] }
 0x698   :  { %v2146_v56 = vadd.f32 %v5186_v31, %v1926_v24  ;;  %v1928_v40 = vpop.f32.mrb[49].mxu0  ;;  %3183 = vmatprep.mubr.msk.f32.mxu0 %vm257_vm1, %v5767_v59  ;;  %v2221_v30 = vpack.c.bf16 %v2191_v34, %v2188_v25  ;;  %v3406_v46 = vpop.eup %3405  ;;  %v1673_v11 = vadd.f32 1.0, %v3404_v54  ;;  %v5777_v24 = vld [vmem:[#allocation7_spill] sm:$0xff] }
 0x699   :  { %v2147_v17 = vadd.f32 %v5193_v10, %v1928_v40  ;;  %v2222_v23 = vpack.c.bf16 %v2192_v41, %v2189_v13  ;;  %v1674_v7 = vadd.f32 1.0, %v3406_v46  ;;  %v5780_v54 = vld [vmem:[#allocation15_spill] sm:$0xff] }
 0x69a   :  { %v2194_v39 = vmul.f32 %v2146_v56, %v1715_v53  ;;  %v1721_v25 = vmul.f32 %v1673_v11, %v1529_v61  ;;  %v5448_v56 = vld [vmem:[%s5551_s6] ss:$0 sm:$0xff] }
 0x69b   :  { %v2195_v48 = vmul.f32 %v2147_v17, %v1716_v26  ;;  %v1932_v50 = vpop.f32.mrb[50].mxu0  ;;  %2501 = vmatprep.mubr.bf16.mxu1 %v2222_v23  ;;  %3184 = vmatmul.mubr.msk.f32.gmra.mrb[74].mxu0 %vm257_vm1, %v5768_v44  ;;  %v3408_v12 = vpop.eup %3407  ;;  %v1722_v22 = vmul.f32 %v1674_v7, %v1530_v42 }
 0x69c   :  { %v2149_v58 = vadd.f32 %v5186_v31, %v1932_v50  ;;  %v1934_v5 = vpop.f32.mrb[51].mxu0  ;;  %2502 = vmatmul.mubr.bf16.gmra.mrb[76].mxu1 %v2221_v30  ;;  %3186 = vmatprep.mubr.msk.f32.mxu0 %vm257_vm1, %v5769_v63  ;;  %v3410_v57 = vpop.eup %3409  ;;  %v1676_v32 = vadd.f32 1.0, %v3408_v12 }
 0x69d   :  { %v2150_v18 = vadd.f32 %v5193_v10, %v1934_v5  ;;  %v1677_v28 = vadd.f32 1.0, %v3410_v57 }
 0x69e   :  { %v2197_v38 = vmul.f32 %v2149_v58, %v1718_v27  ;;  %v1724_v15 = vmul.f32 %v1676_v32, %v1532_v6 }
 0x69f   :  { %v2198_v52 = vmul.f32 %v2150_v18, %v1719_v49  ;;  %v1938_v0 = vpop.f32.mrb[52].mxu0  ;;  %3187 = vmatmul.mubr.msk.f32.gmra.mrb[76].mxu0 %vm257_vm1, %v5770_v51  ;;  %v1725_v21 = vmul.f32 %v1677_v28, %v1533_v62 }
 0x6a0   :  { %v2152_v1 = vadd.f32 %v5186_v31, %v1938_v0  ;;  %v1940_v2 = vpop.f32.mrb[53].mxu0  ;;  %3189 = vmatprep.mubr.msk.f32.mxu0 %vm257_vm1, %v5771_v37  ;;  %v2224_v13 = vpack.c.bf16 %v2197_v38, %v2194_v39 }
 0x6a1   :  { %v2153_v16 = vadd.f32 %v5193_v10, %v1940_v2  ;;  %v2225_v55 = vpack.c.bf16 %v2198_v52, %v2195_v48 }
 0x6a2   :  { %v2200_v19 = vmul.f32 %v2152_v1, %v1721_v25 }
 0x6a3   :  { %v2201_v33 = vmul.f32 %v2153_v16, %v1722_v22  ;;  %v1944_v43 = vpop.f32.mrb[54].mxu0  ;;  %2509 = vmatprep.mubr.bf16.mxu1 %v2225_v55  ;;  %3190 = vmatmul.mubr.msk.f32.gmra.mrb[78].mxu0 %vm257_vm1, %v5772_v4 }
 0x6a4   :  { %v2155_v45 = vadd.f32 %v5186_v31, %v1944_v43  ;;  %v1946_v47 = vpop.f32.mrb[55].mxu0  ;;  %2510 = vmatmul.mubr.bf16.gmra.mrb[80].mxu1 %v2224_v13  ;;  %3192 = vmatprep.mubr.msk.f32.mxu0 %vm257_vm1, %v5773_v14  ;;  %v5776_v31 = vld [vmem:[#allocation13_spill] sm:$0xff] }
 0x6a5   :  { %v2156_v35 = vadd.f32 %v5193_v10, %v1946_v47  ;;  %v5779_v10 = vld [vmem:[#allocation8_spill] sm:$0xff] }
 0x6a6   :  { %v2203_v34 = vmul.f32 %v2155_v45, %v1724_v15 }
 0x6a7   :  { %v2204_v60 = vmul.f32 %v2156_v35, %v1725_v21  ;;  %3193 = vmatmul.mubr.msk.f32.gmra.mrb[80].mxu0 %vm257_vm1, %v5774_v9 }
 0x6a8   :  { %3195 = vmatprep.mubr.msk.f32.mxu0 %vm257_vm1, %v5775_v29  ;;  %v2227_v3 = vpack.c.bf16 %v2203_v34, %v2200_v19 }
 0x6a9   :  { %v2228_v41 = vpack.c.bf16 %v2204_v60, %v2201_v33 }
 0x6ab   :  { %2517 = vmatprep.mubr.bf16.mxu1 %v2228_v41  ;;  %3196 = vmatmul.mubr.msk.f32.gmra.mrb[82].mxu0 %vm257_vm1, %v5776_v31 }
 0x6ac   :  { %2518 = vmatmul.mubr.bf16.gmra.mrb[84].mxu1 %v2227_v3  ;;  %3198 = vmatprep.mubr.msk.f32.mxu0 %vm257_vm1, %v5777_v24 }
 0x6af   :  { %3199 = vmatmul.mubr.msk.f32.gmra.mrb[84].mxu0 %vm257_vm1, %v5778_v8 }
 0x6b0   :  { %3201 = vmatprep.mubr.msk.f32.mxu0 %vm257_vm1, %v5779_v10 }
 0x6b3   :  { %3202 = vmatmul.mubr.msk.f32.gmra.mrb[86].mxu0 %vm257_vm1, %v5780_v54  ;;  %vm5781_vm1 = vcmask 261120  }
 0x6b4   :  { %vm5782_vm13 = vmmov %vm5781_vm1 }
 0x6b5   :  { %vm5783_vm14 = vmmov %vm5781_vm1 }
 0x6b6   :  { %vm5784_vm15 = vmmov %vm5781_vm1 }
 0x6b7   :  { %vm5785_vm0 = vmmov %vm5781_vm1 }
 0x6b8   :  { %vm5786_vm2 = vmmov %vm5785_vm0 }
 0x6b9   :  { %vm5787_vm4 = vmmov %vm5785_vm0 }
 0x6ba   :  { %vm5788_vm3 = vmmov %vm5785_vm0 }
 0x6bb   :  { %vm5789_vm5 = vmmov %vm5785_vm0 }
 0x6bc   :  { %vm5790_vm6 = vmmov %vm5785_vm0 }
 0x6bd   :  { %vm5791_vm7 = vmmov %vm5785_vm0 }
 0x6be   :  { %vm5792_vm8 = vmmov %vm5785_vm0 }
 0x6bf   :  { %vm5793_vm9 = vmmov %vm5785_vm0 }
 0x6c0   :  { %vm5794_vm10 = vmmov %vm5785_vm0 }
 0x6c1   :  { %vm5795_vm11 = vmmov %vm5785_vm0 }
 0x6c2   :  { %vm5796_vm12 = vmmov %vm5785_vm0 }
 0x747   :  { %v2987_v36 = vpop.f32.mrb[56].mxu1 }
 0x748   :  { %v2988_v53 = vpop.f32.mrb[57].mxu1 }
 0x749   :  { %v2989_v40 = vadd.f32 %v2988_v53, %v2987_v36  ;;  %v2990_v59 = vpop.f32.mrb[58].mxu1 }
 0x74a   :  { %v2991_v30 = vpop.f32.mrb[59].mxu1  ;;  %v3164_v46 = vpop.f32.mrb[56].mxu0 }
 0x74b   :  { %v2992_v20 = vadd.f32 %v2991_v30, %v2990_v59  ;;  %v2464_v26 = vadd.f32 %v2989_v40, %v5448_v56  ;;  %v2560_v17 = vpop.f32.mrb[57].mxu0 }
 0x74c   :  { %v3165_v23 = vpop.f32.mrb[58].mxu0 }
 0x74d   :  { %v2561_v39 = vadd.f32 %v2560_v17, %v2464_v26  ;;  %v2467_v48 = vadd.f32 %v2992_v20, %v5448_v56  ;;  %v2563_v50 = vpop.f32.mrb[59].mxu0 }
 0x74f   :  { %v2564_v44 = vadd.f32 %v2563_v50, %v2467_v48  ;;  %v2993_v61 = vpop.f32.mrb[60].mxu1 }
 0x750   :  { %v2994_v11 = vpop.f32.mrb[61].mxu1 }
 0x751   :  { %v2995_v27 = vadd.f32 %v2994_v11, %v2993_v61  ;;  %v2996_v58 = vpop.f32.mrb[62].mxu1 }
 0x752   :  { %v2997_v5 = vpop.f32.mrb[63].mxu1  ;;  %v3168_v63 = vpop.f32.mrb[60].mxu0 }
 0x753   :  { %v2472_v12 = vadd.f32 %v2995_v27, %v5448_v56  ;;  %v2998_v42 = vadd.f32 %v2997_v5, %v2996_v58  ;;  %v2576_v7 = vpop.f32.mrb[61].mxu0 }
 0x754   :  { %v3169_v49 = vpop.f32.mrb[62].mxu0 }
 0x755   :  { %v2475_v18 = vadd.f32 %v2998_v42, %v5448_v56  ;;  %v2579_v57 = vpop.f32.mrb[63].mxu0  ;;  %v2569_v38 = vadd.f32 %v3164_v46, %v2472_v12 }
 0x757   :  { %v2999_v6 = vpop.f32.mrb[64].mxu1  ;;  %v2572_v62 = vadd.f32 %v3165_v23, %v2475_v18 }
 0x758   :  { %v3000_v52 = vpop.f32.mrb[65].mxu1 }
 0x759   :  { %v3001_v0 = vadd.f32 %v3000_v52, %v2999_v6  ;;  %v3002_v51 = vpop.f32.mrb[66].mxu1 }
 0x75a   :  { %v3003_v32 = vpop.f32.mrb[67].mxu1  ;;  %v3172_v25 = vpop.f32.mrb[64].mxu0 }
 0x75b   :  { %v2480_v1 = vadd.f32 %v3001_v0, %v5448_v56  ;;  %v3004_v2 = vadd.f32 %v3003_v32, %v3002_v51  ;;  %v2592_v37 = vpop.f32.mrb[65].mxu0 }
 0x75c   :  { %v3173_v13 = vpop.f32.mrb[66].mxu0 }
 0x75d   :  { %v2483_v28 = vadd.f32 %v3004_v2, %v5448_v56  ;;  %v2595_v22 = vpop.f32.mrb[67].mxu0  ;;  %v2577_v16 = vadd.f32 %v2576_v7, %v2480_v1 }
 0x75f   :  { %v3005_v55 = vpop.f32.mrb[68].mxu1  ;;  %v2580_v19 = vadd.f32 %v2579_v57, %v2483_v28 }
 0x760   :  { %v3006_v33 = vpop.f32.mrb[69].mxu1 }
 0x761   :  { %v3007_v43 = vadd.f32 %v3006_v33, %v3005_v55  ;;  %v3008_v4 = vpop.f32.mrb[70].mxu1 }
 0x762   :  { %v3009_v15 = vpop.f32.mrb[71].mxu1  ;;  %v5456_v45 = vpop.f32.mrb[68].mxu0 }
 0x763   :  { %v2488_v47 = vadd.f32 %v3007_v43, %v5448_v56  ;;  %v3010_v14 = vadd.f32 %v3009_v15, %v3008_v4  ;;  %v5459_v21 = vpop.f32.mrb[69].mxu0 }
 0x764   :  { %v5461_v35 = vpop.f32.mrb[70].mxu0 }
 0x765   :  { %v2491_v34 = vadd.f32 %v3010_v14, %v5448_v56  ;;  %v5464_v60 = vpop.f32.mrb[71].mxu0  ;;  %v2585_v9 = vadd.f32 %v3168_v63, %v2488_v47 }
 0x767   :  { %v3011_v29 = vpop.f32.mrb[72].mxu1  ;;  %v2588_v3 = vadd.f32 %v3169_v49, %v2491_v34 }
 0x768   :  { %v3012_v41 = vpop.f32.mrb[73].mxu1 }
 0x769   :  { %v3013_v31 = vadd.f32 %v3012_v41, %v3011_v29  ;;  %v3014_v24 = vpop.f32.mrb[74].mxu1 }
 0x76a   :  { %v3015_v8 = vpop.f32.mrb[75].mxu1  ;;  %v3182_v10 = vpop.f32.mrb[72].mxu0 }
 0x76b   :  { %v2496_v54 = vadd.f32 %v3013_v31, %v5448_v56  ;;  %v3016_v36 = vadd.f32 %v3015_v8, %v3014_v24  ;;  %v2773_v53 = vadd.f32 %v3182_v10, %v2564_v44  ;;  %v2693_v40 = vpop.f32.mrb[73].mxu0 }
 0x76c   :  { %v2772_v59 = vadd.f32 %v2693_v40, %v2561_v39 }
 0x76d   :  { %v2499_v30 = vadd.f32 %v3016_v36, %v5448_v56  ;;  %2789 = vst.msk [vmem:[%s5552_s10 + $0x8] sm:$0xff] %vm5781_vm1, %v2773_v53  ;;  %v2593_v46 = vadd.f32 %v2592_v37, %v2496_v54 }
 0x76e   :  { %2788 = vst.msk [vmem:[%s5552_s10] sm:$0xff] %vm5782_vm13, %v2772_v59  ;;  %v3185_v20 = vpop.f32.mrb[74].mxu0 }
 0x76f   :  { %v2775_v26 = vadd.f32 %v3185_v20, %v2572_v62  ;;  %v3017_v17 = vpop.f32.mrb[76].mxu1  ;;  %v2703_v23 = vpop.f32.mrb[75].mxu0  ;;  %v2596_v48 = vadd.f32 %v2595_v22, %v2499_v30 }
 0x770   :  { %v2774_v50 = vadd.f32 %v2703_v23, %v2569_v38  ;;  %v3018_v39 = vpop.f32.mrb[77].mxu1 }
 0x771   :  { %2791 = vst.msk [vmem:[%s5552_s10 + $0x18] sm:$0xff] %vm5783_vm14, %v2775_v26  ;;  %v3019_v44 = vadd.f32 %v3018_v39, %v3017_v17  ;;  %v3020_v61 = vpop.f32.mrb[78].mxu1 }
 0x772   :  { %2790 = vst.msk [vmem:[%s5552_s10 + $0x10] sm:$0xff] %vm5784_vm15, %v2774_v50  ;;  %v3021_v11 = vpop.f32.mrb[79].mxu1  ;;  %v3188_v27 = vpop.f32.mrb[76].mxu0 }
 0x773   :  { %v2504_v58 = vadd.f32 %v3019_v44, %v5448_v56  ;;  %v3022_v5 = vadd.f32 %v3021_v11, %v3020_v61  ;;  %v2777_v63 = vadd.f32 %v3188_v27, %v2580_v19  ;;  %v2713_v12 = vpop.f32.mrb[77].mxu0 }
 0x774   :  { %v2776_v42 = vadd.f32 %v2713_v12, %v2577_v16 }
 0x775   :  { %v2507_v7 = vadd.f32 %v3022_v5, %v5448_v56  ;;  %2793 = vst.msk [vmem:[%s5552_s10 + $0x28] sm:$0xff] %vm5785_vm0, %v2777_v63  ;;  %v2601_v49 = vadd.f32 %v3172_v25, %v2504_v58 }
 0x776   :  { %2792 = vst.msk [vmem:[%s5552_s10 + $0x20] sm:$0xff] %vm5786_vm2, %v2776_v42  ;;  %v3191_v18 = vpop.f32.mrb[78].mxu0 }
 0x777   :  { %v2779_v57 = vadd.f32 %v3191_v18, %v2588_v3  ;;  %v3023_v38 = vpop.f32.mrb[80].mxu1  ;;  %v2723_v6 = vpop.f32.mrb[79].mxu0  ;;  %v2604_v62 = vadd.f32 %v3173_v13, %v2507_v7 }
 0x778   :  { %v2778_v52 = vadd.f32 %v2723_v6, %v2585_v9  ;;  %v3024_v0 = vpop.f32.mrb[81].mxu1 }
 0x779   :  { %2795 = vst.msk [vmem:[%s5552_s10 + $0x38] sm:$0xff] %vm5787_vm4, %v2779_v57  ;;  %v3025_v51 = vadd.f32 %v3024_v0, %v3023_v38  ;;  %v3026_v32 = vpop.f32.mrb[82].mxu1 }
 0x77a   :  { %2794 = vst.msk [vmem:[%s5552_s10 + $0x30] sm:$0xff] %vm5788_vm3, %v2778_v52  ;;  %v3027_v25 = vpop.f32.mrb[83].mxu1  ;;  %v3194_v1 = vpop.f32.mrb[80].mxu0 }
 0x77b   :  { %v2512_v2 = vadd.f32 %v3025_v51, %v5448_v56  ;;  %v3028_v37 = vadd.f32 %v3027_v25, %v3026_v32  ;;  %v2781_v13 = vadd.f32 %v3194_v1, %v2596_v48  ;;  %v2733_v28 = vpop.f32.mrb[81].mxu0 }
 0x77c   :  { %v2780_v22 = vadd.f32 %v2733_v28, %v2593_v46 }
 0x77d   :  { %v2515_v16 = vadd.f32 %v3028_v37, %v5448_v56  ;;  %2797 = vst.msk [vmem:[%s5552_s10 + $0x48] sm:$0xff] %vm5789_vm5, %v2781_v13  ;;  %v2609_v55 = vadd.f32 %v5459_v21, %v2512_v2 }
 0x77e   :  { %2796 = vst.msk [vmem:[%s5552_s10 + $0x40] sm:$0xff] %vm5790_vm6, %v2780_v22  ;;  %v3197_v19 = vpop.f32.mrb[82].mxu0 }
 0x77f   :  { %v2783_v33 = vadd.f32 %v3197_v19, %v2604_v62  ;;  %v3029_v43 = vpop.f32.mrb[84].mxu1  ;;  %v2743_v4 = vpop.f32.mrb[83].mxu0  ;;  %v2612_v15 = vadd.f32 %v5464_v60, %v2515_v16 }
 0x780   :  { %v2782_v47 = vadd.f32 %v2743_v4, %v2601_v49  ;;  %v3030_v14 = vpop.f32.mrb[85].mxu1 }
 0x781   :  { %2799 = vst.msk [vmem:[%s5552_s10 + $0x58] sm:$0xff] %vm5791_vm7, %v2783_v33  ;;  %v3031_v34 = vadd.f32 %v3030_v14, %v3029_v43  ;;  %v3032_v21 = vpop.f32.mrb[86].mxu1 }
 0x782   :  { %2798 = vst.msk [vmem:[%s5552_s10 + $0x50] sm:$0xff] %vm5792_vm8, %v2782_v47  ;;  %v3033_v9 = vpop.f32.mrb[87].mxu1  ;;  %v3200_v29 = vpop.f32.mrb[84].mxu0 }
 0x783   :  { %v2520_v3 = vadd.f32 %v3031_v34, %v5448_v56  ;;  %v3034_v41 = vadd.f32 %v3033_v9, %v3032_v21  ;;  %v2785_v60 = vadd.f32 %v3200_v29, %v2612_v15  ;;  %v2753_v31 = vpop.f32.mrb[85].mxu0 }
 0x784   :  { %v2784_v24 = vadd.f32 %v2753_v31, %v2609_v55 }
 0x785   :  { %v2523_v8 = vadd.f32 %v3034_v41, %v5448_v56  ;;  %2801 = vst.msk [vmem:[%s5552_s10 + $0x68] sm:$0xff] %vm5793_vm9, %v2785_v60  ;;  %v2617_v10 = vadd.f32 %v5456_v45, %v2520_v3 }
 0x786   :  { %2800 = vst.msk [vmem:[%s5552_s10 + $0x60] sm:$0xff] %vm5794_vm10, %v2784_v24  ;;  %v3203_v54 = vpop.f32.mrb[86].mxu0 }
 0x787   :  { %v2620_v36 = vadd.f32 %v5461_v35, %v2523_v8  ;;  %v2763_v53 = vpop.f32.mrb[87].mxu0 }
 0x788   :  { %v2786_v40 = vadd.f32 %v2763_v53, %v2617_v10 }
 0x789   :  { %v2787_v59 = vadd.f32 %v3203_v54, %v2620_v36 }
 0x78a   :  { %2802 = vst.msk [vmem:[%s5552_s10 + $0x70] sm:$0xff] %vm5795_vm11, %v2786_v40 }
 0x78b   :  { %2803 = vst.msk [vmem:[%s5552_s10 + $0x78] sm:$0xff] %vm5796_vm12, %v2787_v59 }

</bundles_post_ra>
